<compile_context>
chip_gen: v7x
topology: tpu7x:2x2x1
jax: 0.10.0
libtpu: 0.0.40
codegen_flags: <defaults>
</compile_context>

<pallas_src>
import functools

import jax
import jax.numpy as jnp
import numpy as np
from jax import lax
from jax.experimental import pallas as pl
from jax.experimental.pallas import tpu as pltpu

_EPS = 1e-5


def _vmem_limit_bytes():
    """~3/4 of physical VMEM (v7x 64MiB -> 48MiB, v5e/v6e 128MiB -> 96MiB)."""
    cap = 64 * 1024 * 1024            # conservative fallback = v7x physical VMEM
    try:
        cap = int(pltpu.get_tpu_info().vmem_capacity_bytes)
    except Exception:
        pass
    return max(32 * 1024 * 1024, min((cap * 3) // 4, 112 * 1024 * 1024))


# ----------------------------------------------------------------------------
# In-kernel helpers
# ----------------------------------------------------------------------------
def _bn_scale_shift(stats, gamma, beta, mtot, eps):
    """Fold training-mode BatchNorm (batch stats, biased var) into scale/shift (1,C)."""
    c = gamma.shape[-1]
    inv = 1.0 / mtot
    mean = stats[:, :c] * inv
    var = stats[:, c:] * inv - mean * mean
    scale = gamma * lax.rsqrt(var + eps)
    shift = beta - mean * scale
    return scale, shift


def _write_stats(s_ref, v, c):
    """Per-channel partial (sum, sum_sq) of v:(M,C) for this grid step.

    XLU sublane reduction (keeps the MXU free for the conv matmuls); no (M,2C)
    concatenation is materialized."""
    s_ref[:, :c] = jnp.sum(v, axis=0, keepdims=True)
    s_ref[:, c:] = jnp.sum(v * v, axis=0, keepdims=True)


# ----------------------------------------------------------------------------
# Pass 1: conv1 (3x3, stride 1|2) [+ AvgPool->1x1 shortcut conv] + partial stats
# ----------------------------------------------------------------------------
def _conv1_kernel(ph_ref, w1_ref, *rest, stride, ho, wo, cin, cout, downsample):
    if downsample:
        ws_ref, z1_ref, s1_ref, zsc_ref, ssc_ref = rest
    else:
        z1_ref, s1_ref = rest
    m = ho * wo

    # 3x3 conv as 9 accumulated (M,Cin)@(Cin,Cout) bf16 MXU matmuls into an f32
    # accumulator: no 9x im2col patches tensor is ever materialized in VMEM.
    acc = None
    for di in range(3):
        for dj in range(3):
            if stride == 1:
                sl = ph_ref[0, di:di + ho, dj:dj + wo, :]
            else:
                p = (di % 2) * 2 + (dj % 2)
                sl = ph_ref[p, di // 2:di // 2 + ho, dj // 2:dj // 2 + wo, :]
            part = jnp.dot(sl.reshape(m, cin), w1_ref[di * 3 + dj],
                           preferred_element_type=jnp.float32)
            acc = part if acc is None else acc + part

    _write_stats(s1_ref, acc, cout)
    z1_ref[...] = acc.astype(z1_ref.dtype)

    if downsample:
        # AvgPool2d(2,2) of the *unpadded* input, recovered from the padded
        # even/odd phases, followed by the 1x1 shortcut conv (its BN is pass 3).
        avg = 0.25 * (ph_ref[3, 0:ho, 0:wo, :].astype(jnp.float32)
                      + ph_ref[2, 0:ho, 1:wo + 1, :].astype(jnp.float32)
                      + ph_ref[1, 1:ho + 1, 0:wo, :].astype(jnp.float32)
                      + ph_ref[0, 1:ho + 1, 1:wo + 1, :].astype(jnp.float32))
        zsc = jnp.dot(avg.reshape(m, cin).astype(jnp.bfloat16), ws_ref[...],
                      preferred_element_type=jnp.float32)
        _write_stats(ssc_ref, zsc, cout)
        zsc_ref[...] = zsc.astype(zsc_ref.dtype)


# ----------------------------------------------------------------------------
# Pass 2: BN1(batch stats) + ReLU + conv2 (3x3, stride 1) + partial BN2 stats
# ----------------------------------------------------------------------------
def _conv2_kernel(z1_ref, s1_ref, g1_ref, b1_ref, w2_ref, z2_ref, s2_ref, ypad,
                  *, mtot, ho, wo, cout, eps):
    m = ho * wo

    scale1, shift1 = _bn_scale_shift(s1_ref[...], g1_ref[...], b1_ref[...],
                                     mtot, eps)
    y1 = jnp.maximum(z1_ref[...].astype(jnp.float32) * scale1 + shift1, 0.0)

    # Zero-padded conv2 input: ONE bulk interior store + 4 halo strips.  The halo
    # is re-zeroed every step so this stays correct under "parallel" (megacore)
    # scheduling; no per-column masked-store scatter.
    ypad[0:1, :, :] = jnp.zeros((1, wo + 2, cout), ypad.dtype)
    ypad[ho + 1:ho + 2, :, :] = jnp.zeros((1, wo + 2, cout), ypad.dtype)
    ypad[:, 0:1, :] = jnp.zeros((ho + 2, 1, cout), ypad.dtype)
    ypad[:, wo + 1:wo + 2, :] = jnp.zeros((ho + 2, 1, cout), ypad.dtype)
    ypad[1:ho + 1, 1:wo + 1, :] = y1.reshape(ho, wo, cout).astype(ypad.dtype)

    acc = None
    for di in range(3):
        for dj in range(3):
            tap = ypad[di:di + ho, dj:dj + wo, :].reshape(m, cout)
            part = jnp.dot(tap, w2_ref[di * 3 + dj],
                           preferred_element_type=jnp.float32)
            acc = part if acc is None else acc + part

    _write_stats(s2_ref, acc, cout)
    z2_ref[...] = acc.astype(z2_ref.dtype)


# ----------------------------------------------------------------------------
# Pass 3: BN2 + (BN_shortcut | identity) + residual add + ReLU (pure elementwise)
# ----------------------------------------------------------------------------
def _fuse_downsample_kernel(z2_ref, s2_ref, g2_ref, b2_ref,
                            zsc_ref, ssc_ref, gs_ref, bs_ref, out_ref,
                            *, mtot, eps):
    sc2, sh2 = _bn_scale_shift(s2_ref[...], g2_ref[...], b2_ref[...], mtot, eps)
    scs, shs = _bn_scale_shift(ssc_ref[...], gs_ref[...], bs_ref[...], mtot, eps)
    y2 = z2_ref[...].astype(jnp.float32) * sc2 + sh2
    sc = zsc_ref[...].astype(jnp.float32) * scs + shs
    out_ref[...] = jnp.maximum(y2 + sc, 0.0)


def _fuse_identity_kernel(z2_ref, s2_ref, g2_ref, b2_ref, x_ref, out_ref,
                          *, mtot, eps):
    sc2, sh2 = _bn_scale_shift(s2_ref[...], g2_ref[...], b2_ref[...], mtot, eps)
    y2 = z2_ref[...].astype(jnp.float32) * sc2 + sh2
    out_ref[...] = jnp.maximum(y2 + x_ref[...], 0.0)


# ----------------------------------------------------------------------------
# Wrapper: glue (padding / phase extraction / tiny stats reduction) + 3 pallas_calls
# ----------------------------------------------------------------------------
def dblock_forward(x, params, *, downsample):
    w1, w2, ws, g1, b1, g2, b2, gs, bs = params
    n, h, w, cin = x.shape
    cout = w1.shape[-1]
    stride = 2 if downsample else 1
    ho, wo = h // stride, w // stride
    m = ho * wo
    mtot = n * m
    vmem_limit = _vmem_limit_bytes()

    # -------------------- glue: pure data movement ---------------------------
    xp = jnp.pad(x, ((0, 0), (1, 1), (1, 1), (0, 0)))
    if downsample:
        assert h % 2 == 0 and w % 2 == 0
        # even/odd phases of the padded input (~1x the input bytes, not 9x im2col)
        phases = jnp.stack([xp[:, pi::2, pj::2, :]
                            for pi in range(2) for pj in range(2)], axis=1)
    else:
        assert cin == cout, "identity shortcut requires in_channel == out_channel"
        phases = xp[:, None]
    n_ph, hp, wp = phases.shape[1], phases.shape[2], phases.shape[3]
    # bf16 input halves pass-1 DMA; conv operands are bf16 on the MXU anyway.
    phases = phases.reshape(n * n_ph, hp, wp, cin).astype(jnp.bfloat16)

    w1_f = w1.reshape(9, cin, cout).astype(jnp.bfloat16)
    w2_f = w2.reshape(9, cout, cout).astype(jnp.bfloat16)
    as_row = lambda v: v.reshape(1, cout).astype(jnp.float32)
    g1r, b1r, g2r, b2r = as_row(g1), as_row(b1), as_row(g2), as_row(b2)

    # BlockSpec helpers
    def full(shape):
        zeros = (0,) * len(shape)
        return pl.BlockSpec(shape, lambda i: zeros)

    def per_img(shape):
        zeros = (0,) * len(shape)
        return pl.BlockSpec((None,) + shape, lambda i: (i,) + zeros)

    par_params = pltpu.CompilerParams(
        dimension_semantics=("parallel",), vmem_limit_bytes=vmem_limit)

    act = jax.ShapeDtypeStruct((n, m, cout), jnp.bfloat16)       # inter-pass, bf16
    stats = jax.ShapeDtypeStruct((n, 1, 2 * cout), jnp.float32)  # per-step partials

    # ------------------ pass 1: conv1 (+ shortcut conv) + partial stats ------
    a_inputs = [phases, w1_f]
    a_in_specs = [pl.BlockSpec((n_ph, hp, wp, cin), lambda i: (i, 0, 0, 0)),
                  full((9, cin, cout))]
    a_out_shape = [act, stats]
    a_out_specs = [per_img((m, cout)), per_img((1, 2 * cout))]
    flops1 = 2 * mtot * 9 * cin * cout
    a_bytes = int(phases.size * 2 + w1_f.size * 2
                  + n * m * cout * 2 + n * 2 * cout * 4)
    if downsample:
        a_inputs.append(ws.reshape(cin, cout).astype(jnp.bfloat16))
        a_in_specs.append(full((cin, cout)))
        a_out_shape += [act, stats]
        a_out_specs += [per_img((m, cout)), per_img((1, 2 * cout))]
        flops1 += 2 * mtot * cin * cout + 4 * mtot * cin
        a_bytes += int(cin * cout * 2 + n * m * cout * 2 + n * 2 * cout * 4)

    a_res = pl.pallas_call(
        functools.partial(_conv1_kernel, stride=stride, ho=ho, wo=wo,
                          cin=cin, cout=cout, downsample=downsample),
        grid=(n,),
        in_specs=a_in_specs,
        out_specs=tuple(a_out_specs),
        out_shape=tuple(a_out_shape),
        compiler_params=par_params,
        cost_estimate=pl.CostEstimate(flops=flops1, transcendentals=0,
                                      bytes_accessed=a_bytes),
    )(*a_inputs)
    if downsample:
        z1, s1p, zsc, sscp = a_res
    else:
        z1, s1p = a_res

    # Tiny (N,1,2C) partial -> global stats reduction in plain JAX: keeps the conv
    # passes megacore-parallel instead of a revisited "arbitrary" accumulator.
    s1 = jnp.sum(s1p, axis=0)
    if downsample:
        ssc = jnp.sum(sscp, axis=0)

    # ------------------ pass 2: bn1 + relu + conv2 + partial stats ------------
    b_bytes = int(2 * n * m * cout * 2 + w2_f.size * 2 + (2 + n) * 2 * cout * 4)
    z2, s2p = pl.pallas_call(
        functools.partial(_conv2_kernel, mtot=mtot, ho=ho, wo=wo, cout=cout,
                          eps=_EPS),
        grid=(n,),
        in_specs=[per_img((m, cout)), full((1, 2 * cout)),
                  full((1, cout)), full((1, cout)), full((9, cout, cout))],
        out_specs=(per_img((m, cout)), per_img((1, 2 * cout))),
        out_shape=(act, stats),
        scratch_shapes=[pltpu.VMEM((ho + 2, wo + 2, cout), jnp.bfloat16)],
        compiler_params=par_params,
        cost_estimate=pl.CostEstimate(flops=2 * mtot * 9 * cout * cout,
                                      transcendentals=cout,
                                      bytes_accessed=b_bytes),
    )(z1, s1, g1r, b1r, w2_f)
    s2 = jnp.sum(s2p, axis=0)

    # ------------------ pass 3: bn2 + shortcut(+bn) + residual + relu ---------
    out_sds = jax.ShapeDtypeStruct((n, m, cout), jnp.float32)
    c_bytes = int(3 * n * m * cout * 4)
    if downsample:
        gsr, bsr = as_row(gs), as_row(bs)
        out = pl.pallas_call(
            functools.partial(_fuse_downsample_kernel, mtot=mtot, eps=_EPS),
            grid=(n,),
            in_specs=[per_img((m, cout)), full((1, 2 * cout)),
                      full((1, cout)), full((1, cout)),
                      per_img((m, cout)), full((1, 2 * cout)),
                      full((1, cout)), full((1, cout))],
            out_specs=per_img((m, cout)),
            out_shape=out_sds,
            compiler_params=par_params,
            cost_estimate=pl.CostEstimate(flops=6 * mtot * cout,
                                          transcendentals=2 * cout,
                                          bytes_accessed=c_bytes),
        )(z2, s2, g2r, b2r, zsc, ssc, gsr, bsr)
    else:
        x_m = x.reshape(n, m, cin)            # identity shortcut (exact f32)
        out = pl.pallas_call(
            functools.partial(_fuse_identity_kernel, mtot=mtot, eps=_EPS),
            grid=(n,),
            in_specs=[per_img((m, cout)), full((1, 2 * cout)),
                      full((1, cout)), full((1, cout)), per_img((m, cin))],
            out_specs=per_img((m, cout)),
            out_shape=out_sds,
            compiler_params=par_params,
            cost_estimate=pl.CostEstimate(flops=4 * mtot * cout,
                                          transcendentals=cout,
                                          bytes_accessed=c_bytes),
        )(z2, s2, g2r, b2r, x_m)

    return out.reshape(n, ho, wo, cout)


dblock_forward_jit = jax.jit(dblock_forward, static_argnames=("downsample",))


# ----------------------------------------------------------------------------
# Pure-JAX reference (for correctness check)
# ----------------------------------------------------------------------------
def dblock_reference(x, params, *, downsample):
    w1, w2, ws, g1, b1, g2, b2, gs, bs = params
    eps = 1e-5

    def conv(inp, wt, stride):
        return jax.lax.conv_general_dilated(
            inp, wt, (stride, stride), ((1, 1), (1, 1)),
            dimension_numbers=("NHWC", "HWIO", "NHWC"))

    def bn(v, g, b):
        mu = v.mean(axis=(0, 1, 2), keepdims=True)
        var = ((v - mu) ** 2).mean(axis=(0, 1, 2), keepdims=True)
        return (v - mu) / jnp.sqrt(var + eps) * g + b

    stride = 2 if downsample else 1
    y = jax.nn.relu(bn(conv(x, w1, stride), g1, b1))
    y = bn(conv(y, w2, 1), g2, b2)
    if downsample:
        n, h, w, c = x.shape
        xa = x.reshape(n, h // 2, 2, w // 2, 2, c).mean(axis=(2, 4))
        sc = bn(jnp.einsum("nhwc,co->nhwo", xa, ws), gs, bs)
    else:
        sc = x
    return jax.nn.relu(y + sc)


# ----------------------------------------------------------------------------
# Deterministic synthetic parameters (same shapes as the PyTorch __init__)
# ----------------------------------------------------------------------------
def make_params(key, cin, cout):
    k1, k2, k3 = jax.random.split(key, 3)
    w1 = 0.1 * jax.random.normal(k1, (3, 3, cin, cout), jnp.float32)   # conv_1
    w2 = 0.1 * jax.random.normal(k2, (3, 3, cout, cout), jnp.float32)  # conv_2
    ws = 0.1 * jax.random.normal(k3, (cin, cout), jnp.float32)         # 1x1 shortcut
    ar = jnp.arange(cout, dtype=jnp.float32)
    g1, b1 = 1.0 + 0.02 * ar, 0.01 * ar
    g2, b2 = 1.0 - 0.01 * ar, -0.02 * ar
    gs, bs = 1.0 + 0.03 * ar, 0.015 * ar
    return (w1, w2, ws, g1, b1, g2, b2, gs, bs)


if __name__ == "__main__":
    key = jax.random.PRNGKey(0)
    kx1, kp1, kx2, kp2 = jax.random.split(key, 4)

    # Tolerance covers bf16 MXU operands + bf16 inter-pass activation storage
    # vs. the all-f32 reference.
    RTOL = ATOL = 5e-2

    # --- downsample=True: in=4 -> out=8, 16x16 -> 8x8 -------------------------
    x1 = jax.random.normal(kx1, (2, 16, 16, 4), jnp.float32)
    p1 = make_params(kp1, 4, 8)
    out1 = jax.block_until_ready(dblock_forward_jit(x1, p1, downsample=True))
    ref1 = dblock_reference(x1, p1, downsample=True)
    assert out1.shape == (2, 8, 8, 8)
    assert np.allclose(np.asarray(out1), np.asarray(ref1), rtol=RTOL, atol=ATOL), (
        "downsample mismatch, max abs diff = %g"
        % float(jnp.max(jnp.abs(out1 - ref1))))

    # --- downsample=False (identity shortcut): in=out=8, 16x16 -> 16x16 -------
    x2 = jax.random.normal(kx2, (2, 16, 16, 8), jnp.float32)
    p2 = make_params(kp2, 8, 8)
    out2 = jax.block_until_ready(dblock_forward_jit(x2, p2, downsample=False))
    ref2 = dblock_reference(x2, p2, downsample=False)
    assert out2.shape == (2, 16, 16, 8)
    assert np.allclose(np.asarray(out2), np.asarray(ref2), rtol=RTOL, atol=ATOL), (
        "identity mismatch, max abs diff = %g"
        % float(jnp.max(jnp.abs(out2 - ref2))))

    # TODO(synk): BatchNorm running_mean/running_var buffer updates (training-mode
    # side effect) are not replicated; they do not affect the forward output.
    print("KERNEL_OK")
</pallas_src>

<mosaic_0001>
module attributes {stable_mosaic.version = 11 : i64} {
  func.func @_conv1_kernel(%arg0: i32, %arg1: memref<4x9x9x4xbf16, #tpu.memory_space<vmem>>, %arg2: memref<9x4x8xbf16, #tpu.memory_space<vmem>>, %arg3: memref<4x8xbf16, #tpu.memory_space<vmem>>, %arg4: memref<1x64x8xbf16, #tpu.memory_space<vmem>>, %arg5: memref<1x1x16xf32, #tpu.memory_space<vmem>>, %arg6: memref<1x64x8xbf16, #tpu.memory_space<vmem>>, %arg7: memref<1x1x16xf32, #tpu.memory_space<vmem>>) attributes {dimension_semantics = [#tpu.dimension_semantics<parallel>], iteration_bounds = array<i64: 2>, scalar_prefetch = 0 : i64, scratch_operands = 0 : i64, tpu.core_type = #tpu.core_type<tc>, window_params = [{transform_indices = @transform_0, window_bounds = array<i64: 4, 9, 9, 4>}, {pipeline_mode = #tpu.pipeline_mode<synchronous>, transform_indices = @transform_1, window_bounds = array<i64: 9, 4, 8>}, {pipeline_mode = #tpu.pipeline_mode<synchronous>, transform_indices = @transform_2, window_bounds = array<i64: 4, 8>}, {transform_indices = @transform_3, window_bounds = array<i64: 1, 64, 8>}, {transform_indices = @transform_4, window_bounds = array<i64: 1, 1, 16>}, {transform_indices = @transform_5, window_bounds = array<i64: 1, 64, 8>}, {transform_indices = @transform_6, window_bounds = array<i64: 1, 1, 16>}]} {
    %c0 = arith.constant 0 : index
    %c0_0 = arith.constant 0 : index
    %c0_1 = arith.constant 0 : index
    %c0_2 = arith.constant 0 : index
    %0 = vector.load %arg1[%c0, %c0_0, %c0_1, %c0_2] : memref<4x9x9x4xbf16, #tpu.memory_space<vmem>>, vector<1x8x8x4xbf16>
    %1 = vector.shape_cast %0 : vector<1x8x8x4xbf16> to vector<8x8x4xbf16>
    %2 = vector.shape_cast %1 : vector<8x8x4xbf16> to vector<64x4xbf16>
    %c0_3 = arith.constant 0 : index
    %c0_4 = arith.constant 0 : index
    %c0_5 = arith.constant 0 : index
    %3 = vector.load %arg2[%c0_3, %c0_4, %c0_5] : memref<9x4x8xbf16, #tpu.memory_space<vmem>>, vector<1x4x8xbf16>
    %4 = vector.shape_cast %3 : vector<1x4x8xbf16> to vector<4x8xbf16>
    %cst = arith.constant dense<0.000000e+00> : vector<64x8xf32>
    %5 = tpu.matmul %2, %4, %cst {dimension_numbers = #tpu.dot_dimension_numbers<[1], [0], [0], [1], [0, 0, 1, 1], [], []>} : vector<64x4xbf16>, vector<4x8xbf16>, vector<64x8xf32> -> vector<64x8xf32>
    %c1 = arith.constant 1 : index
    %c0_6 = arith.constant 0 : index
    %c0_7 = arith.constant 0 : index
    %c0_8 = arith.constant 0 : index
    %6 = vector.load %arg1[%c1, %c0_6, %c0_7, %c0_8] : memref<4x9x9x4xbf16, #tpu.memory_space<vmem>>, vector<1x8x8x4xbf16>
    %7 = vector.shape_cast %6 : vector<1x8x8x4xbf16> to vector<8x8x4xbf16>
    %8 = vector.shape_cast %7 : vector<8x8x4xbf16> to vector<64x4xbf16>
    %c1_9 = arith.constant 1 : index
    %c0_10 = arith.constant 0 : index
    %c0_11 = arith.constant 0 : index
    %9 = vector.load %arg2[%c1_9, %c0_10, %c0_11] : memref<9x4x8xbf16, #tpu.memory_space<vmem>>, vector<1x4x8xbf16>
    %10 = vector.shape_cast %9 : vector<1x4x8xbf16> to vector<4x8xbf16>
    %cst_12 = arith.constant dense<0.000000e+00> : vector<64x8xf32>
    %11 = tpu.matmul %8, %10, %cst_12 {dimension_numbers = #tpu.dot_dimension_numbers<[1], [0], [0], [1], [0, 0, 1, 1], [], []>} : vector<64x4xbf16>, vector<4x8xbf16>, vector<64x8xf32> -> vector<64x8xf32>
    %12 = arith.addf %5, %11 : vector<64x8xf32>
    %c0_13 = arith.constant 0 : index
    %c0_14 = arith.constant 0 : index
    %c1_15 = arith.constant 1 : index
    %c0_16 = arith.constant 0 : index
    %13 = vector.load %arg1[%c0_13, %c0_14, %c1_15, %c0_16] : memref<4x9x9x4xbf16, #tpu.memory_space<vmem>>, vector<1x8x8x4xbf16>
    %14 = vector.shape_cast %13 : vector<1x8x8x4xbf16> to vector<8x8x4xbf16>
    %15 = vector.shape_cast %14 : vector<8x8x4xbf16> to vector<64x4xbf16>
    %c2 = arith.constant 2 : index
    %c0_17 = arith.constant 0 : index
    %c0_18 = arith.constant 0 : index
    %16 = vector.load %arg2[%c2, %c0_17, %c0_18] : memref<9x4x8xbf16, #tpu.memory_space<vmem>>, vector<1x4x8xbf16>
    %17 = vector.shape_cast %16 : vector<1x4x8xbf16> to vector<4x8xbf16>
    %cst_19 = arith.constant dense<0.000000e+00> : vector<64x8xf32>
    %18 = tpu.matmul %15, %17, %cst_19 {dimension_numbers = #tpu.dot_dimension_numbers<[1], [0], [0], [1], [0, 0, 1, 1], [], []>} : vector<64x4xbf16>, vector<4x8xbf16>, vector<64x8xf32> -> vector<64x8xf32>
    %19 = arith.addf %12, %18 : vector<64x8xf32>
    %c2_20 = arith.constant 2 : index
    %c0_21 = arith.constant 0 : index
    %c0_22 = arith.constant 0 : index
    %c0_23 = arith.constant 0 : index
    %20 = vector.load %arg1[%c2_20, %c0_21, %c0_22, %c0_23] : memref<4x9x9x4xbf16, #tpu.memory_space<vmem>>, vector<1x8x8x4xbf16>
    %21 = vector.shape_cast %20 : vector<1x8x8x4xbf16> to vector<8x8x4xbf16>
    %22 = vector.shape_cast %21 : vector<8x8x4xbf16> to vector<64x4xbf16>
    %c3 = arith.constant 3 : index
    %c0_24 = arith.constant 0 : index
    %c0_25 = arith.constant 0 : index
    %23 = vector.load %arg2[%c3, %c0_24, %c0_25] : memref<9x4x8xbf16, #tpu.memory_space<vmem>>, vector<1x4x8xbf16>
    %24 = vector.shape_cast %23 : vector<1x4x8xbf16> to vector<4x8xbf16>
    %cst_26 = arith.constant dense<0.000000e+00> : vector<64x8xf32>
    %25 = tpu.matmul %22, %24, %cst_26 {dimension_numbers = #tpu.dot_dimension_numbers<[1], [0], [0], [1], [0, 0, 1, 1], [], []>} : vector<64x4xbf16>, vector<4x8xbf16>, vector<64x8xf32> -> vector<64x8xf32>
    %26 = arith.addf %19, %25 : vector<64x8xf32>
    %c3_27 = arith.constant 3 : index
    %c0_28 = arith.constant 0 : index
    %c0_29 = arith.constant 0 : index
    %c0_30 = arith.constant 0 : index
    %27 = vector.load %arg1[%c3_27, %c0_28, %c0_29, %c0_30] : memref<4x9x9x4xbf16, #tpu.memory_space<vmem>>, vector<1x8x8x4xbf16>
    %28 = vector.shape_cast %27 : vector<1x8x8x4xbf16> to vector<8x8x4xbf16>
    %29 = vector.shape_cast %28 : vector<8x8x4xbf16> to vector<64x4xbf16>
    %c4 = arith.constant 4 : index
    %c0_31 = arith.constant 0 : index
    %c0_32 = arith.constant 0 : index
    %30 = vector.load %arg2[%c4, %c0_31, %c0_32] : memref<9x4x8xbf16, #tpu.memory_space<vmem>>, vector<1x4x8xbf16>
    %31 = vector.shape_cast %30 : vector<1x4x8xbf16> to vector<4x8xbf16>
    %cst_33 = arith.constant dense<0.000000e+00> : vector<64x8xf32>
    %32 = tpu.matmul %29, %31, %cst_33 {dimension_numbers = #tpu.dot_dimension_numbers<[1], [0], [0], [1], [0, 0, 1, 1], [], []>} : vector<64x4xbf16>, vector<4x8xbf16>, vector<64x8xf32> -> vector<64x8xf32>
    %33 = arith.addf %26, %32 : vector<64x8xf32>
    %c2_34 = arith.constant 2 : index
    %c0_35 = arith.constant 0 : index
    %c1_36 = arith.constant 1 : index
    %c0_37 = arith.constant 0 : index
    %34 = vector.load %arg1[%c2_34, %c0_35, %c1_36, %c0_37] : memref<4x9x9x4xbf16, #tpu.memory_space<vmem>>, vector<1x8x8x4xbf16>
    %35 = vector.shape_cast %34 : vector<1x8x8x4xbf16> to vector<8x8x4xbf16>
    %36 = vector.shape_cast %35 : vector<8x8x4xbf16> to vector<64x4xbf16>
    %c5 = arith.constant 5 : index
    %c0_38 = arith.constant 0 : index
    %c0_39 = arith.constant 0 : index
    %37 = vector.load %arg2[%c5, %c0_38, %c0_39] : memref<9x4x8xbf16, #tpu.memory_space<vmem>>, vector<1x4x8xbf16>
    %38 = vector.shape_cast %37 : vector<1x4x8xbf16> to vector<4x8xbf16>
    %cst_40 = arith.constant dense<0.000000e+00> : vector<64x8xf32>
    %39 = tpu.matmul %36, %38, %cst_40 {dimension_numbers = #tpu.dot_dimension_numbers<[1], [0], [0], [1], [0, 0, 1, 1], [], []>} : vector<64x4xbf16>, vector<4x8xbf16>, vector<64x8xf32> -> vector<64x8xf32>
    %40 = arith.addf %33, %39 : vector<64x8xf32>
    %c0_41 = arith.constant 0 : index
    %c1_42 = arith.constant 1 : index
    %c0_43 = arith.constant 0 : index
    %c0_44 = arith.constant 0 : index
    %41 = vector.load %arg1[%c0_41, %c1_42, %c0_43, %c0_44] : memref<4x9x9x4xbf16, #tpu.memory_space<vmem>>, vector<1x8x8x4xbf16>
    %42 = vector.shape_cast %41 : vector<1x8x8x4xbf16> to vector<8x8x4xbf16>
    %43 = vector.shape_cast %42 : vector<8x8x4xbf16> to vector<64x4xbf16>
    %c6 = arith.constant 6 : index
    %c0_45 = arith.constant 0 : index
    %c0_46 = arith.constant 0 : index
    %44 = vector.load %arg2[%c6, %c0_45, %c0_46] : memref<9x4x8xbf16, #tpu.memory_space<vmem>>, vector<1x4x8xbf16>
    %45 = vector.shape_cast %44 : vector<1x4x8xbf16> to vector<4x8xbf16>
    %cst_47 = arith.constant dense<0.000000e+00> : vector<64x8xf32>
    %46 = tpu.matmul %43, %45, %cst_47 {dimension_numbers = #tpu.dot_dimension_numbers<[1], [0], [0], [1], [0, 0, 1, 1], [], []>} : vector<64x4xbf16>, vector<4x8xbf16>, vector<64x8xf32> -> vector<64x8xf32>
    %47 = arith.addf %40, %46 : vector<64x8xf32>
    %c1_48 = arith.constant 1 : index
    %c1_49 = arith.constant 1 : index
    %c0_50 = arith.constant 0 : index
    %c0_51 = arith.constant 0 : index
    %48 = vector.load %arg1[%c1_48, %c1_49, %c0_50, %c0_51] : memref<4x9x9x4xbf16, #tpu.memory_space<vmem>>, vector<1x8x8x4xbf16>
    %49 = vector.shape_cast %48 : vector<1x8x8x4xbf16> to vector<8x8x4xbf16>
    %50 = vector.shape_cast %49 : vector<8x8x4xbf16> to vector<64x4xbf16>
    %c7 = arith.constant 7 : index
    %c0_52 = arith.constant 0 : index
    %c0_53 = arith.constant 0 : index
    %51 = vector.load %arg2[%c7, %c0_52, %c0_53] : memref<9x4x8xbf16, #tpu.memory_space<vmem>>, vector<1x4x8xbf16>
    %52 = vector.shape_cast %51 : vector<1x4x8xbf16> to vector<4x8xbf16>
    %cst_54 = arith.constant dense<0.000000e+00> : vector<64x8xf32>
    %53 = tpu.matmul %50, %52, %cst_54 {dimension_numbers = #tpu.dot_dimension_numbers<[1], [0], [0], [1], [0, 0, 1, 1], [], []>} : vector<64x4xbf16>, vector<4x8xbf16>, vector<64x8xf32> -> vector<64x8xf32>
    %54 = arith.addf %47, %53 : vector<64x8xf32>
    %c0_55 = arith.constant 0 : index
    %c1_56 = arith.constant 1 : index
    %c1_57 = arith.constant 1 : index
    %c0_58 = arith.constant 0 : index
    %55 = vector.load %arg1[%c0_55, %c1_56, %c1_57, %c0_58] : memref<4x9x9x4xbf16, #tpu.memory_space<vmem>>, vector<1x8x8x4xbf16>
    %56 = vector.shape_cast %55 : vector<1x8x8x4xbf16> to vector<8x8x4xbf16>
    %57 = vector.shape_cast %56 : vector<8x8x4xbf16> to vector<64x4xbf16>
    %c8 = arith.constant 8 : index
    %c0_59 = arith.constant 0 : index
    %c0_60 = arith.constant 0 : index
    %58 = vector.load %arg2[%c8, %c0_59, %c0_60] : memref<9x4x8xbf16, #tpu.memory_space<vmem>>, vector<1x4x8xbf16>
    %59 = vector.shape_cast %58 : vector<1x4x8xbf16> to vector<4x8xbf16>
    %cst_61 = arith.constant dense<0.000000e+00> : vector<64x8xf32>
    %60 = tpu.matmul %57, %59, %cst_61 {dimension_numbers = #tpu.dot_dimension_numbers<[1], [0], [0], [1], [0, 0, 1, 1], [], []>} : vector<64x4xbf16>, vector<4x8xbf16>, vector<64x8xf32> -> vector<64x8xf32>
    %61 = arith.addf %54, %60 : vector<64x8xf32>
    %cst_62 = arith.constant dense<0.000000e+00> : vector<8xf32>
    %62 = vector.multi_reduction <add>, %61, %cst_62 [0] : vector<64x8xf32> to vector<8xf32>
    %63 = vector.shape_cast %62 : vector<8xf32> to vector<1x8xf32>
    %c0_63 = arith.constant 0 : index
    %c0_64 = arith.constant 0 : index
    %c0_65 = arith.constant 0 : index
    %64 = vector.load %arg5[%c0_63, %c0_64, %c0_65] : memref<1x1x16xf32, #tpu.memory_space<vmem>>, vector<1x1x8xf32>
    %65 = vector.shape_cast %64 : vector<1x1x8xf32> to vector<1x8xf32>
    %66 = vector.shape_cast %63 : vector<1x8xf32> to vector<1x1x8xf32>
    tpu.vector_store %arg5[%c0_63, %c0_64, %c0_65], %66 {strides = array<i32>} : memref<1x1x16xf32, #tpu.memory_space<vmem>>, vector<1x1x8xf32>,
    %67 = arith.mulf %61, %61 : vector<64x8xf32>
    %cst_66 = arith.constant dense<0.000000e+00> : vector<8xf32>
    %68 = vector.multi_reduction <add>, %67, %cst_66 [0] : vector<64x8xf32> to vector<8xf32>
    %69 = vector.shape_cast %68 : vector<8xf32> to vector<1x8xf32>
    %c0_67 = arith.constant 0 : index
    %c0_68 = arith.constant 0 : index
    %c8_69 = arith.constant 8 : index
    %70 = vector.load %arg5[%c0_67, %c0_68, %c8_69] : memref<1x1x16xf32, #tpu.memory_space<vmem>>, vector<1x1x8xf32>
    %71 = vector.shape_cast %70 : vector<1x1x8xf32> to vector<1x8xf32>
    %72 = vector.shape_cast %69 : vector<1x8xf32> to vector<1x1x8xf32>
    tpu.vector_store %arg5[%c0_67, %c0_68, %c8_69], %72 {strides = array<i32>} : memref<1x1x16xf32, #tpu.memory_space<vmem>>, vector<1x1x8xf32>,
    %73 = arith.truncf %61 : vector<64x8xf32> to vector<64x8xbf16>
    %c0_70 = arith.constant 0 : index
    %c0_71 = arith.constant 0 : index
    %c0_72 = arith.constant 0 : index
    %74 = vector.load %arg4[%c0_70, %c0_71, %c0_72] : memref<1x64x8xbf16, #tpu.memory_space<vmem>>, vector<1x64x8xbf16>
    %75 = vector.shape_cast %74 : vector<1x64x8xbf16> to vector<64x8xbf16>
    %76 = vector.shape_cast %73 : vector<64x8xbf16> to vector<1x64x8xbf16>
    tpu.vector_store %arg4[%c0_70, %c0_71, %c0_72], %76 {strides = array<i32>} : memref<1x64x8xbf16, #tpu.memory_space<vmem>>, vector<1x64x8xbf16>,
    %c3_73 = arith.constant 3 : index
    %c0_74 = arith.constant 0 : index
    %c0_75 = arith.constant 0 : index
    %c0_76 = arith.constant 0 : index
    %77 = vector.load %arg1[%c3_73, %c0_74, %c0_75, %c0_76] : memref<4x9x9x4xbf16, #tpu.memory_space<vmem>>, vector<1x8x8x4xbf16>
    %78 = vector.shape_cast %77 : vector<1x8x8x4xbf16> to vector<8x8x4xbf16>
    %79 = arith.extf %78 : vector<8x8x4xbf16> to vector<8x8x4xf32>
    %c2_77 = arith.constant 2 : index
    %c0_78 = arith.constant 0 : index
    %c1_79 = arith.constant 1 : index
    %c0_80 = arith.constant 0 : index
    %80 = vector.load %arg1[%c2_77, %c0_78, %c1_79, %c0_80] : memref<4x9x9x4xbf16, #tpu.memory_space<vmem>>, vector<1x8x8x4xbf16>
    %81 = vector.shape_cast %80 : vector<1x8x8x4xbf16> to vector<8x8x4xbf16>
    %82 = arith.extf %81 : vector<8x8x4xbf16> to vector<8x8x4xf32>
    %83 = arith.addf %79, %82 : vector<8x8x4xf32>
    %c1_81 = arith.constant 1 : index
    %c1_82 = arith.constant 1 : index
    %c0_83 = arith.constant 0 : index
    %c0_84 = arith.constant 0 : index
    %84 = vector.load %arg1[%c1_81, %c1_82, %c0_83, %c0_84] : memref<4x9x9x4xbf16, #tpu.memory_space<vmem>>, vector<1x8x8x4xbf16>
    %85 = vector.shape_cast %84 : vector<1x8x8x4xbf16> to vector<8x8x4xbf16>
    %86 = arith.extf %85 : vector<8x8x4xbf16> to vector<8x8x4xf32>
    %87 = arith.addf %83, %86 : vector<8x8x4xf32>
    %c0_85 = arith.constant 0 : index
    %c1_86 = arith.constant 1 : index
    %c1_87 = arith.constant 1 : index
    %c0_88 = arith.constant 0 : index
    %88 = vector.load %arg1[%c0_85, %c1_86, %c1_87, %c0_88] : memref<4x9x9x4xbf16, #tpu.memory_space<vmem>>, vector<1x8x8x4xbf16>
    %89 = vector.shape_cast %88 : vector<1x8x8x4xbf16> to vector<8x8x4xbf16>
    %90 = arith.extf %89 : vector<8x8x4xbf16> to vector<8x8x4xf32>
    %91 = arith.addf %87, %90 : vector<8x8x4xf32>
    %cst_89 = arith.constant 2.500000e-01 : f32
    %92 = vector.broadcast %cst_89 : f32 to vector<8x8x4xf32>
    %93 = arith.mulf %92, %91 : vector<8x8x4xf32>
    %94 = vector.shape_cast %93 : vector<8x8x4xf32> to vector<64x4xf32>
    %95 = arith.truncf %94 : vector<64x4xf32> to vector<64x4xbf16>
    %c0_90 = arith.constant 0 : index
    %c0_91 = arith.constant 0 : index
    %96 = vector.load %arg3[%c0_90, %c0_91] : memref<4x8xbf16, #tpu.memory_space<vmem>>, vector<4x8xbf16>
    %cst_92 = arith.constant dense<0.000000e+00> : vector<64x8xf32>
    %97 = tpu.matmul %95, %96, %cst_92 {dimension_numbers = #tpu.dot_dimension_numbers<[1], [0], [0], [1], [0, 0, 1, 1], [], []>} : vector<64x4xbf16>, vector<4x8xbf16>, vector<64x8xf32> -> vector<64x8xf32>
    %cst_93 = arith.constant dense<0.000000e+00> : vector<8xf32>
    %98 = vector.multi_reduction <add>, %97, %cst_93 [0] : vector<64x8xf32> to vector<8xf32>
    %99 = vector.shape_cast %98 : vector<8xf32> to vector<1x8xf32>
    %c0_94 = arith.constant 0 : index
    %c0_95 = arith.constant 0 : index
    %c0_96 = arith.constant 0 : index
    %100 = vector.load %arg7[%c0_94, %c0_95, %c0_96] : memref<1x1x16xf32, #tpu.memory_space<vmem>>, vector<1x1x8xf32>
    %101 = vector.shape_cast %100 : vector<1x1x8xf32> to vector<1x8xf32>
    %102 = vector.shape_cast %99 : vector<1x8xf32> to vector<1x1x8xf32>
    tpu.vector_store %arg7[%c0_94, %c0_95, %c0_96], %102 {strides = array<i32>} : memref<1x1x16xf32, #tpu.memory_space<vmem>>, vector<1x1x8xf32>,
    %103 = arith.mulf %97, %97 : vector<64x8xf32>
    %cst_97 = arith.constant dense<0.000000e+00> : vector<8xf32>
    %104 = vector.multi_reduction <add>, %103, %cst_97 [0] : vector<64x8xf32> to vector<8xf32>
    %105 = vector.shape_cast %104 : vector<8xf32> to vector<1x8xf32>
    %c0_98 = arith.constant 0 : index
    %c0_99 = arith.constant 0 : index
    %c8_100 = arith.constant 8 : index
    %106 = vector.load %arg7[%c0_98, %c0_99, %c8_100] : memref<1x1x16xf32, #tpu.memory_space<vmem>>, vector<1x1x8xf32>
    %107 = vector.shape_cast %106 : vector<1x1x8xf32> to vector<1x8xf32>
    %108 = vector.shape_cast %105 : vector<1x8xf32> to vector<1x1x8xf32>
    tpu.vector_store %arg7[%c0_98, %c0_99, %c8_100], %108 {strides = array<i32>} : memref<1x1x16xf32, #tpu.memory_space<vmem>>, vector<1x1x8xf32>,
    %109 = arith.truncf %97 : vector<64x8xf32> to vector<64x8xbf16>
    %c0_101 = arith.constant 0 : index
    %c0_102 = arith.constant 0 : index
    %c0_103 = arith.constant 0 : index
    %110 = vector.load %arg6[%c0_101, %c0_102, %c0_103] : memref<1x64x8xbf16, #tpu.memory_space<vmem>>, vector<1x64x8xbf16>
    %111 = vector.shape_cast %110 : vector<1x64x8xbf16> to vector<64x8xbf16>
    %112 = vector.shape_cast %109 : vector<64x8xbf16> to vector<1x64x8xbf16>
    tpu.vector_store %arg6[%c0_101, %c0_102, %c0_103], %112 {strides = array<i32>} : memref<1x64x8xbf16, #tpu.memory_space<vmem>>, vector<1x64x8xbf16>,
    return
  }
  func.func @transform_0(%arg0: i32) -> (i32, i32, i32, i32) {
    %c0_i32 = arith.constant 0 : i32
    %c0_i32_0 = arith.constant 0 : i32
    %c0_i32_1 = arith.constant 0 : i32
    %c0_i32_2 = arith.constant 0 : i32
    return %arg0, %c0_i32, %c0_i32_0, %c0_i32_1 : i32, i32, i32, i32
  }
  func.func @transform_1(%arg0: i32) -> (i32, i32, i32) {
    %c0_i32 = arith.constant 0 : i32
    %c0_i32_0 = arith.constant 0 : i32
    %c0_i32_1 = arith.constant 0 : i32
    %c0_i32_2 = arith.constant 0 : i32
    return %c0_i32, %c0_i32_0, %c0_i32_1 : i32, i32, i32
  }
  func.func @transform_2(%arg0: i32) -> (i32, i32) {
    %c0_i32 = arith.constant 0 : i32
    %c0_i32_0 = arith.constant 0 : i32
    %c0_i32_1 = arith.constant 0 : i32
    return %c0_i32, %c0_i32_0 : i32, i32
  }
  func.func @transform_3(%arg0: i32) -> (i32, i32, i32) {
    %c0_i32 = arith.constant 0 : i32
    %c0_i32_0 = arith.constant 0 : i32
    %c0_i32_1 = arith.constant 0 : i32
    return %arg0, %c0_i32, %c0_i32_0 : i32, i32, i32
  }
  func.func @transform_4(%arg0: i32) -> (i32, i32, i32) {
    %c0_i32 = arith.constant 0 : i32
    %c0_i32_0 = arith.constant 0 : i32
    %c0_i32_1 = arith.constant 0 : i32
    return %arg0, %c0_i32, %c0_i32_0 : i32, i32, i32
  }
  func.func @transform_5(%arg0: i32) -> (i32, i32, i32) {
    %c0_i32 = arith.constant 0 : i32
    %c0_i32_0 = arith.constant 0 : i32
    %c0_i32_1 = arith.constant 0 : i32
    return %arg0, %c0_i32, %c0_i32_0 : i32, i32, i32
  }
  func.func @transform_6(%arg0: i32) -> (i32, i32, i32) {
    %c0_i32 = arith.constant 0 : i32
    %c0_i32_0 = arith.constant 0 : i32
    %c0_i32_1 = arith.constant 0 : i32
    return %arg0, %c0_i32, %c0_i32_0 : i32, i32, i32
  }
}

module attributes {stable_mosaic.version = 11 : i64} {
  func.func @_conv2_kernel(%arg0: i32, %arg1: memref<1x64x8xbf16, #tpu.memory_space<vmem>>, %arg2: memref<1x16xf32, #tpu.memory_space<vmem>>, %arg3: memref<1x8xf32, #tpu.memory_space<vmem>>, %arg4: memref<1x8xf32, #tpu.memory_space<vmem>>, %arg5: memref<9x8x8xbf16, #tpu.memory_space<vmem>>, %arg6: memref<1x64x8xbf16, #tpu.memory_space<vmem>>, %arg7: memref<1x1x16xf32, #tpu.memory_space<vmem>>, %arg8: memref<10x10x8xbf16, #tpu.memory_space<vmem>>) attributes {dimension_semantics = [#tpu.dimension_semantics<parallel>], iteration_bounds = array<i64: 2>, scalar_prefetch = 0 : i64, scratch_operands = 1 : i64, tpu.core_type = #tpu.core_type<tc>, window_params = [{transform_indices = @transform_0, window_bounds = array<i64: 1, 64, 8>}, {pipeline_mode = #tpu.pipeline_mode<synchronous>, transform_indices = @transform_1, window_bounds = array<i64: 1, 16>}, {pipeline_mode = #tpu.pipeline_mode<synchronous>, transform_indices = @transform_2, window_bounds = array<i64: 1, 8>}, {pipeline_mode = #tpu.pipeline_mode<synchronous>, transform_indices = @transform_3, window_bounds = array<i64: 1, 8>}, {pipeline_mode = #tpu.pipeline_mode<synchronous>, transform_indices = @transform_4, window_bounds = array<i64: 9, 8, 8>}, {transform_indices = @transform_5, window_bounds = array<i64: 1, 64, 8>}, {transform_indices = @transform_6, window_bounds = array<i64: 1, 1, 16>}]} {
    %c0 = arith.constant 0 : index
    %c0_0 = arith.constant 0 : index
    %0 = vector.load %arg2[%c0, %c0_0] : memref<1x16xf32, #tpu.memory_space<vmem>>, vector<1x16xf32>
    %c0_1 = arith.constant 0 : index
    %c0_2 = arith.constant 0 : index
    %1 = vector.load %arg3[%c0_1, %c0_2] : memref<1x8xf32, #tpu.memory_space<vmem>>, vector<1x8xf32>
    %c0_3 = arith.constant 0 : index
    %c0_4 = arith.constant 0 : index
    %2 = vector.load %arg4[%c0_3, %c0_4] : memref<1x8xf32, #tpu.memory_space<vmem>>, vector<1x8xf32>
    %3 = vector.extract_strided_slice %0 {offsets = [0, 0], sizes = [1, 8], strides = [1, 1]} : vector<1x16xf32> to vector<1x8xf32>
    %cst = arith.constant 7.812500e-03 : f32
    %4 = vector.broadcast %cst : f32 to vector<1x8xf32>
    %5 = arith.mulf %3, %4 : vector<1x8xf32>
    %6 = vector.extract_strided_slice %0 {offsets = [0, 8], sizes = [1, 8], strides = [1, 1]} : vector<1x16xf32> to vector<1x8xf32>
    %cst_5 = arith.constant 7.812500e-03 : f32
    %7 = vector.broadcast %cst_5 : f32 to vector<1x8xf32>
    %8 = arith.mulf %6, %7 : vector<1x8xf32>
    %9 = arith.mulf %5, %5 : vector<1x8xf32>
    %10 = arith.subf %8, %9 : vector<1x8xf32>
    %cst_6 = arith.constant 9.99999974E-6 : f32
    %11 = vector.broadcast %cst_6 : f32 to vector<1x8xf32>
    %12 = arith.addf %10, %11 : vector<1x8xf32>
    %13 = math.rsqrt %12 : vector<1x8xf32>
    %14 = arith.mulf %1, %13 : vector<1x8xf32>
    %15 = arith.mulf %5, %14 : vector<1x8xf32>
    %16 = arith.subf %2, %15 : vector<1x8xf32>
    %c0_7 = arith.constant 0 : index
    %c0_8 = arith.constant 0 : index
    %c0_9 = arith.constant 0 : index
    %17 = vector.load %arg1[%c0_7, %c0_8, %c0_9] : memref<1x64x8xbf16, #tpu.memory_space<vmem>>, vector<1x64x8xbf16>
    %18 = vector.shape_cast %17 : vector<1x64x8xbf16> to vector<64x8xbf16>
    %19 = arith.extf %18 : vector<64x8xbf16> to vector<64x8xf32>
    %20 = vector.broadcast %14 : vector<1x8xf32> to vector<64x8xf32>
    %21 = arith.mulf %19, %20 : vector<64x8xf32>
    %22 = vector.broadcast %16 : vector<1x8xf32> to vector<64x8xf32>
    %23 = arith.addf %21, %22 : vector<64x8xf32>
    %cst_10 = arith.constant 0.000000e+00 : f32
    %24 = vector.broadcast %cst_10 : f32 to vector<64x8xf32>
    %25 = arith.maximumf %23, %24 : vector<64x8xf32>
    %cst_11 = arith.constant 0.000000e+00 : bf16
    %26 = vector.broadcast %cst_11 : bf16 to vector<1x10x8xbf16>
    %c0_12 = arith.constant 0 : index
    %c0_13 = arith.constant 0 : index
    %c0_14 = arith.constant 0 : index
    %27 = vector.load %arg8[%c0_12, %c0_13, %c0_14] : memref<10x10x8xbf16, #tpu.memory_space<vmem>>, vector<1x10x8xbf16>
    tpu.vector_store %arg8[%c0_12, %c0_13, %c0_14], %26 {strides = array<i32>} : memref<10x10x8xbf16, #tpu.memory_space<vmem>>, vector<1x10x8xbf16>,
    %cst_15 = arith.constant 0.000000e+00 : bf16
    %28 = vector.broadcast %cst_15 : bf16 to vector<1x10x8xbf16>
    %c9 = arith.constant 9 : index
    %c0_16 = arith.constant 0 : index
    %c0_17 = arith.constant 0 : index
    %29 = vector.load %arg8[%c9, %c0_16, %c0_17] : memref<10x10x8xbf16, #tpu.memory_space<vmem>>, vector<1x10x8xbf16>
    tpu.vector_store %arg8[%c9, %c0_16, %c0_17], %28 {strides = array<i32>} : memref<10x10x8xbf16, #tpu.memory_space<vmem>>, vector<1x10x8xbf16>,
    %cst_18 = arith.constant 0.000000e+00 : bf16
    %30 = vector.broadcast %cst_18 : bf16 to vector<10x1x8xbf16>
    %c0_19 = arith.constant 0 : index
    %c0_20 = arith.constant 0 : index
    %c0_21 = arith.constant 0 : index
    %31 = vector.load %arg8[%c0_19, %c0_20, %c0_21] : memref<10x10x8xbf16, #tpu.memory_space<vmem>>, vector<10x1x8xbf16>
    tpu.vector_store %arg8[%c0_19, %c0_20, %c0_21], %30 {strides = array<i32>} : memref<10x10x8xbf16, #tpu.memory_space<vmem>>, vector<10x1x8xbf16>,
    %cst_22 = arith.constant 0.000000e+00 : bf16
    %32 = vector.broadcast %cst_22 : bf16 to vector<10x1x8xbf16>
    %c0_23 = arith.constant 0 : index
    %c9_24 = arith.constant 9 : index
    %c0_25 = arith.constant 0 : index
    %33 = vector.load %arg8[%c0_23, %c9_24, %c0_25] : memref<10x10x8xbf16, #tpu.memory_space<vmem>>, vector<10x1x8xbf16>
    tpu.vector_store %arg8[%c0_23, %c9_24, %c0_25], %32 {strides = array<i32>} : memref<10x10x8xbf16, #tpu.memory_space<vmem>>, vector<10x1x8xbf16>,
    %34 = vector.shape_cast %25 : vector<64x8xf32> to vector<8x8x8xf32>
    %35 = arith.truncf %34 : vector<8x8x8xf32> to vector<8x8x8xbf16>
    %c1 = arith.constant 1 : index
    %c1_26 = arith.constant 1 : index
    %c0_27 = arith.constant 0 : index
    %36 = vector.load %arg8[%c1, %c1_26, %c0_27] : memref<10x10x8xbf16, #tpu.memory_space<vmem>>, vector<8x8x8xbf16>
    tpu.vector_store %arg8[%c1, %c1_26, %c0_27], %35 {strides = array<i32>} : memref<10x10x8xbf16, #tpu.memory_space<vmem>>, vector<8x8x8xbf16>,
    %c0_28 = arith.constant 0 : index
    %c0_29 = arith.constant 0 : index
    %c0_30 = arith.constant 0 : index
    %37 = vector.load %arg8[%c0_28, %c0_29, %c0_30] : memref<10x10x8xbf16, #tpu.memory_space<vmem>>, vector<8x8x8xbf16>
    %38 = vector.shape_cast %37 : vector<8x8x8xbf16> to vector<64x8xbf16>
    %c0_31 = arith.constant 0 : index
    %c0_32 = arith.constant 0 : index
    %c0_33 = arith.constant 0 : index
    %39 = vector.load %arg5[%c0_31, %c0_32, %c0_33] : memref<9x8x8xbf16, #tpu.memory_space<vmem>>, vector<1x8x8xbf16>
    %40 = vector.shape_cast %39 : vector<1x8x8xbf16> to vector<8x8xbf16>
    %cst_34 = arith.constant dense<0.000000e+00> : vector<64x8xf32>
    %41 = tpu.matmul %38, %40, %cst_34 {dimension_numbers = #tpu.dot_dimension_numbers<[1], [0], [0], [1], [0, 0, 1, 1], [], []>} : vector<64x8xbf16>, vector<8x8xbf16>, vector<64x8xf32> -> vector<64x8xf32>
    %c0_35 = arith.constant 0 : index
    %c1_36 = arith.constant 1 : index
    %c0_37 = arith.constant 0 : index
    %42 = vector.load %arg8[%c0_35, %c1_36, %c0_37] : memref<10x10x8xbf16, #tpu.memory_space<vmem>>, vector<8x8x8xbf16>
    %43 = vector.shape_cast %42 : vector<8x8x8xbf16> to vector<64x8xbf16>
    %c1_38 = arith.constant 1 : index
    %c0_39 = arith.constant 0 : index
    %c0_40 = arith.constant 0 : index
    %44 = vector.load %arg5[%c1_38, %c0_39, %c0_40] : memref<9x8x8xbf16, #tpu.memory_space<vmem>>, vector<1x8x8xbf16>
    %45 = vector.shape_cast %44 : vector<1x8x8xbf16> to vector<8x8xbf16>
    %cst_41 = arith.constant dense<0.000000e+00> : vector<64x8xf32>
    %46 = tpu.matmul %43, %45, %cst_41 {dimension_numbers = #tpu.dot_dimension_numbers<[1], [0], [0], [1], [0, 0, 1, 1], [], []>} : vector<64x8xbf16>, vector<8x8xbf16>, vector<64x8xf32> -> vector<64x8xf32>
    %47 = arith.addf %41, %46 : vector<64x8xf32>
    %c0_42 = arith.constant 0 : index
    %c2 = arith.constant 2 : index
    %c0_43 = arith.constant 0 : index
    %48 = vector.load %arg8[%c0_42, %c2, %c0_43] : memref<10x10x8xbf16, #tpu.memory_space<vmem>>, vector<8x8x8xbf16>
    %49 = vector.shape_cast %48 : vector<8x8x8xbf16> to vector<64x8xbf16>
    %c2_44 = arith.constant 2 : index
    %c0_45 = arith.constant 0 : index
    %c0_46 = arith.constant 0 : index
    %50 = vector.load %arg5[%c2_44, %c0_45, %c0_46] : memref<9x8x8xbf16, #tpu.memory_space<vmem>>, vector<1x8x8xbf16>
    %51 = vector.shape_cast %50 : vector<1x8x8xbf16> to vector<8x8xbf16>
    %cst_47 = arith.constant dense<0.000000e+00> : vector<64x8xf32>
    %52 = tpu.matmul %49, %51, %cst_47 {dimension_numbers = #tpu.dot_dimension_numbers<[1], [0], [0], [1], [0, 0, 1, 1], [], []>} : vector<64x8xbf16>, vector<8x8xbf16>, vector<64x8xf32> -> vector<64x8xf32>
    %53 = arith.addf %47, %52 : vector<64x8xf32>
    %c1_48 = arith.constant 1 : index
    %c0_49 = arith.constant 0 : index
    %c0_50 = arith.constant 0 : index
    %54 = vector.load %arg8[%c1_48, %c0_49, %c0_50] : memref<10x10x8xbf16, #tpu.memory_space<vmem>>, vector<8x8x8xbf16>
    %55 = vector.shape_cast %54 : vector<8x8x8xbf16> to vector<64x8xbf16>
    %c3 = arith.constant 3 : index
    %c0_51 = arith.constant 0 : index
    %c0_52 = arith.constant 0 : index
    %56 = vector.load %arg5[%c3, %c0_51, %c0_52] : memref<9x8x8xbf16, #tpu.memory_space<vmem>>, vector<1x8x8xbf16>
    %57 = vector.shape_cast %56 : vector<1x8x8xbf16> to vector<8x8xbf16>
    %cst_53 = arith.constant dense<0.000000e+00> : vector<64x8xf32>
    %58 = tpu.matmul %55, %57, %cst_53 {dimension_numbers = #tpu.dot_dimension_numbers<[1], [0], [0], [1], [0, 0, 1, 1], [], []>} : vector<64x8xbf16>, vector<8x8xbf16>, vector<64x8xf32> -> vector<64x8xf32>
    %59 = arith.addf %53, %58 : vector<64x8xf32>
    %c1_54 = arith.constant 1 : index
    %c1_55 = arith.constant 1 : index
    %c0_56 = arith.constant 0 : index
    %60 = vector.load %arg8[%c1_54, %c1_55, %c0_56] : memref<10x10x8xbf16, #tpu.memory_space<vmem>>, vector<8x8x8xbf16>
    %61 = vector.shape_cast %60 : vector<8x8x8xbf16> to vector<64x8xbf16>
    %c4 = arith.constant 4 : index
    %c0_57 = arith.constant 0 : index
    %c0_58 = arith.constant 0 : index
    %62 = vector.load %arg5[%c4, %c0_57, %c0_58] : memref<9x8x8xbf16, #tpu.memory_space<vmem>>, vector<1x8x8xbf16>
    %63 = vector.shape_cast %62 : vector<1x8x8xbf16> to vector<8x8xbf16>
    %cst_59 = arith.constant dense<0.000000e+00> : vector<64x8xf32>
    %64 = tpu.matmul %61, %63, %cst_59 {dimension_numbers = #tpu.dot_dimension_numbers<[1], [0], [0], [1], [0, 0, 1, 1], [], []>} : vector<64x8xbf16>, vector<8x8xbf16>, vector<64x8xf32> -> vector<64x8xf32>
    %65 = arith.addf %59, %64 : vector<64x8xf32>
    %c1_60 = arith.constant 1 : index
    %c2_61 = arith.constant 2 : index
    %c0_62 = arith.constant 0 : index
    %66 = vector.load %arg8[%c1_60, %c2_61, %c0_62] : memref<10x10x8xbf16, #tpu.memory_space<vmem>>, vector<8x8x8xbf16>
    %67 = vector.shape_cast %66 : vector<8x8x8xbf16> to vector<64x8xbf16>
    %c5 = arith.constant 5 : index
    %c0_63 = arith.constant 0 : index
    %c0_64 = arith.constant 0 : index
    %68 = vector.load %arg5[%c5, %c0_63, %c0_64] : memref<9x8x8xbf16, #tpu.memory_space<vmem>>, vector<1x8x8xbf16>
    %69 = vector.shape_cast %68 : vector<1x8x8xbf16> to vector<8x8xbf16>
    %cst_65 = arith.constant dense<0.000000e+00> : vector<64x8xf32>
    %70 = tpu.matmul %67, %69, %cst_65 {dimension_numbers = #tpu.dot_dimension_numbers<[1], [0], [0], [1], [0, 0, 1, 1], [], []>} : vector<64x8xbf16>, vector<8x8xbf16>, vector<64x8xf32> -> vector<64x8xf32>
    %71 = arith.addf %65, %70 : vector<64x8xf32>
    %c2_66 = arith.constant 2 : index
    %c0_67 = arith.constant 0 : index
    %c0_68 = arith.constant 0 : index
    %72 = vector.load %arg8[%c2_66, %c0_67, %c0_68] : memref<10x10x8xbf16, #tpu.memory_space<vmem>>, vector<8x8x8xbf16>
    %73 = vector.shape_cast %72 : vector<8x8x8xbf16> to vector<64x8xbf16>
    %c6 = arith.constant 6 : index
    %c0_69 = arith.constant 0 : index
    %c0_70 = arith.constant 0 : index
    %74 = vector.load %arg5[%c6, %c0_69, %c0_70] : memref<9x8x8xbf16, #tpu.memory_space<vmem>>, vector<1x8x8xbf16>
    %75 = vector.shape_cast %74 : vector<1x8x8xbf16> to vector<8x8xbf16>
    %cst_71 = arith.constant dense<0.000000e+00> : vector<64x8xf32>
    %76 = tpu.matmul %73, %75, %cst_71 {dimension_numbers = #tpu.dot_dimension_numbers<[1], [0], [0], [1], [0, 0, 1, 1], [], []>} : vector<64x8xbf16>, vector<8x8xbf16>, vector<64x8xf32> -> vector<64x8xf32>
    %77 = arith.addf %71, %76 : vector<64x8xf32>
    %c2_72 = arith.constant 2 : index
    %c1_73 = arith.constant 1 : index
    %c0_74 = arith.constant 0 : index
    %78 = vector.load %arg8[%c2_72, %c1_73, %c0_74] : memref<10x10x8xbf16, #tpu.memory_space<vmem>>, vector<8x8x8xbf16>
    %79 = vector.shape_cast %78 : vector<8x8x8xbf16> to vector<64x8xbf16>
    %c7 = arith.constant 7 : index
    %c0_75 = arith.constant 0 : index
    %c0_76 = arith.constant 0 : index
    %80 = vector.load %arg5[%c7, %c0_75, %c0_76] : memref<9x8x8xbf16, #tpu.memory_space<vmem>>, vector<1x8x8xbf16>
    %81 = vector.shape_cast %80 : vector<1x8x8xbf16> to vector<8x8xbf16>
    %cst_77 = arith.constant dense<0.000000e+00> : vector<64x8xf32>
    %82 = tpu.matmul %79, %81, %cst_77 {dimension_numbers = #tpu.dot_dimension_numbers<[1], [0], [0], [1], [0, 0, 1, 1], [], []>} : vector<64x8xbf16>, vector<8x8xbf16>, vector<64x8xf32> -> vector<64x8xf32>
    %83 = arith.addf %77, %82 : vector<64x8xf32>
    %c2_78 = arith.constant 2 : index
    %c2_79 = arith.constant 2 : index
    %c0_80 = arith.constant 0 : index
    %84 = vector.load %arg8[%c2_78, %c2_79, %c0_80] : memref<10x10x8xbf16, #tpu.memory_space<vmem>>, vector<8x8x8xbf16>
    %85 = vector.shape_cast %84 : vector<8x8x8xbf16> to vector<64x8xbf16>
    %c8 = arith.constant 8 : index
    %c0_81 = arith.constant 0 : index
    %c0_82 = arith.constant 0 : index
    %86 = vector.load %arg5[%c8, %c0_81, %c0_82] : memref<9x8x8xbf16, #tpu.memory_space<vmem>>, vector<1x8x8xbf16>
    %87 = vector.shape_cast %86 : vector<1x8x8xbf16> to vector<8x8xbf16>
    %cst_83 = arith.constant dense<0.000000e+00> : vector<64x8xf32>
    %88 = tpu.matmul %85, %87, %cst_83 {dimension_numbers = #tpu.dot_dimension_numbers<[1], [0], [0], [1], [0, 0, 1, 1], [], []>} : vector<64x8xbf16>, vector<8x8xbf16>, vector<64x8xf32> -> vector<64x8xf32>
    %89 = arith.addf %83, %88 : vector<64x8xf32>
    %cst_84 = arith.constant dense<0.000000e+00> : vector<8xf32>
    %90 = vector.multi_reduction <add>, %89, %cst_84 [0] : vector<64x8xf32> to vector<8xf32>
    %91 = vector.shape_cast %90 : vector<8xf32> to vector<1x8xf32>
    %c0_85 = arith.constant 0 : index
    %c0_86 = arith.constant 0 : index
    %c0_87 = arith.constant 0 : index
    %92 = vector.load %arg7[%c0_85, %c0_86, %c0_87] : memref<1x1x16xf32, #tpu.memory_space<vmem>>, vector<1x1x8xf32>
    %93 = vector.shape_cast %92 : vector<1x1x8xf32> to vector<1x8xf32>
    %94 = vector.shape_cast %91 : vector<1x8xf32> to vector<1x1x8xf32>
    tpu.vector_store %arg7[%c0_85, %c0_86, %c0_87], %94 {strides = array<i32>} : memref<1x1x16xf32, #tpu.memory_space<vmem>>, vector<1x1x8xf32>,
    %95 = arith.mulf %89, %89 : vector<64x8xf32>
    %cst_88 = arith.constant dense<0.000000e+00> : vector<8xf32>
    %96 = vector.multi_reduction <add>, %95, %cst_88 [0] : vector<64x8xf32> to vector<8xf32>
    %97 = vector.shape_cast %96 : vector<8xf32> to vector<1x8xf32>
    %c0_89 = arith.constant 0 : index
    %c0_90 = arith.constant 0 : index
    %c8_91 = arith.constant 8 : index
    %98 = vector.load %arg7[%c0_89, %c0_90, %c8_91] : memref<1x1x16xf32, #tpu.memory_space<vmem>>, vector<1x1x8xf32>
    %99 = vector.shape_cast %98 : vector<1x1x8xf32> to vector<1x8xf32>
    %100 = vector.shape_cast %97 : vector<1x8xf32> to vector<1x1x8xf32>
    tpu.vector_store %arg7[%c0_89, %c0_90, %c8_91], %100 {strides = array<i32>} : memref<1x1x16xf32, #tpu.memory_space<vmem>>, vector<1x1x8xf32>,
    %101 = arith.truncf %89 : vector<64x8xf32> to vector<64x8xbf16>
    %c0_92 = arith.constant 0 : index
    %c0_93 = arith.constant 0 : index
    %c0_94 = arith.constant 0 : index
    %102 = vector.load %arg6[%c0_92, %c0_93, %c0_94] : memref<1x64x8xbf16, #tpu.memory_space<vmem>>, vector<1x64x8xbf16>
    %103 = vector.shape_cast %102 : vector<1x64x8xbf16> to vector<64x8xbf16>
    %104 = vector.shape_cast %101 : vector<64x8xbf16> to vector<1x64x8xbf16>
    tpu.vector_store %arg6[%c0_92, %c0_93, %c0_94], %104 {strides = array<i32>} : memref<1x64x8xbf16, #tpu.memory_space<vmem>>, vector<1x64x8xbf16>,
    return
  }
  func.func @transform_0(%arg0: i32) -> (i32, i32, i32) {
    %c0_i32 = arith.constant 0 : i32
    %c0_i32_0 = arith.constant 0 : i32
    %c0_i32_1 = arith.constant 0 : i32
    return %arg0, %c0_i32, %c0_i32_0 : i32, i32, i32
  }
  func.func @transform_1(%arg0: i32) -> (i32, i32) {
    %c0_i32 = arith.constant 0 : i32
    %c0_i32_0 = arith.constant 0 : i32
    %c0_i32_1 = arith.constant 0 : i32
    return %c0_i32, %c0_i32_0 : i32, i32
  }
  func.func @transform_2(%arg0: i32) -> (i32, i32) {
    %c0_i32 = arith.constant 0 : i32
    %c0_i32_0 = arith.constant 0 : i32
    %c0_i32_1 = arith.constant 0 : i32
    return %c0_i32, %c0_i32_0 : i32, i32
  }
  func.func @transform_3(%arg0: i32) -> (i32, i32) {
    %c0_i32 = arith.constant 0 : i32
    %c0_i32_0 = arith.constant 0 : i32
    %c0_i32_1 = arith.constant 0 : i32
    return %c0_i32, %c0_i32_0 : i32, i32
  }
  func.func @transform_4(%arg0: i32) -> (i32, i32, i32) {
    %c0_i32 = arith.constant 0 : i32
    %c0_i32_0 = arith.constant 0 : i32
    %c0_i32_1 = arith.constant 0 : i32
    %c0_i32_2 = arith.constant 0 : i32
    return %c0_i32, %c0_i32_0, %c0_i32_1 : i32, i32, i32
  }
  func.func @transform_5(%arg0: i32) -> (i32, i32, i32) {
    %c0_i32 = arith.constant 0 : i32
    %c0_i32_0 = arith.constant 0 : i32
    %c0_i32_1 = arith.constant 0 : i32
    return %arg0, %c0_i32, %c0_i32_0 : i32, i32, i32
  }
  func.func @transform_6(%arg0: i32) -> (i32, i32, i32) {
    %c0_i32 = arith.constant 0 : i32
    %c0_i32_0 = arith.constant 0 : i32
    %c0_i32_1 = arith.constant 0 : i32
    return %arg0, %c0_i32, %c0_i32_0 : i32, i32, i32
  }
}

module attributes {stable_mosaic.version = 11 : i64} {
  func.func @_fuse_downsample_kernel(%arg0: i32, %arg1: memref<1x64x8xbf16, #tpu.memory_space<vmem>>, %arg2: memref<1x16xf32, #tpu.memory_space<vmem>>, %arg3: memref<1x8xf32, #tpu.memory_space<vmem>>, %arg4: memref<1x8xf32, #tpu.memory_space<vmem>>, %arg5: memref<1x64x8xbf16, #tpu.memory_space<vmem>>, %arg6: memref<1x16xf32, #tpu.memory_space<vmem>>, %arg7: memref<1x8xf32, #tpu.memory_space<vmem>>, %arg8: memref<1x8xf32, #tpu.memory_space<vmem>>, %arg9: memref<1x64x8xf32, #tpu.memory_space<vmem>>) attributes {dimension_semantics = [#tpu.dimension_semantics<parallel>], iteration_bounds = array<i64: 2>, scalar_prefetch = 0 : i64, scratch_operands = 0 : i64, tpu.core_type = #tpu.core_type<tc>, window_params = [{transform_indices = @transform_0, window_bounds = array<i64: 1, 64, 8>}, {pipeline_mode = #tpu.pipeline_mode<synchronous>, transform_indices = @transform_1, window_bounds = array<i64: 1, 16>}, {pipeline_mode = #tpu.pipeline_mode<synchronous>, transform_indices = @transform_2, window_bounds = array<i64: 1, 8>}, {pipeline_mode = #tpu.pipeline_mode<synchronous>, transform_indices = @transform_3, window_bounds = array<i64: 1, 8>}, {transform_indices = @transform_4, window_bounds = array<i64: 1, 64, 8>}, {pipeline_mode = #tpu.pipeline_mode<synchronous>, transform_indices = @transform_5, window_bounds = array<i64: 1, 16>}, {pipeline_mode = #tpu.pipeline_mode<synchronous>, transform_indices = @transform_6, window_bounds = array<i64: 1, 8>}, {pipeline_mode = #tpu.pipeline_mode<synchronous>, transform_indices = @transform_7, window_bounds = array<i64: 1, 8>}, {transform_indices = @transform_8, window_bounds = array<i64: 1, 64, 8>}]} {
    %c0 = arith.constant 0 : index
    %c0_0 = arith.constant 0 : index
    %0 = vector.load %arg2[%c0, %c0_0] : memref<1x16xf32, #tpu.memory_space<vmem>>, vector<1x16xf32>
    %c0_1 = arith.constant 0 : index
    %c0_2 = arith.constant 0 : index
    %1 = vector.load %arg3[%c0_1, %c0_2] : memref<1x8xf32, #tpu.memory_space<vmem>>, vector<1x8xf32>
    %c0_3 = arith.constant 0 : index
    %c0_4 = arith.constant 0 : index
    %2 = vector.load %arg4[%c0_3, %c0_4] : memref<1x8xf32, #tpu.memory_space<vmem>>, vector<1x8xf32>
    %3 = vector.extract_strided_slice %0 {offsets = [0, 0], sizes = [1, 8], strides = [1, 1]} : vector<1x16xf32> to vector<1x8xf32>
    %cst = arith.constant 7.812500e-03 : f32
    %4 = vector.broadcast %cst : f32 to vector<1x8xf32>
    %5 = arith.mulf %3, %4 : vector<1x8xf32>
    %6 = vector.extract_strided_slice %0 {offsets = [0, 8], sizes = [1, 8], strides = [1, 1]} : vector<1x16xf32> to vector<1x8xf32>
    %cst_5 = arith.constant 7.812500e-03 : f32
    %7 = vector.broadcast %cst_5 : f32 to vector<1x8xf32>
    %8 = arith.mulf %6, %7 : vector<1x8xf32>
    %9 = arith.mulf %5, %5 : vector<1x8xf32>
    %10 = arith.subf %8, %9 : vector<1x8xf32>
    %cst_6 = arith.constant 9.99999974E-6 : f32
    %11 = vector.broadcast %cst_6 : f32 to vector<1x8xf32>
    %12 = arith.addf %10, %11 : vector<1x8xf32>
    %13 = math.rsqrt %12 : vector<1x8xf32>
    %14 = arith.mulf %1, %13 : vector<1x8xf32>
    %15 = arith.mulf %5, %14 : vector<1x8xf32>
    %16 = arith.subf %2, %15 : vector<1x8xf32>
    %c0_7 = arith.constant 0 : index
    %c0_8 = arith.constant 0 : index
    %17 = vector.load %arg6[%c0_7, %c0_8] : memref<1x16xf32, #tpu.memory_space<vmem>>, vector<1x16xf32>
    %c0_9 = arith.constant 0 : index
    %c0_10 = arith.constant 0 : index
    %18 = vector.load %arg7[%c0_9, %c0_10] : memref<1x8xf32, #tpu.memory_space<vmem>>, vector<1x8xf32>
    %c0_11 = arith.constant 0 : index
    %c0_12 = arith.constant 0 : index
    %19 = vector.load %arg8[%c0_11, %c0_12] : memref<1x8xf32, #tpu.memory_space<vmem>>, vector<1x8xf32>
    %20 = vector.extract_strided_slice %17 {offsets = [0, 0], sizes = [1, 8], strides = [1, 1]} : vector<1x16xf32> to vector<1x8xf32>
    %cst_13 = arith.constant 7.812500e-03 : f32
    %21 = vector.broadcast %cst_13 : f32 to vector<1x8xf32>
    %22 = arith.mulf %20, %21 : vector<1x8xf32>
    %23 = vector.extract_strided_slice %17 {offsets = [0, 8], sizes = [1, 8], strides = [1, 1]} : vector<1x16xf32> to vector<1x8xf32>
    %cst_14 = arith.constant 7.812500e-03 : f32
    %24 = vector.broadcast %cst_14 : f32 to vector<1x8xf32>
    %25 = arith.mulf %23, %24 : vector<1x8xf32>
    %26 = arith.mulf %22, %22 : vector<1x8xf32>
    %27 = arith.subf %25, %26 : vector<1x8xf32>
    %cst_15 = arith.constant 9.99999974E-6 : f32
    %28 = vector.broadcast %cst_15 : f32 to vector<1x8xf32>
    %29 = arith.addf %27, %28 : vector<1x8xf32>
    %30 = math.rsqrt %29 : vector<1x8xf32>
    %31 = arith.mulf %18, %30 : vector<1x8xf32>
    %32 = arith.mulf %22, %31 : vector<1x8xf32>
    %33 = arith.subf %19, %32 : vector<1x8xf32>
    %c0_16 = arith.constant 0 : index
    %c0_17 = arith.constant 0 : index
    %c0_18 = arith.constant 0 : index
    %34 = vector.load %arg1[%c0_16, %c0_17, %c0_18] : memref<1x64x8xbf16, #tpu.memory_space<vmem>>, vector<1x64x8xbf16>
    %35 = vector.shape_cast %34 : vector<1x64x8xbf16> to vector<64x8xbf16>
    %36 = arith.extf %35 : vector<64x8xbf16> to vector<64x8xf32>
    %37 = vector.broadcast %14 : vector<1x8xf32> to vector<64x8xf32>
    %38 = arith.mulf %36, %37 : vector<64x8xf32>
    %39 = vector.broadcast %16 : vector<1x8xf32> to vector<64x8xf32>
    %40 = arith.addf %38, %39 : vector<64x8xf32>
    %c0_19 = arith.constant 0 : index
    %c0_20 = arith.constant 0 : index
    %c0_21 = arith.constant 0 : index
    %41 = vector.load %arg5[%c0_19, %c0_20, %c0_21] : memref<1x64x8xbf16, #tpu.memory_space<vmem>>, vector<1x64x8xbf16>
    %42 = vector.shape_cast %41 : vector<1x64x8xbf16> to vector<64x8xbf16>
    %43 = arith.extf %42 : vector<64x8xbf16> to vector<64x8xf32>
    %44 = vector.broadcast %31 : vector<1x8xf32> to vector<64x8xf32>
    %45 = arith.mulf %43, %44 : vector<64x8xf32>
    %46 = vector.broadcast %33 : vector<1x8xf32> to vector<64x8xf32>
    %47 = arith.addf %45, %46 : vector<64x8xf32>
    %48 = arith.addf %40, %47 : vector<64x8xf32>
    %cst_22 = arith.constant 0.000000e+00 : f32
    %49 = vector.broadcast %cst_22 : f32 to vector<64x8xf32>
    %50 = arith.maximumf %48, %49 : vector<64x8xf32>
    %c0_23 = arith.constant 0 : index
    %c0_24 = arith.constant 0 : index
    %c0_25 = arith.constant 0 : index
    %51 = vector.load %arg9[%c0_23, %c0_24, %c0_25] : memref<1x64x8xf32, #tpu.memory_space<vmem>>, vector<1x64x8xf32>
    %52 = vector.shape_cast %51 : vector<1x64x8xf32> to vector<64x8xf32>
    %53 = vector.shape_cast %50 : vector<64x8xf32> to vector<1x64x8xf32>
    tpu.vector_store %arg9[%c0_23, %c0_24, %c0_25], %53 {strides = array<i32>} : memref<1x64x8xf32, #tpu.memory_space<vmem>>, vector<1x64x8xf32>,
    return
  }
  func.func @transform_0(%arg0: i32) -> (i32, i32, i32) {
    %c0_i32 = arith.constant 0 : i32
    %c0_i32_0 = arith.constant 0 : i32
    %c0_i32_1 = arith.constant 0 : i32
    return %arg0, %c0_i32, %c0_i32_0 : i32, i32, i32
  }
  func.func @transform_1(%arg0: i32) -> (i32, i32) {
    %c0_i32 = arith.constant 0 : i32
    %c0_i32_0 = arith.constant 0 : i32
    %c0_i32_1 = arith.constant 0 : i32
    return %c0_i32, %c0_i32_0 : i32, i32
  }
  func.func @transform_2(%arg0: i32) -> (i32, i32) {
    %c0_i32 = arith.constant 0 : i32
    %c0_i32_0 = arith.constant 0 : i32
    %c0_i32_1 = arith.constant 0 : i32
    return %c0_i32, %c0_i32_0 : i32, i32
  }
  func.func @transform_3(%arg0: i32) -> (i32, i32) {
    %c0_i32 = arith.constant 0 : i32
    %c0_i32_0 = arith.constant 0 : i32
    %c0_i32_1 = arith.constant 0 : i32
    return %c0_i32, %c0_i32_0 : i32, i32
  }
  func.func @transform_4(%arg0: i32) -> (i32, i32, i32) {
    %c0_i32 = arith.constant 0 : i32
    %c0_i32_0 = arith.constant 0 : i32
    %c0_i32_1 = arith.constant 0 : i32
    return %arg0, %c0_i32, %c0_i32_0 : i32, i32, i32
  }
  func.func @transform_5(%arg0: i32) -> (i32, i32) {
    %c0_i32 = arith.constant 0 : i32
    %c0_i32_0 = arith.constant 0 : i32
    %c0_i32_1 = arith.constant 0 : i32
    return %c0_i32, %c0_i32_0 : i32, i32
  }
  func.func @transform_6(%arg0: i32) -> (i32, i32) {
    %c0_i32 = arith.constant 0 : i32
    %c0_i32_0 = arith.constant 0 : i32
    %c0_i32_1 = arith.constant 0 : i32
    return %c0_i32, %c0_i32_0 : i32, i32
  }
  func.func @transform_7(%arg0: i32) -> (i32, i32) {
    %c0_i32 = arith.constant 0 : i32
    %c0_i32_0 = arith.constant 0 : i32
    %c0_i32_1 = arith.constant 0 : i32
    return %c0_i32, %c0_i32_0 : i32, i32
  }
  func.func @transform_8(%arg0: i32) -> (i32, i32, i32) {
    %c0_i32 = arith.constant 0 : i32
    %c0_i32_0 = arith.constant 0 : i32
    %c0_i32_1 = arith.constant 0 : i32
    return %arg0, %c0_i32, %c0_i32_0 : i32, i32, i32
  }
}

</mosaic_0001>

<bundles_post_ra>
// kernel: dblock_forward.5
= control target key start
LH: loop header
LB: loop body
LE: loop exit
PB: predicated region body
PF: predicated region fallthrough
CT: control target
= control target key end

     0   :  { %13 = vsyncpa [#allocation3], 0  ;;  %s922_s0 = inlined_call_operand.vmem [shape: bf16[2,64,8], index: 0, kind: input, shape index: {}]   ;;  %s923_s1 = inlined_call_operand.vmem [shape: f32[1,16], index: 1, kind: input, shape index: {}]   ;;  %s924_s2 = inlined_call_operand.vmem [shape: f32[1,8], index: 2, kind: input, shape index: {}]   ;;  %s925_s3 = inlined_call_operand.vmem [shape: f32[1,8], index: 3, kind: input, shape index: {}]   ;;  %s926_s4 = inlined_call_operand.vmem [shape: bf16[2,64,8], index: 4, kind: input, shape index: {}]   ;;  %s927_s5 = inlined_call_operand.vmem [shape: f32[1,16], index: 5, kind: input, shape index: {}]   ;;  %s928_s6 = inlined_call_operand.vmem [shape: f32[1,8], index: 6, kind: input, shape index: {}]   ;;  %s929_s7 = inlined_call_operand.vmem [shape: f32[1,8], index: 7, kind: input, shape index: {}]   ;;  %s930_s8 = inlined_call_operand.hbm [shape: f32[2,64,8], index: 8, kind: output, shape index: {}]  }
   0x1   :  { %15 = vsyncpa [#allocation3 + $0x1], 0  ;;  %s777_s27 = smov 0   ;;  %s779_s28 = smov 0  }
   0x2   :  { %s781_s29 = smov 0   ;;  %s783_s30 = smov 0  }
   0x3 LB: > { %s798_s9 = sadd.s32 4294967295, %s726_s30   ;;  %s563_s10 = sadd.s32 4294967294, %s726_s30   ;;  %s726_s30 = sphi %s783_s30, %s936_s30   ;;  %s722_s29 = sphi %s781_s29, %s935_s29   ;;  %s718_s28 = sphi %s779_s28, %s934_s28   ;;  %s714_s27 = sphi %s777_s27, %s933_s27  }
   0x4   : > { %s802_s11 = sadd.s32 1, %s726_s30   ;;  %s206_s12 = sadd.s32 1, %s722_s29 }
   0x5   : > { %s203_s13 = ssub.s32 %s726_s30, %s802_s11  ;;  %p216_p0 = scmp.ne.s32.totalorder %s722_s29, %s718_s28 }
   0x6   : > { %p204_p1 = scmp.eq.s32.totalorder %s203_s13, 0  ;;  %p217_p2 = scmp.eq.s32.totalorder %s798_s9, 1 }
   0x7   : > { %p222_p3 = scmp.ne.s32.totalorder %s718_s28, %s714_s27  ;;  %p223_p4 = scmp.eq.s32.totalorder %s563_s10, 1 }
   0x8   : > { %s813_s14 = scalar_select %p204_p1, %s722_s29, %s206_s12  }
   0x9   : > { %p815_p5 = por %p217_p2, %p216_p0  ;;  %p819_p6 = por %p223_p4, %p222_p3 }
   0xa   : > { %p566_p7 = scmp.ge.s32.totalorder %s726_s30, 1  ;;  %p275_p8 = scmp.lt.s32.totalorder %s726_s30, 3 }
   0xc   : > { %p276_p9 = pnand %p566_p7, %p275_p8 }
   0xd   : > { %v324_v0 = vld [vmem:[%s923_s1] sm:$0x1] (!%p276_p9)  ;;  %s728_s21 = smov (!%p276_p9), 8   ;;  %s729_s22 = smov (!%p276_p9), 120   ;;  %v379_v14 = vlaneseq (!%p276_p9)  ;;  %vm466_vm0 = vcmask (!%p276_p9), 64512  }
   0xe   : > { %279 = sbr.rel (%p276_p9) target bundleno = 300 (0x12c), region = 52  ;;  %v343_v1 = vld [vmem:[%s927_s5] sm:$0x1] (!%p276_p9)  ;;  %v327_v2 = vmul.f32 (!%p276_p9), 0.0078125, %v324_v0  ;;  %p314_p10 = scmp.lt.s32.totalorder (!%p276_p9), %s798_s9, 1 }
   0xf   : > { %v831_v3 = vmul.f32 (!%p276_p9), 0.0078125, %v343_v1  ;;  %v325_v15 = vld [vmem:[%s924_s2] sm:$0x1] (!%p276_p9)  ;;  %v380_v16 = vshrl.u32 (!%p276_p9), %v379_v14, 7  ;;  %s311_s10 = sand.u32 (!%p276_p9), 1, %s718_s28   ;;  %s730_s25 = smov (!%p276_p9), [#allocation2]  }
  0x10   : > { %v328_v4 = vmul.f32 (!%p276_p9), %v327_v2, %v327_v2  ;;  %v326_v19 = vld [vmem:[%s925_s3] sm:$0x1] (!%p276_p9)  ;;  %s567_s12 = sshll.u32 (!%p276_p9), %s311_s10, 6 }
  0x11   : > { %v347_v5 = vmul.f32 (!%p276_p9), %v831_v3, %v831_v3  ;;  %v381_v20 = vsub.s32 (!%p276_p9), 0, %v380_v16  ;;  %v344_v26 = vld [vmem:[%s928_s6] sm:$0x1] (!%p276_p9)  ;;  %s313_s17 = scalar_lea.vmem (!%p276_p9), [#allocation2], %s567_s12 }
  0x12   : > { %330 = vrot.lane.b32.xlu0 (!%p276_p9), %v328_v4, %s728_s21  ;;  %v345_v56 = vld [vmem:[%s929_s7] sm:$0x1] (!%p276_p9)  ;;  %s489_s18 = sshll.u32 (!%p276_p9), %s313_s17, 4  ;;  %s868_s18 = int_to_ptr.vmem [resolvable:$true] %s489_s18 }
  0x15   : > { %s315_s23 = scalar_select %p314_p10, %s798_s9, 1 }
  0x16   : > { %349 = vrot.lane.b32.xlu0 %v347_v5, %s728_s21 }
  0x17   : > { %s577_s24 = sshll.u32 %s315_s23, 5  ;;  %s664_s23 = scalar_lea.vmem %s868_s18, 1024 }
  0x18   : > { %s318_s13 = scalar_lea.vmem %s922_s0, %s577_s24  ;;  %s323_s19 = scalar_lea.vmem %s926_s4, %s577_s24 }
  0x19   : > { %v581_v21 = vld [vmem:[%s318_s13] sm:$0xff]   ;;  %v612_v22 = vld [vmem:[%s318_s13 + $0x8] sm:$0xff]   ;;  %v613_v24 = vld [vmem:[%s318_s13 + $0x10] sm:$0xff]   ;;  %p665_p11 = scmp.ne.s32.totalorder %s868_s18, %s664_s23  ;;  %s668_s24 = sshll.u32 %s730_s25, 4  ;;  %s669_s24 = int_to_ptr.vmem [resolvable:$false] %s668_s24 }
  0x1a   : > { %v614_v25 = vld [vmem:[%s318_s13 + $0x18] sm:$0xff]   ;;  %v597_v28 = vld [vmem:[%s323_s19] sm:$0xff]   ;;  %v582_v30 = vunpack.c.l.bf16 %v581_v21  ;;  %v583_v31 = vunpack.c.h.bf16 %v581_v21  ;;  %v586_v32 = vunpack.c.l.bf16 %v612_v22  ;;  %v615_v33 = vld [vmem:[%s323_s19 + $0x8] sm:$0xff]   ;;  %v587_v34 = vunpack.c.h.bf16 %v612_v22  ;;  %s579_s13 = sshll.u32 %s798_s9, 10  ;;  %s880_s9 = scalar_lea.sflag [#allocation3], %s311_s10 }
  0x1b   : > { %v590_v35 = vunpack.c.l.bf16 %v613_v24  ;;  %v591_v36 = vunpack.c.h.bf16 %v613_v24  ;;  %v616_v38 = vld [vmem:[%s323_s19 + $0x10] sm:$0xff]   ;;  %v617_v39 = vld [vmem:[%s323_s19 + $0x18] sm:$0xff]   ;;  %v594_v40 = vunpack.c.l.bf16 %v614_v25  ;;  %v595_v41 = vunpack.c.h.bf16 %v614_v25  ;;  %p666_p12 = pnand %p665_p11, %p815_p5  ;;  %s670_s26 = scalar_lea.vmem %s669_s24, 2048 }
  0x1c   : > { %v598_v43 = vunpack.c.l.bf16 %v597_v28  ;;  %v599_v45 = vunpack.c.h.bf16 %v597_v28  ;;  %v602_v46 = vunpack.c.l.bf16 %v615_v33  ;;  %v603_v47 = vunpack.c.h.bf16 %v615_v33  ;;  %p671_p0 = scmp.lt.s32.totalorder %s868_s18, %s669_s24  ;;  %p672_p1 = scmp.lt.s32.totalorder %s670_s26, %s664_s23 }
  0x1d   : > { %v606_v48 = vunpack.c.l.bf16 %v616_v38  ;;  %v607_v49 = vunpack.c.h.bf16 %v616_v38  ;;  %v610_v50 = vunpack.c.l.bf16 %v617_v39  ;;  %v611_v51 = vunpack.c.h.bf16 %v617_v39  ;;  %p667_p13 = pneg %p666_p12 }
  0x1e   : > { %p673_p2 = por %p672_p1, %p671_p0 }
  0x20   : > { %p674_p3 = pnand %p673_p2, %p667_p13 }
  0x84   : > { %v331_v6 = vpop.permute.xlu0 %330 }
  0x85   : > { %v333_v7 = vsub.f32 %v327_v2, %v331_v6 }
  0x87   : > { %v334_v8 = vadd.f32 1e-05, %v333_v7 }
  0x88   : > { %v350_v9 = vpop.permute.xlu0 %349 }
  0x89   : > { %660 = vrsqrt.f32 %v334_v8  ;;  %v352_v10 = vsub.f32 %v831_v3, %v350_v9 }
  0x8b   : > { %v353_v11 = vadd.f32 1e-05, %v352_v10 }
  0x8d   : > { %662 = vrsqrt.f32 %v353_v11 }
  0x93   : > { %v661_v12 = vpop.eup %660 }
  0x94   : > { %337 = vrot.lane.b32.xlu1 %v661_v12, %s729_s22 }
  0x97   : > { %v663_v13 = vpop.eup %662 }
  0x98   : > { %356 = vrot.lane.b32.xlu1 %v663_v13, %s729_s22  ;;  %s866_s22 = scalar_lea.hbm %s930_s8, %s579_s13 }
 0x106   : > { %v338_v17 = vpop.permute.xlu1 %337 }
 0x107   : > { %v340_v18 = vmul.f32 %v338_v17, %v325_v15 }
 0x109   : > { %v341_v23 = vmul.f32 %v340_v18, %v327_v2  ;;  %v382_v37 = vrot.slane %v340_v18, %v381_v20 }
 0x10a   : > { %v357_v27 = vpop.permute.xlu1 %356 }
 0x10b   : > { %v342_v29 = vsub.f32 %v326_v19, %v341_v23  ;;  %v359_v42 = vmul.f32 %v357_v27, %v344_v26  ;;  %v384_v52 = vmul.f32 %v582_v30, %v382_v37  ;;  %v385_v53 = vmul.f32 %v583_v31, %v382_v37 }
 0x10c   : > { %v386_v54 = vmul.f32 %v586_v32, %v382_v37  ;;  %v387_v55 = vmul.f32 %v587_v34, %v382_v37  ;;  %v388_v57 = vmul.f32 %v590_v35, %v382_v37  ;;  %v389_v58 = vmul.f32 %v591_v36, %v382_v37 }
 0x10d   : > { %v396_v44 = vrot.slane %v342_v29, %v381_v20  ;;  %v360_v59 = vmul.f32 %v359_v42, %v831_v3  ;;  %v426_v60 = vrot.slane %v359_v42, %v381_v20  ;;  %v390_v61 = vmul.f32 %v594_v40, %v382_v37 }
 0x10e   : > { %v391_v62 = vmul.f32 %v595_v41, %v382_v37 }
 0x10f   : > { %v398_v63 = vadd.f32 %v396_v44, %v384_v52  ;;  %v399_v0 = vadd.f32 %v396_v44, %v385_v53  ;;  %v400_v1 = vadd.f32 %v396_v44, %v386_v54  ;;  %v401_v2 = vadd.f32 %v396_v44, %v387_v55 }
 0x110   : > { %v402_v4 = vadd.f32 %v396_v44, %v388_v57  ;;  %v361_v5 = vsub.f32 %v345_v56, %v360_v59  ;;  %v403_v6 = vadd.f32 %v396_v44, %v389_v58  ;;  %v404_v7 = vadd.f32 %v396_v44, %v390_v61 }
 0x111   : > { %v405_v8 = vadd.f32 %v396_v44, %v391_v62  ;;  %v428_v9 = vmul.f32 %v598_v43, %v426_v60  ;;  %v429_v10 = vmul.f32 %v599_v45, %v426_v60  ;;  %v430_v11 = vmul.f32 %v602_v46, %v426_v60 }
 0x112   : > { %v431_v3 = vmul.f32 %v603_v47, %v426_v60  ;;  %v440_v12 = vrot.slane %v361_v5, %v381_v20  ;;  %v432_v13 = vmul.f32 %v606_v48, %v426_v60  ;;  %v433_v14 = vmul.f32 %v607_v49, %v426_v60 }
 0x113   : > { %v434_v15 = vmul.f32 %v610_v50, %v426_v60  ;;  %v435_v16 = vmul.f32 %v611_v51, %v426_v60 }
 0x114   : > { %v442_v17 = vadd.f32 %v440_v12, %v428_v9  ;;  %v443_v18 = vadd.f32 %v440_v12, %v429_v10  ;;  %v444_v19 = vadd.f32 %v440_v12, %v430_v11  ;;  %v445_v21 = vadd.f32 %v440_v12, %v431_v3 }
 0x115   : > { %v446_v22 = vadd.f32 %v440_v12, %v432_v13  ;;  %v447_v23 = vadd.f32 %v440_v12, %v433_v14  ;;  %v448_v24 = vadd.f32 %v440_v12, %v434_v15  ;;  %v449_v25 = vadd.f32 %v440_v12, %v435_v16 }
 0x116   : > { %v450_v26 = vadd.f32 %v442_v17, %v398_v63  ;;  %v451_v27 = vadd.f32 %v443_v18, %v399_v0  ;;  %v452_v28 = vadd.f32 %v444_v19, %v400_v1  ;;  %v453_v29 = vadd.f32 %v445_v21, %v401_v2 }
 0x117   : > { %v454_v20 = vadd.f32 %v446_v22, %v402_v4  ;;  %v455_v30 = vadd.f32 %v447_v23, %v403_v6  ;;  %v456_v31 = vadd.f32 %v448_v24, %v404_v7  ;;  %v457_v32 = vadd.f32 %v449_v25, %v405_v8 }
 0x118   : > { %v458_v33 = vmax.f32 %v450_v26, 0.0  ;;  %v459_v34 = vmax.f32 %v451_v27, 0.0  ;;  %v460_v35 = vmax.f32 %v452_v28, 0.0  ;;  %v461_v36 = vmax.f32 %v453_v29, 0.0 }
 0x119   : > { %v462_v37 = vmax.f32 %v454_v20, 0.0  ;;  %v463_v38 = vmax.f32 %v455_v30, 0.0  ;;  %v464_v39 = vmax.f32 %v456_v31, 0.0  ;;  %v465_v40 = vmax.f32 %v457_v32, 0.0 }
 0x11a   : > { %467 = vst.msk [vmem:[%s313_s17] sm:$0xff] %vm466_vm0, %v458_v33  ;;  %468 = vst.msk [vmem:[%s313_s17 + $0x8] sm:$0xff] %vm466_vm0, %v459_v34 }
 0x11b   : > { %469 = vst.msk [vmem:[%s313_s17 + $0x10] sm:$0xff] %vm466_vm0, %v460_v35  ;;  %470 = vst.msk [vmem:[%s313_s17 + $0x18] sm:$0xff] %vm466_vm0, %v461_v36 }
 0x11c   : > { %471 = vst.msk [vmem:[%s313_s17 + $0x20] sm:$0xff] %vm466_vm0, %v462_v37  ;;  %472 = vst.msk [vmem:[%s313_s17 + $0x28] sm:$0xff] %vm466_vm0, %v463_v38 }
 0x11d   : > { %473 = vst.msk [vmem:[%s313_s17 + $0x30] sm:$0xff] %vm466_vm0, %v464_v39  ;;  %474 = vst.msk [vmem:[%s313_s17 + $0x38] sm:$0xff] %vm466_vm0, %v465_v40 }
 0x11e   : > { %677 = shalt.err (!%p674_p3)
}
 0x11f   : > { %s678_s10 = scalar_lea.hbm %s866_s22, 1024  ;;  %s682_s17 = scalar_lea.hbm %s930_s8, 2048 }
 0x120   : > { %p679_p4 = scmp.ne.s32.totalorder %s866_s22, %s678_s10  ;;  %p683_p9 = scmp.lt.u32.totalorder %s866_s22, %s930_s8 }
 0x121   : > { %p684_p10 = scmp.lt.u32.totalorder %s682_s17, %s678_s10  ;;  %p686_p12 = scmp.lt.u32.totalorder %s678_s10, %s866_s22 }
 0x122   : > { %p680_p7 = pnand %p679_p4, %p815_p5 }
 0x123   : > { %p685_p11 = por %p684_p10, %p683_p9 }
 0x124   : > { %p681_p8 = pneg %p680_p7 }
 0x125   : > { %p687_p13 = por %p686_p12, %p685_p11 }
 0x127   : > { %p688_p0 = pnand %p687_p13, %p681_p8 }
 0x129   : > { %691 = shalt.err (!%p688_p0)
}
 0x12a   : > { %s731_s23 = smov 128  }
 0x12b   : > { %618 = dma.vmem_to_hbm [thread:$0]  (%p815_p5), %s868_s18, 1024, %s866_s22, %s880_s9, %s731_s23, %s731_s23, %s728_s21  }
 0x12c PF: > { %p624_p1 = scmp.ge.s32.totalorder %s726_s30, 2  ;;  %s504_s25 = sand.u32 1, %s714_s27  }
 0x12d   : > { %s505_s24 = scalar_lea.sflag [#allocation3], %s504_s25 }
 0x12e   : > { %p621_p2 = pnand %p624_p1, %p819_p6 }
 0x130   : > { %709 = dma.done.wait (!%p621_p2), %s505_s24, 1024  }
 0x131   : > { %711 = vsyncadd (!%p621_p2), %s505_s24, 4294966272  ;;  %p18_p3 = scmp.ge.s32.totalorder %s802_s11, 4   ;;  %s933_s27 = smov %s718_s28 }
 0x132   : > { %s934_s28 = smov %s722_s29  ;;  %s935_s29 = smov %s813_s14 }
 0x133   : > { %s936_s30 = smov %s802_s11  ;;  %20 = sbr.rel (!%p18_p3) target bundleno = 3 (0x3), region = 90 }
 0x13a   :  { %510 = vsyncpa [#allocation3], 1 }
 0x13b   :  { %512 = vsyncpa [#allocation3 + $0x1], 1 }

// kernel: dblock_forward.4
= control target key start
LH: loop header
LB: loop body
LE: loop exit
PB: predicated region body
PF: predicated region fallthrough
CT: control target
= control target key end

     0   :  { %s2697_s21 = smov 0   ;;  %s3293_s0 = inlined_call_operand.vmem [shape: bf16[2,64,8], index: 0, kind: input, shape index: {}]   ;;  %s3294_s1 = inlined_call_operand.vmem [shape: f32[1,16], index: 1, kind: input, shape index: {}]   ;;  %s3295_s2 = inlined_call_operand.vmem [shape: f32[1,8], index: 2, kind: input, shape index: {}]   ;;  %s3296_s3 = inlined_call_operand.vmem [shape: f32[1,8], index: 3, kind: input, shape index: {}]   ;;  %s3297_s4 = inlined_call_operand.vmem [shape: bf16[9,8,8], index: 4, kind: input, shape index: {}]   ;;  %s3298_s5 = inlined_call_operand.vmem [shape: bf16[2,64,8], index: 5, kind: output, shape index: {0}]   ;;  %s3299_s6 = inlined_call_operand.vmem [shape: f32[2,1,16], index: 6, kind: output, shape index: {1}]  }
   0x1 LB: > { %s2247_s22 = sadd.s32 4294967295, %s2657_s21   ;;  %p2251_p0 = scmp.ge.s32.totalorder %s2657_s21, 1  ;;  %s2657_s21 = sphi %s2697_s21, %s17_s21  }
   0x2   : > { %p215_p1 = scmp.lt.s32.totalorder %s2657_s21, 3 }
   0x4   : > { %p216_p2 = pnand %p2251_p0, %p215_p1 }
   0x5   : > { %v262_v0 = vld [vmem:[%s3294_s1] sm:$0x1] (!%p216_p2)  ;;  %s2659_s25 = smov (!%p216_p2), 8   ;;  %vm335_vm0 = vcmask (!%p216_p2), 57344   ;;  %vm341_vm1 = vsmask.f32 (!%p216_p2), 256  ;;  %v298_v56 = vlaneseq (!%p216_p2) }
   0x6   : > { %219 = sbr.rel (%p216_p2) target bundleno = 736 (0x2e0), region = 40  ;;  %v2708_v1 = vmul.f32 (!%p216_p2), 0.0078125, %v262_v0  ;;  %v346_v3 = vld [vmem:[#allocation2 + $0x8] sm:$0x1] (!%p216_p2)  ;;  %v349_v4 = vld [vmem:[#allocation2 + $0x10] sm:$0x1] (!%p216_p2)  ;;  %vm2714_vm2 = vmand (!%p216_p2), %vm335_vm0, %vm341_vm1 }
   0x7   : > { %v352_v6 = vld [vmem:[#allocation2 + $0x18] sm:$0x1] (!%p216_p2)  ;;  %v355_v7 = vld [vmem:[#allocation2 + $0x20] sm:$0x1] (!%p216_p2)  ;;  %v347_v8 = vsel (!%p216_p2), %vm2714_vm2, 0, %v346_v3  ;;  %v350_v9 = vsel (!%p216_p2), %vm2714_vm2, 0, %v349_v4 }
   0x8   : > { %v266_v2 = vmul.f32 (!%p216_p2), %v2708_v1, %v2708_v1  ;;  %v353_v10 = vsel (!%p216_p2), %vm2714_vm2, 0, %v352_v6  ;;  %v356_v11 = vsel (!%p216_p2), %vm2714_vm2, 0, %v355_v7  ;;  %v358_v12 = vld [vmem:[#allocation2 + $0x28] sm:$0x1] (!%p216_p2)  ;;  %348 = vst [vmem:[#allocation2 + $0x8] sm:$0x1] (!%p216_p2), %v347_v8 }
   0x9   : > { %351 = vst [vmem:[#allocation2 + $0x10] sm:$0x1] (!%p216_p2), %v350_v9  ;;  %354 = vst [vmem:[#allocation2 + $0x18] sm:$0x1] (!%p216_p2), %v353_v10  ;;  %v359_v13 = vsel (!%p216_p2), %vm2714_vm2, 0, %v358_v12  ;;  %s2660_s26 = smov (!%p216_p2), 120  }
   0xa   : > { %268 = vrot.lane.b32.xlu0 (!%p216_p2), %v266_v2, %s2659_s25  ;;  %357 = vst [vmem:[#allocation2 + $0x20] sm:$0x1] (!%p216_p2), %v356_v11  ;;  %v361_v14 = vld [vmem:[#allocation2 + $0x30] sm:$0x1] (!%p216_p2)  ;;  %v364_v15 = vld [vmem:[#allocation2 + $0x38] sm:$0x1] (!%p216_p2) }
   0xb   : > { %360 = vst [vmem:[#allocation2 + $0x28] sm:$0x1] (!%p216_p2), %v359_v13  ;;  %v362_v16 = vsel (!%p216_p2), %vm2714_vm2, 0, %v361_v14  ;;  %v365_v17 = vsel (!%p216_p2), %vm2714_vm2, 0, %v364_v15  ;;  %v367_v18 = vld [vmem:[#allocation2 + $0x40] sm:$0x1] (!%p216_p2) }
   0xc   : > { %vm373_vm3 = vsmask.f32 (!%p216_p2), 7938  ;;  %363 = vst [vmem:[#allocation2 + $0x30] sm:$0x1] (!%p216_p2), %v362_v16  ;;  %366 = vst [vmem:[#allocation2 + $0x38] sm:$0x1] (!%p216_p2), %v365_v17 }
   0xd   : > { %v368_v19 = vsel %vm2714_vm2, 0, %v367_v18  ;;  %vm2736_vm4 = vmand %vm335_vm0, %vm373_vm3  ;;  %v384_v21 = vld [vmem:[#allocation2 + $0x1c] sm:$0x1]  ;;  %v387_v22 = vld [vmem:[#allocation2 + $0x24] sm:$0x1]  ;;  %vm333_vm5 = vcmask 60416  }
   0xe   : > { %369 = vst [vmem:[#allocation2 + $0x40] sm:$0x1] %v368_v19  ;;  %v385_v23 = vsel %vm2736_vm4, 0, %v384_v21  ;;  %v388_v24 = vsel %vm2736_vm4, 0, %v387_v22  ;;  %v390_v25 = vld [vmem:[#allocation2 + $0x2c] sm:$0x1]  ;;  %vm2838_vm7 = vmand %vm333_vm5, %vm373_vm3 }
   0xf   : > { %v393_v26 = vld [vmem:[#allocation2 + $0x34] sm:$0x1]  ;;  %386 = vst [vmem:[#allocation2 + $0x1c] sm:$0x1] %v385_v23  ;;  %389 = vst [vmem:[#allocation2 + $0x24] sm:$0x1] %v388_v24 }
  0x10   : > { %v391_v27 = vsel %vm2736_vm4, 0, %v390_v25  ;;  %v394_v28 = vsel %vm2736_vm4, 0, %v393_v26  ;;  %v396_v29 = vld [vmem:[#allocation2 + $0x3c] sm:$0x1]  ;;  %v399_v30 = vld [vmem:[#allocation2 + $0x44] sm:$0x1] }
  0x11   : > { %392 = vst [vmem:[#allocation2 + $0x2c] sm:$0x1] %v391_v27  ;;  %395 = vst [vmem:[#allocation2 + $0x34] sm:$0x1] %v394_v28  ;;  %v397_v31 = vsel %vm2736_vm4, 0, %v396_v29  ;;  %v400_v32 = vsel %vm2736_vm4, 0, %v399_v30 }
  0x12   : > { %398 = vst [vmem:[#allocation2 + $0x3c] sm:$0x1] %v397_v31  ;;  %401 = vst [vmem:[#allocation2 + $0x44] sm:$0x1] %v400_v32  ;;  %v378_v37 = vld [vmem:[#allocation2 + $0xc] sm:$0x1] }
  0x13   : > { %v381_v38 = vld [vmem:[#allocation2 + $0x14] sm:$0x1]  ;;  %v379_v39 = vsel %vm2736_vm4, 0, %v378_v37  ;;  %v2661_v41 = vmov 0   ;;  %v2264_v46 = vld [vmem:[%s3297_s4 + $0x4] sm:$0xf] }
  0x14   : > { %v382_v40 = vsel %vm2736_vm4, 0, %v381_v38  ;;  %334 = vst.msk [vmem:[#allocation2] sm:$0xf] %vm333_vm5, %v2661_v41  ;;  %380 = vst [vmem:[#allocation2 + $0xc] sm:$0x1] %v379_v39  ;;  %vm727_vm6 = vcmask 1043456  }
  0x15   : > { %336 = vst.msk [vmem:[#allocation2 + $0x4] sm:$0x1] %vm335_vm0, %v2661_v41  ;;  %339 = vst.msk [vmem:[#allocation2 + $0x4c] sm:$0x1] %vm335_vm0, %v2661_v41  ;;  %v2307_v47 = vld [vmem:[%s3297_s4 + $0x10] sm:$0xf]  ;;  %2616 = vmatprep.subr.msk.bf16.mxu1 %vm727_vm6, %v2264_v46 }
  0x16   : > { %338 = vst.msk [vmem:[#allocation2 + $0x48] sm:$0xf] %vm333_vm5, %v2661_v41  ;;  %383 = vst [vmem:[#allocation2 + $0x14] sm:$0x1] %v382_v40  ;;  %2620 = vmatprep.subr.msk.bf16.mxu0 %vm727_vm6, %v2307_v47  ;;  %v729_v48 = vsel %vm727_vm6, %v2264_v46, 0  ;;  %v2775_v49 = vsel %vm727_vm6, %v2307_v47, 0 }
  0x17   : > { %2461 = vmatpush3.bf16.msra.mxu1 %v729_v48  ;;  %2501 = vmatpush3.bf16.msra.mxu0 %v2775_v49  ;;  %v2781_v50 = vld [vmem:[%s3297_s4] sm:$0xf]  ;;  %v2788_v51 = vld [vmem:[%s3297_s4 + $0x14] sm:$0xf]  ;;  %p248_p3 = scmp.lt.s32.totalorder %s2247_s22, 1  ;;  %v299_v57 = vshrl.u32 %v298_v56, 7 }
  0x18   : > { %2617 = vmatprep.subr.msk.bf16.mxu1 %vm727_vm6, %v2781_v50  ;;  %2622 = vmatprep.subr.msk.bf16.mxu0 %vm727_vm6, %v2788_v51  ;;  %v263_v59 = vld [vmem:[%s3295_s2] sm:$0x1]  ;;  %vm585_vm8 = vsmask.f32 3328  ;;  %vm586_vm9 = vsmask.f32 7440 }
  0x19   : > { %s3311_s22 = smov (!%p248_p3, %s2247_s22), 1  ;;  %v300_v62 = vsub.s32 0, %v299_v57  ;;  %v264_v7 = vld [vmem:[%s3296_s3] sm:$0x1]  ;;  %vm714_vm10 = vcmask 64512   ;;  %vm2894_vm11 = vmor %vm585_vm8, %vm586_vm9  ;;  %vm920_vm12 = vcmask 1042432  }
  0x1a   : > { %s2378_s11 = sshll.u32 %s3311_s22, 5  ;;  %vm921_vm13 = vcmask 1046532   ;;  %s260_s15 = scalar_lea.vmem %s3299_s6, %s3311_s22  ;;  %vm2125_vm15 = vcmask 122944  }
  0x1b   : > { %v343_v42 = vld [vmem:[#allocation2] sm:$0x1]  ;;  %s252_s14 = scalar_lea.vmem %s3293_s0, %s2378_s11  ;;  %vm2975_vm14 = vmor %vm920_vm12, %vm921_vm13  ;;  %s3250_s13 = scalar_lea.vmem %s3298_s5, %s2378_s11 }
  0x1c   : > { %v375_v43 = vld [vmem:[#allocation2 + $0x4] sm:$0x1]  ;;  %v344_v44 = vsel %vm2714_vm2, 0, %v343_v42  ;;  %v402_v54 = vld [vmem:[#allocation2 + $0x4c] sm:$0x1]  ;;  %v2413_v4 = vld [vmem:[%s252_s14 + $0x10] sm:$0xff]  }
  0x1d   : > { %v376_v45 = vsel %vm2736_vm4, 0, %v375_v43  ;;  %345 = vst [vmem:[#allocation2] sm:$0x1] %v344_v44  ;;  %v370_v52 = vld [vmem:[#allocation2 + $0x48] sm:$0x1]  ;;  %v403_v55 = vsel %vm2736_vm4, 0, %v402_v54  ;;  %v2406_v16 = vunpack.c.l.bf16 %v2413_v4  ;;  %v2407_v17 = vunpack.c.h.bf16 %v2413_v4 }
  0x1e   : > { %377 = vst [vmem:[#allocation2 + $0x4] sm:$0x1] %v376_v45  ;;  %v371_v53 = vsel %vm2714_vm2, 0, %v370_v52  ;;  %404 = vst [vmem:[#allocation2 + $0x4c] sm:$0x1] %v403_v55  ;;  %v2397_v63 = vld [vmem:[%s252_s14] sm:$0xff]  }
  0x1f   : > { %372 = vst [vmem:[#allocation2 + $0x48] sm:$0x1] %v371_v53  ;;  %v2412_v2 = vld [vmem:[%s252_s14 + $0x8] sm:$0xff]   ;;  %v2414_v6 = vld [vmem:[%s252_s14 + $0x18] sm:$0xff]   ;;  %v2398_v8 = vunpack.c.l.bf16 %v2397_v63  ;;  %v2399_v9 = vunpack.c.h.bf16 %v2397_v63 }
  0x20   : > { %v2402_v13 = vunpack.c.l.bf16 %v2412_v2  ;;  %v2403_v14 = vunpack.c.h.bf16 %v2412_v2  ;;  %v2410_v18 = vunpack.c.l.bf16 %v2414_v6  ;;  %v2411_v19 = vunpack.c.h.bf16 %v2414_v6 }
  0x24   : > { %v2803_v58 = vld [vmem:[#allocation2] sm:$0xf] }
  0x25   : > { %v589_v60 = vshrl.u32 %v2803_v58, 16  ;;  %v592_v61 = vshll.u32 %v2803_v58, 16  ;;  %v2823_v21 = vld [vmem:[#allocation2 + $0x4] sm:$0x1] }
  0x26   : > { %v598_v24 = vshll.u32 %v2823_v21, 16 }
  0x27   : > { %v2818_v10 = vrot.slane %v589_v60, 4  ;;  %v2820_v11 = vrot.slane %v592_v61, 5 }
  0x29   : > { %v595_v23 = vor.u32 %v2820_v11, %v2818_v10 }
  0x7c   : > { %v269_v33 = vpop.permute.xlu0 %268 }
  0x7d   : > { %v271_v34 = vsub.f32 %v2708_v1, %v269_v33 }
  0x7f   : > { %v272_v35 = vadd.f32 1e-05, %v271_v34 }
  0x81   : > { %2648 = vrsqrt.f32 %v272_v35 }
  0x8b   : > { %v2649_v36 = vpop.eup %2648 }
  0x8c   : > { %275 = vrot.lane.b32.xlu0 %v2649_v36, %s2660_s26 }
  0xfe   : > { %v276_v0 = vpop.permute.xlu0 %275 }
  0xff   : > { %v278_v3 = vmul.f32 %v276_v0, %v263_v59 }
 0x101   : > { %v279_v12 = vmul.f32 %v278_v3, %v2708_v1  ;;  %v301_v15 = vrot.slane %v278_v3, %v300_v62 }
 0x103   : > { %v280_v20 = vsub.f32 %v264_v7, %v279_v12  ;;  %v303_v22 = vmul.f32 %v2398_v8, %v301_v15  ;;  %v304_v25 = vmul.f32 %v2399_v9, %v301_v15  ;;  %v305_v26 = vmul.f32 %v2402_v13, %v301_v15  ;;  %v520_v12 = vld [vmem:[#allocation2 + $0x8] sm:$0xf] }
 0x104   : > { %v306_v27 = vmul.f32 %v2403_v14, %v301_v15  ;;  %v307_v28 = vmul.f32 %v2406_v16, %v301_v15  ;;  %v308_v29 = vmul.f32 %v2407_v17, %v301_v15  ;;  %v309_v30 = vmul.f32 %v2410_v18, %v301_v15  ;;  %v526_v18 = vld [vmem:[#allocation2 + $0x10] sm:$0xf] }
 0x105   : > { %v315_v1 = vrot.slane %v280_v20, %v300_v62  ;;  %v310_v31 = vmul.f32 %v2411_v19, %v301_v15  ;;  %v532_v19 = vld [vmem:[#allocation2 + $0x18] sm:$0xf] }
 0x107   : > { %v317_v32 = vadd.f32 %v315_v1, %v303_v22  ;;  %v318_v33 = vadd.f32 %v315_v1, %v304_v25  ;;  %v319_v34 = vadd.f32 %v315_v1, %v305_v26  ;;  %v320_v35 = vadd.f32 %v315_v1, %v306_v27  ;;  %v538_v27 = vld [vmem:[#allocation2 + $0x20] sm:$0xf] }
 0x108   : > { %v321_v36 = vadd.f32 %v315_v1, %v307_v28  ;;  %v322_v37 = vadd.f32 %v315_v1, %v308_v29  ;;  %v323_v38 = vadd.f32 %v315_v1, %v309_v30  ;;  %v324_v39 = vadd.f32 %v315_v1, %v310_v31  ;;  %v544_v1 = vld [vmem:[#allocation2 + $0x28] sm:$0xf] }
 0x109   : > { %v325_v40 = vmax.f32 %v317_v32, 0.0  ;;  %v326_v41 = vmax.f32 %v318_v33, 0.0  ;;  %v327_v42 = vmax.f32 %v319_v34, 0.0  ;;  %v328_v43 = vmax.f32 %v320_v35, 0.0  ;;  %v535_v32 = vld [vmem:[#allocation2 + $0x1c] sm:$0x1] }
 0x10a   : > { %v329_v44 = vmax.f32 %v321_v36, 0.0  ;;  %v330_v45 = vmax.f32 %v322_v37, 0.0  ;;  %v331_v46 = vmax.f32 %v323_v38, 0.0  ;;  %v332_v47 = vmax.f32 %v324_v39, 0.0  ;;  %v541_v37 = vld [vmem:[#allocation2 + $0x24] sm:$0x1] }
 0x10b   : > { %v2380_v48 = vpack.c.bf16 %v325_v40, %v325_v40  ;;  %v2381_v52 = vpack.c.bf16 %v326_v41, %v326_v41  ;;  %v2382_v53 = vpack.c.bf16 %v327_v42, %v327_v42  ;;  %v2383_v54 = vpack.c.bf16 %v328_v43, %v328_v43  ;;  %v547_v38 = vld [vmem:[#allocation2 + $0x2c] sm:$0x1]  ;;  %v550_v39 = vld [vmem:[#allocation2 + $0x30] sm:$0xf] }
 0x10c   : > { %v2384_v55 = vpack.c.bf16 %v329_v44, %v329_v44  ;;  %v2385_v56 = vpack.c.bf16 %v330_v45, %v330_v45  ;;  %v2828_v57 = vpack.c.bf16 %v331_v46, %v331_v46  ;;  %v2830_v59 = vpack.c.bf16 %v332_v47, %v332_v47  ;;  %v553_v44 = vld [vmem:[#allocation2 + $0x34] sm:$0x1]  ;;  %v556_v45 = vld [vmem:[#allocation2 + $0x38] sm:$0xf] }
 0x10d   : > { %v438_v60 = vshrl.u32 %v2380_v48, 16  ;;  %v441_v61 = vshll.u32 %v2380_v48, 16  ;;  %v446_v62 = vshrl.u32 %v2381_v52, 16  ;;  %v449_v63 = vshll.u32 %v2381_v52, 16 }
 0x10e   : > { %v454_v0 = vshrl.u32 %v2382_v53, 16  ;;  %v457_v2 = vshll.u32 %v2382_v53, 16  ;;  %v462_v3 = vshrl.u32 %v2383_v54, 16  ;;  %v465_v4 = vshll.u32 %v2383_v54, 16 }
 0x10f   : > { %v2832_v6 = vrot.slane %v438_v60, 7  ;;  %v2834_v7 = vrot.slane %v446_v62, 7  ;;  %v470_v8 = vshrl.u32 %v2384_v55, 16  ;;  %v473_v9 = vshll.u32 %v2384_v55, 16  ;;  %v559_v60 = vld [vmem:[#allocation2 + $0x3c] sm:$0x1] }
 0x110   : > { %v456_v13 = vrot.slane %v454_v0, 7  ;;  %v464_v14 = vrot.slane %v462_v3, 7  ;;  %v478_v15 = vshrl.u32 %v2385_v56, 16  ;;  %v481_v16 = vshll.u32 %v2385_v56, 16  ;;  %v565_v62 = vld [vmem:[#allocation2 + $0x44] sm:$0x1] }
 0x111   : > { %v443_v20 = vor.u32 %v441_v61, %v2832_v6  ;;  %v444_v22 = vrot.slane %v2832_v6, 4  ;;  %v451_v25 = vor.u32 %v449_v63, %v2834_v7  ;;  %v452_v26 = vrot.slane %v2834_v7, 4  ;;  %v562_v61 = vld [vmem:[#allocation2 + $0x40] sm:$0xf] }
 0x112   : > { %v459_v28 = vor.u32 %v457_v2, %v456_v13  ;;  %v460_v29 = vrot.slane %v456_v13, 4  ;;  %v467_v30 = vor.u32 %v465_v4, %v464_v14  ;;  %v468_v31 = vrot.slane %v464_v14, 4 }
 0x113   : > { %v472_v33 = vrot.slane %v470_v8, 7  ;;  %v480_v34 = vrot.slane %v478_v15, 7  ;;  %v486_v35 = vshrl.u32 %v2828_v57, 16  ;;  %v489_v36 = vshll.u32 %v2828_v57, 16  ;;  %v523_v57 = vld [vmem:[#allocation2 + $0xc] sm:$0x1] }
 0x114   : > { %v494_v40 = vshrl.u32 %v2830_v59, 16  ;;  %v497_v41 = vshll.u32 %v2830_v59, 16  ;;  %v521_v42 = vsel %vm2838_vm7, %v443_v20, %v520_v12  ;;  %v527_v43 = vsel %vm2838_vm7, %v451_v25, %v526_v18  ;;  %v529_v59 = vld [vmem:[#allocation2 + $0x14] sm:$0x1] }
 0x115   : > { %v475_v46 = vor.u32 %v473_v9, %v472_v33  ;;  %v476_v47 = vrot.slane %v472_v33, 4  ;;  %v483_v48 = vor.u32 %v481_v16, %v480_v34  ;;  %v484_v52 = vrot.slane %v480_v34, 4  ;;  %522 = vst [vmem:[#allocation2 + $0x8] sm:$0xf] %v521_v42  ;;  %528 = vst [vmem:[#allocation2 + $0x10] sm:$0xf] %v527_v43 }
 0x116   : > { %v488_v53 = vrot.slane %v486_v35, 7  ;;  %v496_v54 = vrot.slane %v494_v40, 7  ;;  %v533_v55 = vsel %vm2838_vm7, %v459_v28, %v532_v19  ;;  %v536_v56 = vsel %vm2714_vm2, %v460_v29, %v535_v32 }
 0x117   : > { %534 = vst [vmem:[#allocation2 + $0x18] sm:$0xf] %v533_v55  ;;  %v539_v63 = vsel %vm2838_vm7, %v467_v30, %v538_v27  ;;  %v542_v0 = vsel %vm2714_vm2, %v468_v31, %v541_v37  ;;  %v545_v2 = vsel %vm2838_vm7, %v475_v46, %v544_v1  ;;  %v548_v3 = vsel %vm2714_vm2, %v476_v47, %v547_v38 }
 0x118   : > { %537 = vst [vmem:[#allocation2 + $0x1c] sm:$0x1] %v536_v56  ;;  %v491_v4 = vor.u32 %v489_v36, %v488_v53  ;;  %v492_v6 = vrot.slane %v488_v53, 4  ;;  %v499_v7 = vor.u32 %v497_v41, %v496_v54  ;;  %v500_v8 = vrot.slane %v496_v54, 4  ;;  %546 = vst [vmem:[#allocation2 + $0x28] sm:$0xf] %v545_v2 }
 0x119   : > { %540 = vst [vmem:[#allocation2 + $0x20] sm:$0xf] %v539_v63  ;;  %543 = vst [vmem:[#allocation2 + $0x24] sm:$0x1] %v542_v0  ;;  %v551_v9 = vsel %vm2838_vm7, %v483_v48, %v550_v39  ;;  %v554_v12 = vsel %vm2714_vm2, %v484_v52, %v553_v44  ;;  %v524_v13 = vsel %vm2714_vm2, %v444_v22, %v523_v57  ;;  %v600_v20 = vrot.slane %v598_v24, 5 }
 0x11a   : > { %549 = vst [vmem:[#allocation2 + $0x2c] sm:$0x1] %v548_v3  ;;  %v530_v14 = vsel %vm2714_vm2, %v452_v26, %v529_v59  ;;  %552 = vst [vmem:[#allocation2 + $0x30] sm:$0xf] %v551_v9  ;;  %v557_v15 = vsel %vm2838_vm7, %v491_v4, %v556_v45  ;;  %v560_v16 = vsel %vm2714_vm2, %v492_v6, %v559_v60  ;;  %v596_v29 = vrot.slane %v595_v23, 4 }
 0x11b   : > { %v563_v18 = vsel %vm2838_vm7, %v499_v7, %v562_v61  ;;  %v566_v19 = vsel %vm2714_vm2, %v500_v8, %v565_v62  ;;  %555 = vst [vmem:[#allocation2 + $0x34] sm:$0x1] %v554_v12  ;;  %525 = vst [vmem:[#allocation2 + $0xc] sm:$0x1] %v524_v13  ;;  %v2917_v54 = vsel %vm727_vm6, %v2781_v50, 0  ;;  %v2921_v59 = vsel %vm727_vm6, %v2788_v51, 0 }
 0x11c   : > { %531 = vst [vmem:[#allocation2 + $0x14] sm:$0x1] %v530_v14  ;;  %558 = vst [vmem:[#allocation2 + $0x38] sm:$0xf] %v557_v15  ;;  %v2884_v22 = vld [vmem:[#allocation2 + $0x8] sm:$0xf]  ;;  %v601_v42 = vsel %vm2894_vm11, %v596_v29, %v600_v20 }
 0x11d   : > { %561 = vst [vmem:[#allocation2 + $0x3c] sm:$0x1] %v560_v16  ;;  %564 = vst [vmem:[#allocation2 + $0x40] sm:$0xf] %v563_v18  ;;  %v1175_v25 = vld [vmem:[#allocation2 + $0x8] sm:$0xf] }
 0x11e   : > { %567 = vst [vmem:[#allocation2 + $0x44] sm:$0x1] %v566_v19  ;;  %v1177_v17 = vld [vmem:[#allocation2 + $0x10] sm:$0xf]  ;;  %v603_v26 = vshrl.u32 %v2884_v22, 16  ;;  %v606_v5 = vshll.u32 %v2884_v22, 16 }
 0x11f   : > { %v1192_v27 = vshrl.u32 %v1175_v25, 16  ;;  %v1195_v1 = vshll.u32 %v1175_v25, 16  ;;  %v2888_v28 = vld [vmem:[#allocation2 + $0x10] sm:$0xf]  ;;  %v1206_v30 = vshrl.u32 %v1177_v17, 16  ;;  %v1209_v31 = vshll.u32 %v1177_v17, 16 }
 0x120   : > { %v605_v32 = vrot.slane %v603_v26, 4  ;;  %v608_v33 = vrot.slane %v606_v5, 5  ;;  %v617_v38 = vshrl.u32 %v2888_v28, 16  ;;  %v620_v39 = vshll.u32 %v2888_v28, 16  ;;  %v2913_v53 = vld [vmem:[#allocation2 + $0x18] sm:$0xf] }
 0x121   : > { %v1194_v34 = vrot.slane %v1192_v27, 4  ;;  %v1197_v35 = vrot.slane %v1195_v1, 5  ;;  %v1208_v36 = vrot.slane %v1206_v30, 4  ;;  %v1211_v37 = vrot.slane %v1209_v31, 5  ;;  %v2923_v61 = vld [vmem:[#allocation2 + $0x1c] sm:$0x1] }
 0x122   : > { %v2900_v10 = vld [vmem:[#allocation2 + $0xc] sm:$0x1]  ;;  %v609_v11 = vor.u32 %v608_v33, %v605_v32  ;;  %v619_v62 = vrot.slane %v617_v38, 4  ;;  %v622_v63 = vrot.slane %v620_v39, 5  ;;  %v631_v3 = vshrl.u32 %v2913_v53, 16 }
 0x123   : > { %v2902_v23 = vld [vmem:[#allocation2 + $0xc] sm:$0x1]  ;;  %v2904_v40 = vld [vmem:[#allocation2 + $0x14] sm:$0x1]  ;;  %v1198_v41 = vor.u32 %v1197_v35, %v1194_v34  ;;  %v612_v43 = vshll.u32 %v2900_v10, 16  ;;  %v1212_v45 = vor.u32 %v1211_v37, %v1208_v36  ;;  %v634_v4 = vshll.u32 %v2913_v53, 16 }
 0x124   : > { %v1201_v44 = vshll.u32 %v2902_v23, 16  ;;  %v2910_v46 = vld [vmem:[#allocation2 + $0x14] sm:$0x1]  ;;  %v610_v47 = vrot.slane %v609_v11, 4  ;;  %v1215_v52 = vshll.u32 %v2904_v40, 16  ;;  %v1431_v8 = vrot.slane %v2902_v23, 5 }
 0x125   : > { %v1199_v48 = vrot.slane %v1198_v41, 4  ;;  %v614_v55 = vrot.slane %v612_v43, 5  ;;  %v1213_v57 = vrot.slane %v1212_v45, 4  ;;  %v626_v0 = vshll.u32 %v2910_v46, 16  ;;  %v1179_v6 = vld [vmem:[#allocation2 + $0x18] sm:$0xf] }
 0x126   : > { %v1203_v56 = vrot.slane %v1201_v44, 5  ;;  %v1217_v60 = vrot.slane %v1215_v52, 5  ;;  %v623_v9 = vor.u32 %v622_v63, %v619_v62  ;;  %v2935_v12 = vld [vmem:[#allocation2 + $0x1c] sm:$0x1]  ;;  %v633_v14 = vrot.slane %v631_v3, 4 }
 0x127   : > { %v615_v2 = vsel %vm2894_vm11, %v610_v47, %v614_v55  ;;  %v636_v15 = vrot.slane %v634_v4, 5  ;;  %v640_v16 = vshll.u32 %v2923_v61, 16  ;;  %v1181_v18 = vld [vmem:[#allocation2 + $0x20] sm:$0xf]  ;;  %v1435_v19 = vrot.slane %v2904_v40, 5 }
 0x128   : > { %v1204_v50 = vsel %vm2894_vm11, %v1199_v48, %v1203_v56  ;;  %v2265_v51 = vcombine.low %v601_v42, %v615_v2  ;;  %v1218_v7 = vsel %vm2894_vm11, %v1213_v57, %v1217_v60  ;;  %v624_v20 = vrot.slane %v623_v9, 4  ;;  %v2940_v17 = vld [vmem:[#allocation2 + $0x24] sm:$0x1]  ;;  %v2946_v34 = vld [vmem:[#allocation2 + $0x20] sm:$0xf] }
 0x129   : > { %v2308_v13 = vcombine.low %v1204_v50, %v1218_v7  ;;  %v628_v25 = vrot.slane %v626_v0, 5  ;;  %v1220_v26 = vshrl.u32 %v1179_v6, 16  ;;  %v637_v5 = vor.u32 %v636_v15, %v633_v14  ;;  %v2949_v39 = vld [vmem:[#allocation2 + $0x24] sm:$0x1]  ;;  %v2953_v44 = vld [vmem:[#allocation2 + $0x28] sm:$0xf] }
 0x12a   : > { %2462 = vmatprep.mubr.msk.bf16.mxu1 %vm714_vm10, %v2265_v51  ;;  %v642_v27 = vrot.slane %v640_v16, 5  ;;  %v1223_v1 = vshll.u32 %v1179_v6, 16  ;;  %v1229_v29 = vshll.u32 %v2935_v12, 16  ;;  %v1234_v32 = vshrl.u32 %v1181_v18, 16  ;;  %v2957_v52 = vld [vmem:[#allocation2 + $0x2c] sm:$0x1] }
 0x12b   : > { %2502 = vmatprep.mubr.msk.bf16.mxu0 %vm714_vm10, %v2308_v13  ;;  %v629_v30 = vsel %vm2894_vm11, %v624_v20, %v628_v25  ;;  %v1222_v31 = vrot.slane %v1220_v26, 4  ;;  %v1237_v33 = vshll.u32 %v1181_v18, 16  ;;  %v638_v35 = vrot.slane %v637_v5, 4  ;;  %v2963_v56 = vld [vmem:[%s3297_s4 + $0x8] sm:$0xf] }
 0x12c   : > { %v1225_v36 = vrot.slane %v1223_v1, 5  ;;  %v1231_v37 = vrot.slane %v1229_v29, 5  ;;  %v1243_v38 = vshll.u32 %v2940_v17, 16  ;;  %v1236_v11 = vrot.slane %v1234_v32, 4  ;;  %v1405_v0 = vld [vmem:[#allocation2 + $0x8] sm:$0xe] }
 0x12d   : > { %v1239_v41 = vrot.slane %v1237_v33, 5  ;;  %v1439_v42 = vrot.slane %v2935_v12, 5  ;;  %v1443_v43 = vrot.slane %v2940_v17, 5  ;;  %v643_v45 = vsel %vm2894_vm11, %v638_v35, %v642_v27  ;;  %v1406_v2 = vld [vmem:[#allocation2 + $0x10] sm:$0xe] }
 0x12e   : > { %v1226_v47 = vor.u32 %v1225_v36, %v1222_v31  ;;  %v1245_v48 = vrot.slane %v1243_v38, 5  ;;  %v645_v55 = vshrl.u32 %v2946_v34, 16  ;;  %v2266_v57 = vcombine.low %v629_v30, %v643_v45  ;;  %v2969_v51 = vld [vmem:[#allocation2 + $0x30] sm:$0xf]  ;;  %v2979_v16 = vld [vmem:[#allocation2 + $0x38] sm:$0xf] }
 0x12f   : > { %v1240_v60 = vor.u32 %v1239_v41, %v1236_v11  ;;  %v648_v62 = vshll.u32 %v2946_v34, 16  ;;  %v654_v63 = vshll.u32 %v2949_v39, 16  ;;  %v659_v4 = vshrl.u32 %v2953_v44, 16  ;;  %v2984_v5 = vld [vmem:[#allocation2 + $0x34] sm:$0x1] }
 0x130   : > { %v1227_v50 = vrot.slane %v1226_v47, 4  ;;  %v647_v3 = vrot.slane %v645_v55, 4  ;;  %v662_v6 = vshll.u32 %v2953_v44, 16  ;;  %2463 = vmatmul.mubr.msk.bf16.vlgmr.msra.gmra.mrb[0].mxu1 %vm714_vm10, %v2266_v57  ;;  %v668_v14 = vshll.u32 %v2957_v52, 16  ;;  %v2988_v31 = vld [vmem:[#allocation2 + $0x3c] sm:$0x1] }
 0x131   : > { %v1241_v7 = vrot.slane %v1240_v60, 4  ;;  %v650_v9 = vrot.slane %v648_v62, 5  ;;  %v656_v13 = vrot.slane %v654_v63, 5  ;;  %2471 = vmatpush3.bf16.msra.mxu1 %v2917_v54  ;;  %v661_v20 = vrot.slane %v659_v4, 4  ;;  %v2333_v54 = vld [vmem:[%s3297_s4 + $0x18] sm:$0xf] }
 0x132   : > { %v1232_v18 = vsel %vm2894_vm11, %v1227_v50, %v1231_v37  ;;  %v664_v25 = vrot.slane %v662_v6, 5  ;;  %v2316_v26 = vrot.slane %v1405_v0, 9  ;;  %v670_v29 = vrot.slane %v668_v14, 5  ;;  %v1407_v32 = vld [vmem:[#allocation2 + $0x18] sm:$0xe]  ;;  %2618 = vmatprep.subr.msk.bf16.mxu1 %vm727_vm6, %v2963_v56 }
 0x133   : > { %v1246_v27 = vsel %vm2894_vm11, %v1241_v7, %v1245_v48  ;;  %v651_v1 = vor.u32 %v650_v9, %v647_v3  ;;  %v2317_v30 = vrot.slane %v1406_v2, 9  ;;  %v673_v37 = vshrl.u32 %v2969_v51, 16  ;;  %v1408_v47 = vld [vmem:[#allocation2 + $0x20] sm:$0xe]  ;;  %v3008_v57 = vld [vmem:[#allocation2 + $0x2c] sm:$0x1] }
 0x134   : > { %v2309_v33 = vcombine.low %v1232_v18, %v1246_v27  ;;  %v665_v35 = vor.u32 %v664_v25, %v661_v20  ;;  %v1432_v36 = vsel %vm2975_vm14, %v2316_v26, %v1431_v8  ;;  %v676_v41 = vshll.u32 %v2969_v51, 16  ;;  %v1409_v60 = vld [vmem:[#allocation2 + $0x28] sm:$0xe]  ;;  %v1410_v63 = vld [vmem:[#allocation2 + $0x30] sm:$0xe] }
 0x135   : > { %v652_v38 = vrot.slane %v651_v1, 4  ;;  %v1436_v11 = vsel %vm2975_vm14, %v2317_v30, %v1435_v19  ;;  %v682_v45 = vshll.u32 %v2984_v5, 16  ;;  %v675_v55 = vrot.slane %v673_v37, 4  ;;  %v3019_v9 = vld [vmem:[#allocation2 + $0x34] sm:$0x1] }
 0x136   : > { %2503 = vmatmul.mubr.msk.bf16.vlgmr.msra.gmra.mrb[0].mxu0 %vm714_vm10, %v2309_v33  ;;  %v666_v48 = vrot.slane %v665_v35, 4  ;;  %v2325_v23 = vcombine.low %v1432_v36, %v1436_v11  ;;  %v687_v8 = vshrl.u32 %v2979_v16, 16  ;;  %v678_v19 = vrot.slane %v676_v41, 5  ;;  %v3036_v37 = vld [vmem:[#allocation2 + $0x3c] sm:$0x1] }
 0x137   : > { %2511 = vmatpush3.bf16.msra.mxu0 %v2921_v59  ;;  %v657_v40 = vsel %vm2894_vm11, %v652_v38, %v656_v13  ;;  %v690_v62 = vshll.u32 %v2979_v16, 16  ;;  %v696_v50 = vshll.u32 %v2988_v31, 16  ;;  %v2318_v3 = vrot.slane %v1407_v32, 9  ;;  %v1696_v32 = vld [vmem:[#allocation2 + $0x48] sm:$0xf] }
 0x138   : > { %v671_v0 = vsel %vm2894_vm11, %v666_v48, %v670_v29  ;;  %2512 = vmatprep.mubr.msk.bf16.mxu0 %vm714_vm10, %v2325_v23  ;;  %v689_v2 = vrot.slane %v687_v8, 4  ;;  %2623 = vmatprep.subr.msk.bf16.mxu0 %vm727_vm6, %v2333_v54  ;;  %v679_v59 = vor.u32 %v678_v19, %v675_v55  ;;  %v2319_v7 = vrot.slane %v1408_v47, 9  ;;  %v1411_v38 = vld [vmem:[#allocation2 + $0x38] sm:$0xe]  ;;  %v1412_v11 = vld [vmem:[#allocation2 + $0x40] sm:$0xe] }
 0x139   : > { %v2267_v4 = vcombine.low %v657_v40, %v671_v0  ;;  %v692_v6 = vrot.slane %v690_v62, 5  ;;  %v684_v13 = vrot.slane %v682_v45, 5  ;;  %v2320_v14 = vrot.slane %v1409_v60, 9  ;;  %v896_v45 = vld [vmem:[#allocation2] sm:$0xe] }
 0x13a   : > { %v680_v18 = vrot.slane %v679_v59, 4  ;;  %v1447_v25 = vrot.slane %v3008_v57, 5  ;;  %v2321_v26 = vrot.slane %v1410_v63, 9  ;;  %v925_v27 = vrot.slane %v2823_v21, 5  ;;  %v2342_v17 = vld [vmem:[%s3297_s4 + $0x1c] sm:$0xf] }
 0x13b   : > { %2466 = vmatprep.mubr.msk.bf16.mxu1 %vm714_vm10, %v2267_v4  ;;  %v693_v20 = vor.u32 %v692_v6, %v689_v2  ;;  %v698_v1 = vrot.slane %v696_v50, 5  ;;  %v1607_v29 = vsel %vm727_vm6, %v2333_v54, 0  ;;  %v1451_v30 = vrot.slane %v3019_v9, 5  ;;  %v3038_v54 = vld [vmem:[#allocation2 + $0x44] sm:$0x1] }
 0x13c   : > { %v685_v33 = vsel %vm2894_vm11, %v680_v18, %v684_v13  ;;  %v1440_v36 = vsel %vm2975_vm14, %v2318_v3, %v1439_v42  ;;  %v1444_v21 = vsel %vm2975_vm14, %v2319_v7, %v1443_v43  ;;  %v1448_v12 = vsel %vm2975_vm14, %v2320_v14, %v1447_v25  ;;  %v897_v50 = vld [vmem:[#allocation2 + $0x8] sm:$0xe]  ;;  %v2298_v3 = vld [vmem:[%s3297_s4 + $0xc] sm:$0xf]  ;;  %v898_v7 = vld [vmem:[#allocation2 + $0x10] sm:$0xe] }
 0x13d   : > { %v694_v35 = vrot.slane %v693_v20, 4  ;;  %v1452_v42 = vsel %vm2975_vm14, %v2321_v26, %v1451_v30  ;;  %v1797_v43 = vshrl.u32 %v1696_v32, 16  ;;  %v2273_v48 = vcombine.low %v2803_v58, %v2884_v22  ;;  %v1682_v58 = vld [vmem:[#allocation2 + $0x10] sm:$0xf]  ;;  %v1684_v22 = vld [vmem:[#allocation2 + $0x18] sm:$0xf] }
 0x13e   : > { %v2326_v23 = vcombine.low %v1440_v36, %v1444_v21  ;;  %v1800_v55 = vshll.u32 %v1696_v32, 16  ;;  %v2322_v8 = vrot.slane %v1411_v38, 9  ;;  %v1455_v60 = vrot.slane %v3036_v37, 5  ;;  %v900_v36 = vld [vmem:[#allocation2 + $0x20] sm:$0xe] }
 0x13f   : > { %v699_v41 = vsel %vm2894_vm11, %v694_v35, %v698_v1  ;;  %v2323_v40 = vrot.slane %v1412_v11, 9  ;;  %v1459_v19 = vrot.slane %v3038_v54, 5  ;;  %v2327_v62 = vcombine.low %v1448_v12, %v1452_v42  ;;  %v899_v35 = vld [vmem:[#allocation2 + $0x18] sm:$0xe]  ;;  %v901_v11 = vld [vmem:[#allocation2 + $0x28] sm:$0xe] }
 0x140   : > { %v2268_v47 = vcombine.low %v685_v33, %v699_v41  ;;  %v982_v63 = vsel %vm727_vm6, %v2963_v56, 0  ;;  %v2281_v0 = vrot.slane %v896_v45, 9  ;;  %v3058_v2 = vsel %vm727_vm6, %v2342_v17, 0  ;;  %v2639_v33 = vld [vmem:[#allocation2 + $0x10] ss:$8 sps:$4 sm:$0xff]  }
 0x141   : > { %v1456_v56 = vsel %vm2975_vm14, %v2322_v8, %v1455_v60  ;;  %v1460_v4 = vsel %vm2975_vm14, %v2323_v40, %v1459_v19  ;;  %v3070_v59 = vrot.slane %v1797_v43, 4  ;;  %v3072_v6 = vrot.slane %v1800_v55, 5  ;;  %v1686_v41 = vld [vmem:[#allocation2 + $0x20] sm:$0xf]  ;;  %v1688_v45 = vld [vmem:[#allocation2 + $0x28] sm:$0xf] }
 0x142   : > { %2467 = vmatmul.mubr.msk.bf16.gmra.mrb[4].mxu1 %vm714_vm10, %v2268_v47  ;;  %2513 = vmatmul.mubr.msk.bf16.vlgmr.msra.gmra.mrb[0].mxu0 %vm714_vm10, %v2326_v23  ;;  %v1699_v13 = vshrl.u32 %v1682_v58, 16  ;;  %v1702_v14 = vshll.u32 %v1682_v58, 16  ;;  %v1713_v18 = vshrl.u32 %v1684_v22, 16  ;;  %v1716_v20 = vshll.u32 %v1684_v22, 16  ;;  %v1690_v43 = vld [vmem:[#allocation2 + $0x30] sm:$0xf] }
 0x143   : > { %2472 = vmatprep.mubr.msk.bf16.mxu1 %vm714_vm10, %v2273_v48  ;;  %2521 = vmatpush3.bf16.msra.mxu0 %v1607_v29  ;;  %v929_v25 = vrot.slane %v2900_v10, 5  ;;  %v933_v26 = vrot.slane %v2910_v46, 5  ;;  %v2282_v1 = vrot.slane %v897_v50, 9  ;;  %v3077_v29 = vsel %vm727_vm6, %v2298_v3, 0  ;;  %v1692_v19 = vld [vmem:[#allocation2 + $0x38] sm:$0xf] }
 0x144   : > { %2516 = vmatprep.mubr.msk.bf16.mxu0 %vm714_vm10, %v2327_v62  ;;  %2624 = vmatprep.subr.msk.bf16.mxu0 %vm727_vm6, %v2342_v17  ;;  %v2274_v30 = vcombine.low %v2888_v28, %v2913_v53  ;;  %v2328_v32 = vcombine.low %v1456_v56, %v1460_v4  ;;  %v937_v21 = vrot.slane %v2923_v61, 5  ;;  %v2275_v38 = vcombine.low %v2946_v34, %v2953_v44  ;;  %v3092_v17 = vld [vmem:[#allocation2 + $0x14] sm:$0x1]  ;;  %v2641_v58 = vld [vmem:[#allocation2 + $0x20] ss:$8 sps:$4 sm:$0xff]  }
 0x145   : > { %v926_v10 = vsel %vm2975_vm14, %v2281_v0, %v925_v27  ;;  %v2283_v46 = vrot.slane %v898_v7, 9  ;;  %v1701_v28 = vrot.slane %v1699_v13, 4  ;;  %v1704_v53 = vrot.slane %v1702_v14, 5  ;;  %v3105_v0 = vld [vmem:[#allocation2 + $0x1c] sm:$0x1] }
 0x146   : > { %v1715_v12 = vrot.slane %v1713_v18, 4  ;;  %v1718_v42 = vrot.slane %v1716_v20, 5  ;;  %v930_v61 = vsel %vm2975_vm14, %v2282_v1, %v929_v25  ;;  %v2284_v34 = vrot.slane %v899_v35, 9  ;;  %v2642_v4 = vld [vmem:[#allocation2 + $0x30] ss:$8 sps:$4 sm:$0xff]  }
 0x147   : > { %v2285_v44 = vrot.slane %v900_v36, 9  ;;  %v941_v27 = vrot.slane %v2949_v39, 5  ;;  %v2276_v47 = vcombine.low %v2969_v51, %v2979_v16  ;;  %v1727_v48 = vshrl.u32 %v1686_v41, 16  ;;  %v3119_v13 = vld [vmem:[#allocation2 + $0x30] sm:$0xe] }
 0x148   : > { %v1730_v23 = vshll.u32 %v1686_v41, 16  ;;  %v1803_v55 = vor.u32 %v3072_v6, %v3070_v59  ;;  %v2286_v8 = vrot.slane %v901_v11, 9  ;;  %v945_v60 = vrot.slane %v2957_v52, 5  ;;  %v3116_v52 = vld [vmem:[%s3297_s4 + $0x20] sm:$0xf] }
 0x149   : > { %v1741_v40 = vshrl.u32 %v1688_v45, 16  ;;  %v1744_v39 = vshll.u32 %v1688_v45, 16  ;;  %v2290_v62 = vcombine.low %v926_v10, %v930_v61  ;;  %v1705_v51 = vor.u32 %v1704_v53, %v1701_v28  ;;  %v3129_v10 = vld [vmem:[#allocation2 + $0x24] sm:$0x1] }
 0x14a   : > { %2473 = vmatmul.mubr.msk.bf16.vlgmr.msra.gmra.mrb[0].mxu1 %vm714_vm10, %v2274_v30  ;;  %2517 = vmatmul.mubr.msk.bf16.gmra.mrb[4].mxu0 %vm714_vm10, %v2328_v32  ;;  %v1719_v16 = vor.u32 %v1718_v42, %v1715_v12  ;;  %v938_v22 = vsel %vm2975_vm14, %v2284_v34, %v937_v21  ;;  %v3111_v50 = vsel %vm2975_vm14, %v2285_v44, %v941_v27  ;;  %v1758_v56 = vshll.u32 %v1690_v43, 16  ;;  %v3136_v12 = vld [vmem:[#allocation2 + $0x2c] sm:$0x1] }
 0x14b   : > { %2481 = vmatpush3.bf16.msra.mxu1 %v982_v63  ;;  %2476 = vmatprep.mubr.msk.bf16.mxu1 %vm714_vm10, %v2275_v38  ;;  %v3103_v63 = vsel %vm2975_vm14, %v2283_v46, %v933_v26  ;;  %v1708_v7 = vshll.u32 %v3092_v17, 16  ;;  %v1729_v14 = vrot.slane %v1727_v48, 4  ;;  %v1732_v18 = vrot.slane %v1730_v23, 5  ;;  %v3122_v26 = vld [vmem:[#allocation2 + $0x38] sm:$0xe] }
 0x14c   : > { %2522 = vmatprep.mubr.msk.bf16.mxu0 %vm714_vm10, %v2639_v33  ;;  %2619 = vmatprep.subr.msk.bf16.mxu1 %vm727_vm6, %v2298_v3  ;;  %v1755_v3 = vshrl.u32 %v1690_v43, 16  ;;  %v1769_v20 = vshrl.u32 %v1692_v19, 16  ;;  %v1722_v25 = vshll.u32 %v3105_v0, 16  ;;  %v1743_v1 = vrot.slane %v1741_v40, 4  ;;  %v1694_v33 = vld [vmem:[#allocation2 + $0x40] sm:$0xf] }
 0x14d   : > { %v1746_v30 = vrot.slane %v1744_v39, 5  ;;  %v1772_v32 = vshll.u32 %v1692_v19, 16  ;;  %v2291_v35 = vcombine.low %v3103_v63, %v938_v22  ;;  %v946_v36 = vsel %vm2975_vm14, %v2286_v8, %v945_v60  ;;  %v3140_v43 = vld [vmem:[#allocation2 + $0x34] sm:$0x1]  ;;  %v3147_v60 = vld [vmem:[#allocation2 + $0x3c] sm:$0x1] }
 0x14e   : > { %v1706_v21 = vrot.slane %v1705_v51, 4  ;;  %v1720_v38 = vrot.slane %v1719_v16, 4  ;;  %v1757_v46 = vrot.slane %v1755_v3, 4  ;;  %v1760_v11 = vrot.slane %v1758_v56, 5  ;;  %v2643_v63 = vld [vmem:[#allocation2 + $0x40] ss:$8 sps:$4 sm:$0xff]  }
 0x14f   : > { %v1771_v41 = vrot.slane %v1769_v20, 4  ;;  %v1774_v28 = vrot.slane %v1772_v32, 5  ;;  %v1710_v53 = vrot.slane %v1708_v7, 5  ;;  %v1733_v42 = vor.u32 %v1732_v18, %v1729_v14  ;;  %v3160_v14 = vld [vmem:[#allocation2 + $0x44] sm:$0x1] }
 0x150   : > { %v1783_v45 = vshrl.u32 %v1694_v33, 16  ;;  %v1786_v61 = vshll.u32 %v1694_v33, 16  ;;  %v1724_v34 = vrot.slane %v1722_v25, 5  ;;  %v2287_v44 = vrot.slane %v3119_v13, 9  ;;  %v1183_v20 = vld [vmem:[#allocation2 + $0x28] sm:$0xf] }
 0x151   : > { %v1747_v27 = vor.u32 %v1746_v30, %v1743_v1  ;;  %v2288_v48 = vrot.slane %v3122_v26, 9  ;;  %v953_v23 = vrot.slane %v2988_v31, 5  ;;  %v1736_v8 = vshll.u32 %v3129_v10, 16  ;;  %v1185_v30 = vld [vmem:[#allocation2 + $0x30] sm:$0xf] }
 0x152   : > { %2477 = vmatmul.mubr.msk.bf16.gmra.mrb[4].mxu1 %vm714_vm10, %v2276_v47  ;;  %2523 = vmatmul.mubr.msk.bf16.vlgmr.msra.gmra.mrb[0].mxu0 %vm714_vm10, %v2641_v58  ;;  %v1711_v47 = vsel %vm2894_vm11, %v1706_v21, %v1710_v53  ;;  %v1725_v40 = vsel %vm2894_vm11, %v1720_v38, %v1724_v34  ;;  %v1750_v39 = vshll.u32 %v3136_v12, 16  ;;  %v1775_v19 = vor.u32 %v1774_v28, %v1771_v41  ;;  %v1912_v21 = vld [vmem:[#allocation2 + $0x10] sm:$0xe] }
 0x153   : > { %2482 = vmatprep.mubr.msk.bf16.mxu1 %vm714_vm10, %v2290_v62  ;;  %2531 = vmatpush3.bf16.msra.mxu0 %v3058_v2  ;;  %v949_v2 = vrot.slane %v2984_v5, 5  ;;  %v1761_v5 = vor.u32 %v1760_v11, %v1757_v46  ;;  %v3152_v62 = vld [vmem:[#allocation2 + $0x4c] sm:$0x1]  ;;  %v1734_v51 = vrot.slane %v1733_v42, 4  ;;  %v1764_v16 = vshll.u32 %v3140_v43, 16 }
 0x154   : > { %2526 = vmatprep.mubr.msk.bf16.mxu0 %vm714_vm10, %v2642_v4  ;;  %2625 = vmatprep.subr.msk.bf16.mxu0 %vm727_vm6, %v3116_v52  ;;  %v1785_v58 = vrot.slane %v1783_v45, 4  ;;  %v1788_v22 = vrot.slane %v1786_v61, 5  ;;  %v2292_v31 = vcombine.low %v3111_v50, %v946_v36  ;;  %v1748_v3 = vrot.slane %v1747_v27, 4  ;;  %v1913_v11 = vld [vmem:[#allocation2 + $0x18] sm:$0xe] }
 0x155   : > { %v1778_v56 = vshll.u32 %v3147_v60, 16  ;;  %v1806_v4 = vshll.u32 %v3152_v62, 16  ;;  %v2343_v7 = vcombine.low %v1711_v47, %v1725_v40  ;;  %v1738_v13 = vrot.slane %v1736_v8, 5 }
 0x156   : > { %v3165_v18 = vrot.slane %v1803_v55, 4  ;;  %v950_v50 = vsel %vm2975_vm14, %v2287_v44, %v949_v2  ;;  %v1752_v25 = vrot.slane %v1750_v39, 5  ;;  %v1762_v26 = vrot.slane %v1761_v5, 4 }
 0x157   : > { %v1776_v1 = vrot.slane %v1775_v19, 4  ;;  %v954_v32 = vsel %vm2975_vm14, %v2288_v48, %v953_v23  ;;  %v1739_v59 = vsel %vm2894_vm11, %v1734_v51, %v1738_v13  ;;  %v1766_v6 = vrot.slane %v1764_v16, 5  ;;  %v2644_v48 = vld [vmem:[#allocation2 + $0x8] ss:$8 sps:$4 sm:$0xff]   ;;  %v1914_v51 = vld [vmem:[#allocation2 + $0x20] sm:$0xe] }
 0x158   : > { %v1789_v55 = vor.u32 %v1788_v22, %v1785_v58  ;;  %v1753_v33 = vsel %vm2894_vm11, %v1748_v3, %v1752_v25  ;;  %v1792_v36 = vshll.u32 %v3160_v14, 16  ;;  %v1248_v38 = vshrl.u32 %v1183_v20, 16  ;;  %v1915_v16 = vld [vmem:[#allocation2 + $0x28] sm:$0xe]  ;;  %v1916_v3 = vld [vmem:[#allocation2 + $0x30] sm:$0xe] }
 0x159   : > { %v1808_v46 = vrot.slane %v1806_v4, 5  ;;  %v1251_v41 = vshll.u32 %v1183_v20, 16  ;;  %v1262_v28 = vshrl.u32 %v1185_v30, 16  ;;  %v1265_v53 = vshll.u32 %v1185_v30, 16  ;;  %v1189_v25 = vld [vmem:[#allocation2 + $0x40] sm:$0xf] }
 0x15a   : > { %2483 = vmatmul.mubr.msk.bf16.vlgmr.msra.gmra.mrb[0].mxu1 %vm714_vm10, %v2291_v35  ;;  %2527 = vmatmul.mubr.msk.bf16.gmra.mrb[4].mxu0 %vm714_vm10, %v2643_v63  ;;  %v1780_v35 = vrot.slane %v1778_v56, 5  ;;  %v2293_v42 = vcombine.low %v950_v50, %v954_v32  ;;  %v1995_v45 = vsel %vm727_vm6, %v3116_v52, 0  ;;  %v1767_v61 = vsel %vm2894_vm11, %v1762_v26, %v1766_v6  ;;  %v1917_v56 = vld [vmem:[#allocation2 + $0x38] sm:$0xe] }
 0x15b   : > { %2491 = vmatpush3.bf16.msra.mxu1 %v3077_v29  ;;  %2486 = vmatprep.mubr.msk.bf16.mxu1 %vm714_vm10, %v2292_v31  ;;  %v2650_v29 = vld [vmem:[%s3297_s4 + $0x10] sm:$0xf]  ;;  %v2344_v44 = vcombine.low %v1739_v59, %v1753_v33  ;;  %v1790_v2 = vrot.slane %v1789_v55, 4  ;;  %v2351_v27 = vrot.slane %v1912_v21, 9  ;;  %v1938_v47 = vrot.slane %v3092_v17, 5 }
 0x15c   : > { %2532 = vmatprep.mubr.msk.bf16.mxu0 %vm714_vm10, %v2343_v7  ;;  %2621 = vmatprep.subr.msk.bf16.mxu1 %vm727_vm6, %v2650_v29  ;;  %v1781_v34 = vsel %vm2894_vm11, %v1776_v1, %v1780_v35  ;;  %v1794_v23 = vrot.slane %v1792_v36, 5  ;;  %v2352_v8 = vrot.slane %v1913_v11, 9  ;;  %v1942_v40 = vrot.slane %v3105_v0, 5  ;;  %v1187_v50 = vld [vmem:[#allocation2 + $0x38] sm:$0xf] }
 0x15d   : > { %v1250_v39 = vrot.slane %v1248_v38, 4  ;;  %v2345_v52 = vcombine.low %v1767_v61, %v1781_v34  ;;  %v1253_v5 = vrot.slane %v1251_v41, 5  ;;  %v1264_v19 = vrot.slane %v1262_v28, 4  ;;  %v2645_v32 = vld [vmem:[#allocation2 + $0x18] ss:$8 sps:$4 sm:$0xff]  }
 0x15e   : > { %v1267_v63 = vrot.slane %v1265_v53, 5  ;;  %v1795_v17 = vsel %vm2894_vm11, %v1790_v2, %v1794_v23  ;;  %v1809_v0 = vsel %vm2894_vm11, %v3165_v18, %v1808_v46  ;;  %v1939_v58 = vsel %vm2975_vm14, %v2351_v27, %v1938_v47  ;;  %v2646_v55 = vld [vmem:[#allocation2 + $0x28] ss:$8 sps:$4 sm:$0xff]   ;;  %v1918_v61 = vld [vmem:[#allocation2 + $0x40] sm:$0xe] }
 0x15f   : > { %v1943_v22 = vsel %vm2975_vm14, %v2352_v8, %v1942_v40  ;;  %v1257_v31 = vshll.u32 %v3008_v57, 16  ;;  %v1254_v4 = vor.u32 %v1253_v5, %v1250_v39  ;;  %v1271_v13 = vshll.u32 %v3019_v9, 16  ;;  %v1919_v28 = vld [vmem:[#allocation2 + $0x48] sm:$0xe]  ;;  %v2647_v27 = vld [vmem:[#allocation2 + $0x38] ss:$8 sps:$4 sm:$0xff]  }
 0x160   : > { %v1268_v7 = vor.u32 %v1267_v63, %v1264_v19  ;;  %v2353_v20 = vrot.slane %v1914_v51, 9  ;;  %v2346_v26 = vcombine.low %v1795_v17, %v1809_v0  ;;  %v1946_v18 = vrot.slane %v3129_v10, 5 }
 0x161   : > { %v2354_v1 = vrot.slane %v1915_v16, 9  ;;  %v1950_v30 = vrot.slane %v3136_v12, 5  ;;  %v2355_v59 = vrot.slane %v1916_v3, 9  ;;  %v1954_v6 = vrot.slane %v3140_v43, 5 }
 0x162   : > { %2487 = vmatmul.mubr.msk.bf16.gmra.mrb[4].mxu1 %vm714_vm10, %v2293_v42  ;;  %2533 = vmatmul.mubr.msk.bf16.vlgmr.msra.gmra.mrb[0].mxu0 %vm714_vm10, %v2344_v44  ;;  %v2356_v57 = vrot.slane %v1917_v56, 9  ;;  %v1958_v29 = vrot.slane %v3147_v60, 5  ;;  %v1276_v33 = vshrl.u32 %v1187_v50, 16  ;;  %v1279_v35 = vshll.u32 %v1187_v50, 16 }
 0x163   : > { %2492 = vmatprep.mubr.msk.bf16.mxu1 %vm714_vm10, %v2644_v48  ;;  %2541 = vmatpush3.bf16.msra.mxu0 %v1995_v45  ;;  %v1290_v9 = vshrl.u32 %v1189_v25, 16  ;;  %v1293_v36 = vshll.u32 %v1189_v25, 16  ;;  %v2360_v10 = vcombine.low %v1939_v58, %v1943_v22  ;;  %v1255_v21 = vrot.slane %v1254_v4, 4 }
 0x164   : > { %2536 = vmatprep.mubr.msk.bf16.mxu0 %vm714_vm10, %v2345_v52  ;;  %v1269_v38 = vrot.slane %v1268_v7, 4  ;;  %v1259_v12 = vrot.slane %v1257_v31, 5  ;;  %v1273_v43 = vrot.slane %v1271_v13, 5  ;;  %v1947_v60 = vsel %vm2975_vm14, %v2353_v20, %v1946_v18 }
 0x165   : > { %v1951_v46 = vsel %vm2975_vm14, %v2354_v1, %v1950_v30  ;;  %v1955_v11 = vsel %vm2975_vm14, %v2355_v59, %v1954_v6  ;;  %v1959_v41 = vsel %vm2975_vm14, %v2356_v57, %v1958_v29  ;;  %v1281_v53 = vrot.slane %v1279_v35, 5 }
 0x166   : > { %v1292_v42 = vrot.slane %v1290_v9, 4  ;;  %v1295_v45 = vrot.slane %v1293_v36, 5  ;;  %v1260_v34 = vsel %vm2894_vm11, %v1255_v21, %v1259_v12  ;;  %v1274_v44 = vsel %vm2894_vm11, %v1269_v38, %v1273_v43 }
 0x167   : > { %v2358_v2 = vrot.slane %v1919_v28, 9  ;;  %v2361_v47 = vcombine.low %v1947_v60, %v1951_v46  ;;  %v2362_v48 = vcombine.low %v1955_v11, %v1959_v41  ;;  %v2357_v23 = vrot.slane %v1918_v61, 9 }
 0x168   : > { %v1966_v8 = vrot.slane %v3152_v62, 5  ;;  %v2310_v40 = vcombine.low %v1260_v34, %v1274_v44  ;;  %v1296_v52 = vor.u32 %v1295_v45, %v1292_v42  ;;  %v1962_v5 = vrot.slane %v3160_v14, 5 }
 0x169   : > { %v1285_v19 = vshll.u32 %v3036_v37, 16  ;;  %v1299_v63 = vshll.u32 %v3038_v54, 16 }
 0x16a   : > { %2493 = vmatmul.mubr.msk.bf16.vlgmr.msra.gmra.mrb[0].mxu1 %vm714_vm10, %v2645_v32  ;;  %2537 = vmatmul.mubr.msk.bf16.gmra.mrb[4].mxu0 %vm714_vm10, %v2346_v26  ;;  %v1297_v17 = vrot.slane %v1296_v52, 4  ;;  %v1963_v62 = vsel %vm2975_vm14, %v2357_v23, %v1962_v5  ;;  %v1967_v14 = vsel %vm2975_vm14, %v2358_v2, %v1966_v8 }
 0x16b   : > { %2551 = vmatpush3.bf16.msra.mxu1 %v2775_v49  ;;  %2496 = vmatprep.mubr.msk.bf16.mxu1 %vm714_vm10, %v2646_v55  ;;  %v1278_v49 = vrot.slane %v1276_v33, 4  ;;  %v1287_v0 = vrot.slane %v1285_v19, 5  ;;  %v1301_v16 = vrot.slane %v1299_v63, 5  ;;  %v2363_v58 = vcombine.low %v1963_v62, %v1967_v14 }
 0x16c   : > { %2542 = vmatprep.mubr.msk.bf16.mxu0 %vm714_vm10, %v2360_v10 }
 0x16d   : > { %v1282_v39 = vor.u32 %v1281_v53, %v1278_v49  ;;  %v1302_v54 = vsel %vm2894_vm11, %v1297_v17, %v1301_v16 }
 0x16f   : > { %v1283_v51 = vrot.slane %v1282_v39, 4 }
 0x171   : > { %v1288_v37 = vsel %vm2894_vm11, %v1283_v51, %v1287_v0 }
 0x172   : > { %2497 = vmatmul.mubr.msk.bf16.gmra.mrb[4].mxu1 %vm714_vm10, %v2647_v27  ;;  %2543 = vmatmul.mubr.msk.bf16.vlgmr.msra.gmra.mrb[0].mxu0 %vm714_vm10, %v2361_v47  ;;  %v2311_v22 = vcombine.low %v1288_v37, %v1302_v54 }
 0x173   : > { %2506 = vmatprep.mubr.msk.bf16.mxu1 %vm714_vm10, %v2310_v40  ;;  %2546 = vmatprep.mubr.msk.bf16.mxu0 %vm714_vm10, %v2362_v48 }
 0x17a   : > { %2547 = vmatmul.mubr.msk.bf16.gmra.mrb[4].mxu0 %vm714_vm10, %v2363_v58 }
 0x17e   : > { %2507 = vmatmul.mubr.msk.bf16.vlgmr.msra.gmra.mrb[4].mxu1 %vm714_vm10, %v2311_v22 }
 0x23d   : > { %v2494_v31 = vpop.f32.mrb[0].mxu1 }
 0x23e   : > { %v1136_v3 = vpop.f32.mrb[1].mxu1 }
 0x23f   : > { %v2495_v56 = vpop.f32.mrb[2].mxu1 }
 0x240   : > { %v1139_v15 = vpop.f32.mrb[3].mxu1 }
 0x245   : > { %v2544_v4 = vpop.f32.mrb[0].mxu0 }
 0x246   : > { %v2552_v7 = vadd.f32 %v2544_v4, %v2494_v31  ;;  %v2031_v13 = vpop.f32.mrb[1].mxu0 }
 0x247   : > { %v2553_v24 = vadd.f32 %v2031_v13, %v1136_v3  ;;  %v2545_v20 = vpop.f32.mrb[2].mxu0 }
 0x248   : > { %v2390_v50 = vpack.c.bf16 %v2552_v7, %v2552_v7  ;;  %v2554_v25 = vadd.f32 %v2545_v20, %v2495_v56  ;;  %v2034_v26 = vpop.f32.mrb[3].mxu0  ;;  %v2094_v32 = vmul.f32 %v2552_v7, %v2552_v7  ;;  %v2073_v35 = vsel %vm714_vm10, %v2552_v7, 0.0 }
 0x249   : > { %v2092_v18 = vmul.f32 %v2553_v24, %v2553_v24  ;;  %v2388_v1 = vpack.c.bf16 %v2553_v24, %v2553_v24  ;;  %v2555_v30 = vadd.f32 %v2034_v26, %v1139_v15  ;;  %v2070_v6 = vsel %vm714_vm10, %v2553_v24, 0.0 }
 0x24a   : > { %2161 = vst.msk [vmem:[%s3250_s13 + $0x8] sm:$0xf] %vm333_vm5, %v2390_v50  ;;  %v2391_v59 = vpack.c.bf16 %v2554_v25, %v2554_v25  ;;  %v2095_v36 = vmul.f32 %v2554_v25, %v2554_v25  ;;  %v2103_v60 = vsel %vm714_vm10, %v2094_v32, 0.0  ;;  %v2075_v46 = vsel %vm714_vm10, %v2554_v25, 0.0 }
 0x24b   : > { %2159 = vst.msk [vmem:[%s3250_s13] sm:$0xf] %vm333_vm5, %v2388_v1  ;;  %v2071_v57 = vsel %vm714_vm10, %v2555_v30, 0.0  ;;  %v2093_v29 = vmul.f32 %v2555_v30, %v2555_v30  ;;  %v2389_v55 = vpack.c.bf16 %v2555_v30, %v2555_v30  ;;  %v2100_v9 = vsel %vm714_vm10, %v2092_v18, 0.0 }
 0x24c   : > { %2162 = vst.msk [vmem:[%s3250_s13 + $0xc] sm:$0xf] %vm333_vm5, %v2391_v59  ;;  %v2072_v33 = vadd.f32 %v2071_v57, %v2070_v6  ;;  %v2105_v53 = vsel %vm714_vm10, %v2095_v36, 0.0 }
 0x24d   : > { %v2101_v10 = vsel %vm714_vm10, %v2093_v29, 0.0  ;;  %2160 = vst.msk [vmem:[%s3250_s13 + $0x4] sm:$0xf] %vm333_vm5, %v2389_v55  ;;  %v2548_v21 = vpop.f32.mrb[4].mxu0 }
 0x24e   : > { %v2074_v38 = vadd.f32 %v2073_v35, %v2072_v33  ;;  %v2102_v12 = vadd.f32 %v2101_v10, %v2100_v9  ;;  %v2047_v43 = vpop.f32.mrb[5].mxu0 }
 0x24f   : > { %v2549_v11 = vpop.f32.mrb[6].mxu0 }
 0x250   : > { %v2104_v41 = vadd.f32 %v2103_v60, %v2102_v12  ;;  %v2076_v28 = vadd.f32 %v2075_v46, %v2074_v38  ;;  %v2050_v49 = vpop.f32.mrb[7].mxu0 }
 0x251   : > { %v2508_v42 = vpop.f32.mrb[4].mxu1 }
 0x252   : > { %v2556_v45 = vadd.f32 %v2548_v21, %v2508_v42  ;;  %v1382_v61 = vpop.f32.mrb[5].mxu1  ;;  %v2106_v34 = vadd.f32 %v2105_v53, %v2104_v41 }
 0x253   : > { %v2557_v44 = vadd.f32 %v2047_v43, %v1382_v61  ;;  %v2509_v2 = vpop.f32.mrb[6].mxu1 }
 0x254   : > { %v2394_v27 = vpack.c.bf16 %v2556_v45, %v2556_v45  ;;  %v2558_v47 = vadd.f32 %v2549_v11, %v2509_v2  ;;  %v1385_v48 = vpop.f32.mrb[7].mxu1  ;;  %v2098_v52 = vmul.f32 %v2556_v45, %v2556_v45  ;;  %v2081_v16 = vsel %vm714_vm10, %v2556_v45, 0.0 }
 0x255   : > { %v2077_v23 = vsel %vm714_vm10, %v2557_v44, 0.0  ;;  %v2096_v8 = vmul.f32 %v2557_v44, %v2557_v44  ;;  %v2392_v40 = vpack.c.bf16 %v2557_v44, %v2557_v44  ;;  %v2559_v39 = vadd.f32 %v2050_v49, %v1385_v48 }
 0x256   : > { %2165 = vst.msk [vmem:[%s3250_s13 + $0x18] sm:$0xf] %vm333_vm5, %v2394_v27  ;;  %v2078_v5 = vadd.f32 %v2077_v23, %v2076_v28  ;;  %v2395_v63 = vpack.c.bf16 %v2558_v47, %v2558_v47  ;;  %v2099_v58 = vmul.f32 %v2558_v47, %v2558_v47  ;;  %v2111_v31 = vsel %vm714_vm10, %v2098_v52, 0.0 }
 0x257   : > { %v2107_v19 = vsel %vm714_vm10, %v2096_v8, 0.0  ;;  %2163 = vst.msk [vmem:[%s3250_s13 + $0x10] sm:$0xf] %vm333_vm5, %v2392_v40  ;;  %v2079_v51 = vsel %vm714_vm10, %v2559_v39, 0.0  ;;  %v2097_v17 = vmul.f32 %v2559_v39, %v2559_v39  ;;  %v2393_v0 = vpack.c.bf16 %v2559_v39, %v2559_v39 }
 0x258   : > { %v2108_v62 = vadd.f32 %v2107_v19, %v2106_v34  ;;  %v2080_v14 = vadd.f32 %v2079_v51, %v2078_v5  ;;  %2166 = vst.msk [vmem:[%s3250_s13 + $0x1c] sm:$0xf] %vm333_vm5, %v2395_v63  ;;  %v2083_v3 = vsel %vm714_vm10, %v2558_v47, 0.0  ;;  %v2113_v4 = vsel %vm714_vm10, %v2099_v58, 0.0 }
 0x259   : > { %v2109_v37 = vsel %vm714_vm10, %v2097_v17, 0.0  ;;  %2164 = vst.msk [vmem:[%s3250_s13 + $0x14] sm:$0xf] %vm333_vm5, %v2393_v0 }
 0x25a   : > { %v2082_v54 = vadd.f32 %v2081_v16, %v2080_v14  ;;  %v2110_v22 = vadd.f32 %v2109_v37, %v2108_v62 }
 0x25c   : > { %v2084_v56 = vadd.f32 %v2083_v3, %v2082_v54  ;;  %v2112_v15 = vadd.f32 %v2111_v31, %v2110_v22 }
 0x25e   : > { %v2085_v7 = vrot.slane %v2084_v56, 4  ;;  %v2114_v13 = vadd.f32 %v2113_v4, %v2112_v15 }
 0x260   : > { %v2086_v24 = vadd.f32 %v2085_v7, %v2084_v56  ;;  %v2115_v20 = vrot.slane %v2114_v13, 4 }
 0x262   : > { %v2087_v50 = vrot.slane %v2086_v24, 2  ;;  %v2116_v25 = vadd.f32 %v2115_v20, %v2114_v13 }
 0x264   : > { %v2117_v26 = vrot.slane %v2116_v25, 2  ;;  %v2088_v18 = vadd.f32 %v2087_v50, %v2086_v24 }
 0x266   : > { %v2118_v1 = vadd.f32 %v2117_v26, %v2116_v25  ;;  %v2089_v30 = vrot.slane %v2088_v18, 1 }
 0x268   : > { %v2119_v32 = vrot.slane %v2118_v1, 1  ;;  %v2090_v59 = vadd.f32 %v2089_v30, %v2088_v18 }
 0x26a   : > { %v2120_v6 = vadd.f32 %v2119_v32, %v2118_v1  ;;  %2091 = vst.msk [vmem:[%s260_s15] sm:$0x1] %vm335_vm0, %v2090_v59 }
 0x26c   : > { %2122 = vrot.lane.b32.xlu1 %v2120_v6, %s2659_s25 }
 0x2de   : > { %v2123_v57 = vpop.permute.xlu1 %2122 }
 0x2df   : > { %2126 = vst.msk [vmem:[%s260_s15] sm:$0x1] %vm2125_vm15, %v2123_v57 }
 0x2e0 PF: > { %s17_s21 = sadd.s32 1, %s2657_s21  }
 0x2e1   : > { %p14_p4 = scmp.ge.s32.totalorder %s17_s21, 4  }
 0x2e3   :  { %16 = sbr.rel (!%p14_p4) target bundleno = 1 (0x1), region = 93 }

// kernel: dblock_forward.3
= control target key start
LH: loop header
LB: loop body
LE: loop exit
PB: predicated region body
PF: predicated region fallthrough
CT: control target
= control target key end

     0   :  { %s2875_s21 = smov 0   ;;  %s3278_s0 = inlined_call_operand.vmem [shape: bf16[8,9,9,4], index: 0, kind: input, shape index: {}]   ;;  %s3279_s1 = inlined_call_operand.vmem [shape: bf16[9,4,8], index: 1, kind: input, shape index: {}]   ;;  %s3280_s2 = inlined_call_operand.vmem [shape: bf16[4,8], index: 2, kind: input, shape index: {}]   ;;  %s3281_s3 = inlined_call_operand.vmem [shape: bf16[2,64,8], index: 3, kind: output, shape index: {0}]   ;;  %s3282_s4 = inlined_call_operand.vmem [shape: f32[2,1,16], index: 4, kind: output, shape index: {1}]   ;;  %s3283_s5 = inlined_call_operand.vmem [shape: bf16[2,64,8], index: 5, kind: output, shape index: {2}]   ;;  %s3284_s6 = inlined_call_operand.vmem [shape: f32[2,1,16], index: 6, kind: output, shape index: {3}]  }
   0x1 LB: > { %s2881_s22 = sadd.s32 4294967295, %s2837_s21   ;;  %p2326_p0 = scmp.ge.s32.totalorder %s2837_s21, 1  ;;  %s2837_s21 = sphi %s2875_s21, %s17_s21  }
   0x2   : > { %p221_p1 = scmp.lt.s32.totalorder %s2837_s21, 3 }
   0x4   : > { %p222_p2 = pnand %p2326_p0, %p221_p1 }
   0x5   : > { %vm340_vm0 = vcmask (!%p222_p2), 1041408   ;;  %v2392_v0 = vld [vmem:[%s3279_s1 + $0x8] sm:$0x3] (!%p222_p2)  ;;  %v2341_v1 = vld [vmem:[%s3279_s1 + $0x2] sm:$0x3] (!%p222_p2)  ;;  %s2327_s27 = sshll.u32 (!%p222_p2), %s2881_s22, 2 }
   0x6   : > { %225 = sbr.rel (%p222_p2) target bundleno = 472 (0x1d8), region = 32  ;;  %2791 = vmatprep.subr.msk.bf16.mxu0 (!%p222_p2), %vm340_vm0, %v2392_v0  ;;  %2787 = vmatprep.subr.msk.bf16.mxu1 (!%p222_p2), %vm340_vm0, %v2341_v1  ;;  %v905_v2 = vsel (!%p222_p2), %vm340_vm0, %v2392_v0, 0  ;;  %v342_v3 = vsel (!%p222_p2), %vm340_vm0, %v2341_v1, 0  ;;  %p264_p3 = scmp.lt.s32.totalorder (!%p222_p2), %s2327_s27, 7  ;;  %v2417_v4 = vld [vmem:[%s3279_s1 + $0xa] sm:$0x3] (!%p222_p2) }
   0x7   : > { %2664 = vmatpush3.bf16.msra.mxu0 (!%p222_p2), %v905_v2  ;;  %2624 = vmatpush3.bf16.msra.mxu1 (!%p222_p2), %v342_v3  ;;  %v295_v5 = vld [vmem:[%s3279_s1] sm:$0x3] (!%p222_p2)  ;;  %v2434_v6 = vld [vmem:[%s3279_s1 + $0xc] sm:$0x3] (!%p222_p2)  ;;  %vm327_vm1 = vcmask (!%p222_p2), 31744   ;;  %v1135_v7 = vsel (!%p222_p2), %vm340_vm0, %v2417_v4, 0 }
   0x8   : > { %2792 = vmatprep.subr.msk.bf16.mxu0 (!%p222_p2), %vm340_vm0, %v2417_v4  ;;  %2788 = vmatprep.subr.msk.bf16.mxu1 (!%p222_p2), %vm340_vm0, %v295_v5  ;;  %v442_v8 = vsel (!%p222_p2), %vm340_vm0, %v295_v5, 0  ;;  %v2915_v9 = vsel (!%p222_p2), %vm340_vm0, %v2434_v6, 0  ;;  %v2358_v14 = vld [vmem:[%s3279_s1 + $0x4] sm:$0x3] (!%p222_p2)  ;;  %vm525_vm2 = vsmask.f32 (!%p222_p2), 3328 }
   0x9   : > { %vm526_vm3 = vsmask.f32 (!%p222_p2), 7440  ;;  %v667_v56 = vsel (!%p222_p2), %vm340_vm0, %v2358_v14, 0  ;;  %v2960_v58 = vld [vmem:[%s3279_s1 + $0xe] sm:$0x3] (!%p222_p2)  ;;  %vm1842_vm5 = vcmask (!%p222_p2), 1046528  }
   0xa   : > { %vm2951_vm4 = vmor (!%p222_p2), %vm525_vm2, %vm526_vm3  ;;  %v2965_v59 = vld [vmem:[%s3279_s1 + $0x6] sm:$0x3] (!%p222_p2)  ;;  %p270_p4 = scmp.lt.s32.totalorder (!%p222_p2), %s2881_s22, 1  ;;  %vm1769_vm6 = vcmask (!%p222_p2), 60416   ;;  %vm1678_vm7 = vcmask (!%p222_p2), 64512   ;;  %vm1700_vm8 = vcmask (!%p222_p2), 57344  }
   0xb   : > { %s2839_s12 = smov (!%p222_p2), 8   ;;  %vm1735_vm9 = vcmask (!%p222_p2), 122944  }
   0xd   : > { %s3288_s27 = smov (!%p264_p3, %s2327_s27), 7  ;;  %s3290_s22 = smov (!%p270_p4, %s2881_s22), 1 }
   0xe   : > { %s2797_s10 = smul.u32 72, %s3288_s27  ;;  %s2555_s26 = sshll.u32 %s3290_s22, 5 }
   0xf   : > { %s3190_s29 = scalar_lea.vmem %s3281_s3, %s2555_s26  ;;  %s3210_s8 = scalar_lea.vmem %s3283_s5, %s2555_s26 }
  0x10   : > { %s2910_s13 = scalar_lea.vmem %s3278_s0, %s2797_s10  ;;  %s277_s11 = scalar_lea.vmem %s3282_s4, %s3290_s22 }
  0x11   : > { %v2807_v10 = vld [vmem:[%s2910_s13 + $0x48] ss:$8 sps:$4 sm:$0xff]   ;;  %v2808_v11 = vld [vmem:[%s2910_s13 + $0xd8] ss:$8 sps:$4 sm:$0xff]   ;;  %v2402_v21 = vld [vmem:[%s2910_s13 + $0x94] sm:$0x1]  ;;  %s285_s15 = scalar_lea.vmem %s3284_s6, %s3290_s22 }
  0x12   : > { %2625 = vmatprep.mubr.msk.bf16.mxu1 %vm327_vm1, %v2807_v10  ;;  %v2809_v12 = vld [vmem:[%s2910_s13 + $0x58] ss:$8 sps:$4 sm:$0xff]   ;;  %2665 = vmatprep.mubr.msk.bf16.mxu0 %vm327_vm1, %v2808_v11  ;;  %v2810_v13 = vld [vmem:[%s2910_s13 + $0xe8] ss:$8 sps:$4 sm:$0xff]   ;;  %v2404_v23 = vld [vmem:[%s2910_s13 + $0x9c] sm:$0x1] }
  0x13   : > { %2626 = vmatmul.mubr.msk.bf16.vlgmr.msra.gmra.mrb[0].mxu1 %vm327_vm1, %v2809_v12  ;;  %v2811_v15 = vld [vmem:[%s2910_s13 + $0x68] ss:$8 sps:$4 sm:$0xff]   ;;  %2666 = vmatmul.mubr.msk.bf16.vlgmr.msra.gmra.mrb[0].mxu0 %vm327_vm1, %v2810_v13  ;;  %v2812_v16 = vld [vmem:[%s2910_s13 + $0xf8] ss:$8 sps:$4 sm:$0xff]   ;;  %v1006_v26 = vshll.u32 %v2402_v21, 16  ;;  %v1020_v29 = vshll.u32 %v2404_v23, 16 }
  0x14   : > { %2634 = vmatpush3.bf16.msra.mxu1 %v442_v8  ;;  %2674 = vmatpush3.bf16.msra.mxu0 %v1135_v7  ;;  %v2813_v17 = vld [vmem:[%s2910_s13 + $0x78] ss:$8 sps:$4 sm:$0xff]   ;;  %v2814_v18 = vld [vmem:[%s2910_s13 + $0x108] ss:$8 sps:$4 sm:$0xff]   ;;  %v2406_v37 = vld [vmem:[%s2910_s13 + $0xa4] sm:$0x1] }
  0x15   : > { %2629 = vmatprep.mubr.msk.bf16.mxu1 %vm327_vm1, %v2811_v15  ;;  %2669 = vmatprep.mubr.msk.bf16.mxu0 %vm327_vm1, %v2812_v16  ;;  %v2815_v19 = vld [vmem:[%s2910_s13] ss:$8 sps:$4 sm:$0xff]   ;;  %v2401_v20 = vld [vmem:[%s2910_s13 + $0x90] sm:$0xf]  ;;  %v2403_v22 = vld [vmem:[%s2910_s13 + $0x98] sm:$0xf] }
  0x16   : > { %2793 = vmatprep.subr.msk.bf16.mxu0 %vm340_vm0, %v2434_v6  ;;  %2789 = vmatprep.subr.msk.bf16.mxu1 %vm340_vm0, %v2358_v14  ;;  %v997_v24 = vshrl.u32 %v2401_v20, 16  ;;  %v1000_v25 = vshll.u32 %v2401_v20, 16  ;;  %v1011_v27 = vshrl.u32 %v2403_v22, 16  ;;  %v1014_v28 = vshll.u32 %v2403_v22, 16  ;;  %v2405_v36 = vld [vmem:[%s2910_s13 + $0xa0] sm:$0xf] }
  0x17   : > { %v1008_v32 = vrot.slane %v1006_v26, 5  ;;  %v1022_v35 = vrot.slane %v1020_v29, 5  ;;  %v2816_v39 = vld [vmem:[%s2910_s13 + $0x10] ss:$8 sps:$4 sm:$0xff]   ;;  %v2407_v40 = vld [vmem:[%s2910_s13 + $0xa8] sm:$0xf] }
  0x18   : > { %v999_v30 = vrot.slane %v997_v24, 4  ;;  %v1002_v31 = vrot.slane %v1000_v25, 5  ;;  %v1013_v33 = vrot.slane %v1011_v27, 4  ;;  %v1016_v34 = vrot.slane %v1014_v28, 5  ;;  %v2408_v41 = vld [vmem:[%s2910_s13 + $0xac] sm:$0x1] }
  0x19   : > { %v1025_v42 = vshrl.u32 %v2405_v36, 16  ;;  %v1028_v43 = vshll.u32 %v2405_v36, 16  ;;  %v1034_v46 = vshll.u32 %v2406_v37, 16  ;;  %v1039_v47 = vshrl.u32 %v2407_v40, 16  ;;  %v2817_v57 = vld [vmem:[%s2910_s13 + $0x20] ss:$8 sps:$4 sm:$0xff]  }
  0x1a   : > { %v1003_v38 = vor.u32 %v1002_v31, %v999_v30  ;;  %v1017_v45 = vor.u32 %v1016_v34, %v1013_v33  ;;  %v1042_v48 = vshll.u32 %v2407_v40, 16  ;;  %v1048_v52 = vshll.u32 %v2408_v41, 16  ;;  %v2409_v0 = vld [vmem:[%s2910_s13 + $0xb0] sm:$0xf]  ;;  %v2410_v1 = vld [vmem:[%s2910_s13 + $0xb4] sm:$0x1] }
  0x1b   : > { %2630 = vmatmul.mubr.msk.bf16.gmra.mrb[4].mxu1 %vm327_vm1, %v2813_v17  ;;  %2670 = vmatmul.mubr.msk.bf16.gmra.mrb[4].mxu0 %vm327_vm1, %v2814_v18  ;;  %v1027_v50 = vrot.slane %v1025_v42, 4  ;;  %v1030_v51 = vrot.slane %v1028_v43, 5  ;;  %v1041_v54 = vrot.slane %v1039_v47, 4  ;;  %v1036_v62 = vrot.slane %v1034_v46, 5  ;;  %v2411_v4 = vld [vmem:[%s2910_s13 + $0xb8] sm:$0xf] }
  0x1c   : > { %2635 = vmatprep.mubr.msk.bf16.mxu1 %vm327_vm1, %v2815_v19  ;;  %v1004_v49 = vrot.slane %v1003_v38, 4  ;;  %v1018_v53 = vrot.slane %v1017_v45, 4  ;;  %v1044_v55 = vrot.slane %v1042_v48, 5  ;;  %v1050_v63 = vrot.slane %v1048_v52, 5  ;;  %v2412_v5 = vld [vmem:[%s2910_s13 + $0xbc] sm:$0x1] }
  0x1d   : > { %v1031_v61 = vor.u32 %v1030_v51, %v1027_v50  ;;  %v1053_v6 = vshrl.u32 %v2409_v0, 16  ;;  %v1056_v7 = vshll.u32 %v2409_v0, 16  ;;  %v1062_v11 = vshll.u32 %v2410_v1, 16  ;;  %v2818_v20 = vld [vmem:[%s2910_s13 + $0x30] ss:$8 sps:$4 sm:$0xff]  }
  0x1e   : > { %v1009_v60 = vsel %vm2951_vm4, %v1004_v49, %v1008_v32  ;;  %v1023_v2 = vsel %vm2951_vm4, %v1018_v53, %v1022_v35  ;;  %v1045_v3 = vor.u32 %v1044_v55, %v1041_v54  ;;  %v1067_v12 = vshrl.u32 %v2411_v4, 16  ;;  %v2413_v26 = vld [vmem:[%s2910_s13 + $0xc0] sm:$0xf]  ;;  %v2414_v27 = vld [vmem:[%s2910_s13 + $0xc4] sm:$0x1] }
  0x1f   : > { %v2418_v8 = vcombine.low %v1009_v60, %v1023_v2  ;;  %v1032_v10 = vrot.slane %v1031_v61, 4  ;;  %v1055_v14 = vrot.slane %v1053_v6, 4  ;;  %v1058_v15 = vrot.slane %v1056_v7, 5  ;;  %v2415_v30 = vld [vmem:[%s2910_s13 + $0xc8] sm:$0xf] }
  0x20   : > { %v1046_v13 = vrot.slane %v1045_v3, 4  ;;  %v1070_v16 = vshll.u32 %v2411_v4, 16  ;;  %v1069_v18 = vrot.slane %v1067_v12, 4  ;;  %v1076_v19 = vshll.u32 %v2412_v5, 16  ;;  %v2416_v31 = vld [vmem:[%s2910_s13 + $0xcc] sm:$0x1] }
  0x21   : > { %2675 = vmatprep.mubr.msk.bf16.mxu0 %vm327_vm1, %v2418_v8  ;;  %v1037_v17 = vsel %vm2951_vm4, %v1032_v10, %v1036_v62  ;;  %v2983_v21 = vsel %vm340_vm0, %v2960_v58, 0  ;;  %v1059_v23 = vor.u32 %v1058_v15, %v1055_v14  ;;  %v1064_v24 = vrot.slane %v1062_v11, 5  ;;  %v509_v37 = vld [vmem:[%s2910_s13] sm:$0xf]  ;;  %v510_v42 = vld [vmem:[%s2910_s13 + $0x4] sm:$0x1] }
  0x22   : > { %v1051_v22 = vsel %vm2951_vm4, %v1046_v13, %v1050_v63  ;;  %v1072_v25 = vrot.slane %v1070_v16, 5  ;;  %v1078_v29 = vrot.slane %v1076_v19, 5  ;;  %v1081_v32 = vshrl.u32 %v2413_v26, 16  ;;  %v511_v48 = vld [vmem:[%s2910_s13 + $0x8] sm:$0xf] }
  0x23   : > { %2636 = vmatmul.mubr.msk.bf16.vlgmr.msra.gmra.mrb[0].mxu1 %vm327_vm1, %v2816_v39  ;;  %v2419_v28 = vcombine.low %v1037_v17, %v1051_v22  ;;  %v1060_v33 = vrot.slane %v1059_v23, 4  ;;  %v1084_v35 = vshll.u32 %v2413_v26, 16  ;;  %v1090_v36 = vshll.u32 %v2414_v27, 16  ;;  %v512_v52 = vld [vmem:[%s2910_s13 + $0xc] sm:$0x1] }
  0x24   : > { %2644 = vmatpush3.bf16.msra.mxu1 %v667_v56  ;;  %2639 = vmatprep.mubr.msk.bf16.mxu1 %vm327_vm1, %v2817_v57  ;;  %v1073_v34 = vor.u32 %v1072_v25, %v1069_v18  ;;  %v1083_v38 = vrot.slane %v1081_v32, 4  ;;  %v1095_v39 = vshrl.u32 %v2415_v30, 16  ;;  %v1098_v40 = vshll.u32 %v2415_v30, 16  ;;  %v513_v63 = vld [vmem:[%s2910_s13 + $0x10] sm:$0xf] }
  0x25   : > { %2790 = vmatprep.subr.msk.bf16.mxu1 %vm340_vm0, %v2965_v59  ;;  %2676 = vmatmul.mubr.msk.bf16.vlgmr.msra.gmra.mrb[0].mxu0 %vm327_vm1, %v2419_v28  ;;  %v1104_v41 = vshll.u32 %v2416_v31, 16  ;;  %v1065_v43 = vsel %vm2951_vm4, %v1060_v33, %v1064_v24  ;;  %v1086_v46 = vrot.slane %v1084_v35, 5  ;;  %v1092_v47 = vrot.slane %v1090_v36, 5  ;;  %v514_v4 = vld [vmem:[%s2910_s13 + $0x14] sm:$0x1] }
  0x26   : > { %2684 = vmatpush3.bf16.msra.mxu0 %v2915_v9  ;;  %v1074_v45 = vrot.slane %v1073_v34, 4  ;;  %v1097_v49 = vrot.slane %v1095_v39, 4  ;;  %v1100_v50 = vrot.slane %v1098_v40, 5  ;;  %v529_v53 = vshrl.u32 %v509_v37, 16  ;;  %v2819_v7 = vld [vmem:[%s2910_s13 + $0x8] ss:$8 sps:$4 sm:$0xff]  }
  0x27   : > { %v1106_v51 = vrot.slane %v1104_v41, 5  ;;  %2794 = vmatprep.subr.msk.bf16.mxu0 %vm340_vm0, %v2960_v58  ;;  %v1087_v54 = vor.u32 %v1086_v46, %v1083_v38  ;;  %v532_v55 = vshll.u32 %v509_v37, 16  ;;  %v538_v56 = vshll.u32 %v510_v42, 16  ;;  %v515_v8 = vld [vmem:[%s2910_s13 + $0x18] sm:$0xf] }
  0x28   : > { %v1079_v9 = vsel %vm2951_vm4, %v1074_v45, %v1078_v29  ;;  %v1101_v60 = vor.u32 %v1100_v50, %v1097_v49  ;;  %v531_v61 = vrot.slane %v529_v53, 4  ;;  %v543_v62 = vshrl.u32 %v511_v48, 16  ;;  %v516_v14 = vld [vmem:[%s2910_s13 + $0x1c] sm:$0x1]  ;;  %v517_v25 = vld [vmem:[%s2910_s13 + $0x20] sm:$0xf] }
  0x29   : > { %v2420_v57 = vcombine.low %v1065_v43, %v1079_v9  ;;  %v1088_v0 = vrot.slane %v1087_v54, 4  ;;  %v534_v1 = vrot.slane %v532_v55, 5  ;;  %v540_v2 = vrot.slane %v538_v56, 5  ;;  %v518_v30 = vld [vmem:[%s2910_s13 + $0x24] sm:$0x1] }
  0x2a   : > { %v546_v3 = vshll.u32 %v511_v48, 16  ;;  %v1102_v58 = vrot.slane %v1101_v60, 4  ;;  %v545_v5 = vrot.slane %v543_v62, 4  ;;  %v552_v6 = vshll.u32 %v512_v52, 16  ;;  %v519_v34 = vld [vmem:[%s2910_s13 + $0x28] sm:$0xf] }
  0x2b   : > { %2640 = vmatmul.mubr.msk.bf16.gmra.mrb[4].mxu1 %vm327_vm1, %v2818_v20  ;;  %2679 = vmatprep.mubr.msk.bf16.mxu0 %vm327_vm1, %v2420_v57  ;;  %v557_v10 = vshrl.u32 %v513_v63, 16  ;;  %v1093_v11 = vsel %vm2951_vm4, %v1088_v0, %v1092_v47  ;;  %v535_v12 = vor.u32 %v534_v1, %v531_v61  ;;  %v560_v15 = vshll.u32 %v513_v63, 16  ;;  %v520_v35 = vld [vmem:[%s2910_s13 + $0x2c] sm:$0x1]  ;;  %v2820_v43 = vld [vmem:[%s2910_s13 + $0x18] ss:$8 sps:$4 sm:$0xff]  }
  0x2c   : > { %v548_v13 = vrot.slane %v546_v3, 5  ;;  %v1107_v16 = vsel %vm2951_vm4, %v1102_v58, %v1106_v51  ;;  %v554_v17 = vrot.slane %v552_v6, 5  ;;  %v566_v19 = vshll.u32 %v514_v4, 16  ;;  %v2821_v51 = vld [vmem:[%s2910_s13 + $0x28] ss:$8 sps:$4 sm:$0xff]  }
  0x2d   : > { %v559_v18 = vrot.slane %v557_v10, 4  ;;  %v2421_v20 = vcombine.low %v1093_v11, %v1107_v16  ;;  %v536_v22 = vrot.slane %v535_v12, 4  ;;  %v562_v24 = vrot.slane %v560_v15, 5  ;;  %v521_v52 = vld [vmem:[%s2910_s13 + $0x30] sm:$0xf] }
  0x2e   : > { %v549_v23 = vor.u32 %v548_v13, %v545_v5  ;;  %v568_v26 = vrot.slane %v566_v19, 5  ;;  %v571_v27 = vshrl.u32 %v515_v8, 16  ;;  %v574_v28 = vshll.u32 %v515_v8, 16  ;;  %v522_v56 = vld [vmem:[%s2910_s13 + $0x34] sm:$0x1] }
  0x2f   : > { %v580_v29 = vshll.u32 %v516_v14, 16  ;;  %2680 = vmatmul.mubr.msk.bf16.gmra.mrb[4].mxu0 %vm327_vm1, %v2421_v20  ;;  %v541_v31 = vsel %vm2951_vm4, %v536_v22, %v540_v2  ;;  %v563_v33 = vor.u32 %v562_v24, %v559_v18  ;;  %v585_v36 = vshrl.u32 %v517_v25, 16  ;;  %v523_v63 = vld [vmem:[%s2910_s13 + $0x38] sm:$0xf]  ;;  %v524_v0 = vld [vmem:[%s2910_s13 + $0x3c] sm:$0x1] }
  0x30   : > { %v550_v32 = vrot.slane %v549_v23, 4  ;;  %2685 = vmatprep.mubr.msk.bf16.mxu0 %vm327_vm1, %v2819_v7  ;;  %v573_v37 = vrot.slane %v571_v27, 4  ;;  %v576_v38 = vrot.slane %v574_v28, 5  ;;  %v588_v40 = vshll.u32 %v517_v25, 16  ;;  %v2476_v1 = vld [vmem:[%s3279_s1 + $0x10] sm:$0x3] }
  0x31   : > { %v582_v39 = vrot.slane %v580_v29, 5  ;;  %v564_v42 = vrot.slane %v563_v33, 4  ;;  %v587_v45 = vrot.slane %v585_v36, 4  ;;  %v594_v46 = vshll.u32 %v518_v30, 16  ;;  %v2007_v15 = vld [vmem:[%s3280_s2] sm:$0x3] }
  0x32   : > { %v555_v41 = vsel %vm2951_vm4, %v550_v32, %v554_v17  ;;  %v577_v48 = vor.u32 %v576_v38, %v573_v37  ;;  %v590_v49 = vrot.slane %v588_v40, 5  ;;  %v599_v50 = vshrl.u32 %v519_v34, 16  ;;  %v2822_v20 = vld [vmem:[%s2910_s13 + $0x38] ss:$8 sps:$4 sm:$0xff]   ;;  %v2460_v37 = vld [vmem:[%s2910_s13 + $0x8] sm:$0xf] }
  0x33   : > { %v2359_v47 = vcombine.low %v541_v31, %v555_v41  ;;  %v786_v53 = vsel %vm340_vm0, %v2965_v59, 0  ;;  %v596_v9 = vrot.slane %v594_v46, 5  ;;  %v602_v54 = vshll.u32 %v519_v34, 16  ;;  %v2824_v23 = vld [vmem:[%s2910_s13 + $0x50] ss:$8 sps:$4 sm:$0xff]  }
  0x34   : > { %v608_v55 = vshll.u32 %v520_v35, 16  ;;  %v569_v57 = vsel %vm2951_vm4, %v564_v42, %v568_v26  ;;  %v578_v60 = vrot.slane %v577_v48, 4  ;;  %v591_v61 = vor.u32 %v590_v49, %v587_v45  ;;  %v2823_v34 = vld [vmem:[%s2910_s13 + $0x90] ss:$8 sps:$4 sm:$0xff]   ;;  %v2826_v36 = vld [vmem:[%s2910_s13 + $0x60] ss:$8 sps:$4 sm:$0xff]  }
  0x35   : > { %2645 = vmatprep.mubr.msk.bf16.mxu1 %vm327_vm1, %v2359_v47  ;;  %v601_v62 = vrot.slane %v599_v50, 4  ;;  %v604_v2 = vrot.slane %v602_v54, 5  ;;  %v613_v3 = vshrl.u32 %v521_v52, 16  ;;  %v616_v4 = vshll.u32 %v521_v52, 16  ;;  %v2828_v38 = vld [vmem:[%s2910_s13 + $0x70] ss:$8 sps:$4 sm:$0xff]  }
  0x36   : > { %v610_v59 = vrot.slane %v608_v55, 5  ;;  %v583_v58 = vsel %vm2951_vm4, %v578_v60, %v582_v39  ;;  %v592_v5 = vrot.slane %v591_v61, 4  ;;  %v622_v6 = vshll.u32 %v522_v56, 16  ;;  %v2461_v39 = vld [vmem:[%s2910_s13 + $0xc] sm:$0x1] }
  0x37   : > { %v627_v7 = vshrl.u32 %v523_v63, 16  ;;  %v2360_v8 = vcombine.low %v569_v57, %v583_v58  ;;  %2686 = vmatmul.mubr.msk.bf16.vlgmr.msra.gmra.mrb[0].mxu0 %vm327_vm1, %v2820_v43  ;;  %v605_v10 = vor.u32 %v604_v2, %v601_v62  ;;  %v615_v11 = vrot.slane %v613_v3, 4  ;;  %v2462_v40 = vld [vmem:[%s2910_s13 + $0x10] sm:$0xf]  ;;  %v2463_v41 = vld [vmem:[%s2910_s13 + $0x14] sm:$0x1] }
  0x38   : > { %v618_v12 = vrot.slane %v616_v4, 5  ;;  %2694 = vmatpush3.bf16.msra.mxu0 %v2983_v21  ;;  %2689 = vmatprep.mubr.msk.bf16.mxu0 %vm327_vm1, %v2821_v51  ;;  %v630_v14 = vshll.u32 %v523_v63, 16  ;;  %v597_v16 = vsel %vm2951_vm4, %v592_v5, %v596_v9  ;;  %v636_v19 = vshll.u32 %v524_v0, 16  ;;  %v2493_v47 = vld [vmem:[%s2910_s13 + $0xd8] ss:$8 sps:$4 sm:$0xff]  }
  0x39   : > { %v629_v13 = vrot.slane %v627_v7, 4  ;;  %2646 = vmatmul.mubr.msk.bf16.vlgmr.msra.gmra.mrb[0].mxu1 %vm327_vm1, %v2360_v8  ;;  %v606_v17 = vrot.slane %v605_v10, 4  ;;  %2795 = vmatprep.subr.msk.bf16.mxu0 %vm340_vm0, %v2476_v1  ;;  %v624_v21 = vrot.slane %v622_v6, 5  ;;  %v1603_v31 = vsel %vm340_vm0, %v2476_v1, 0  ;;  %v2501_v52 = vld [vmem:[%s2910_s13 + $0x90] ss:$8 sps:$4 sm:$0xff]  }
  0x3a   : > { %v619_v18 = vor.u32 %v618_v12, %v615_v11  ;;  %2654 = vmatpush3.bf16.msra.mxu1 %v786_v53  ;;  %v632_v22 = vrot.slane %v630_v14, 5  ;;  %v638_v28 = vrot.slane %v636_v19, 5  ;;  %v3063_v32 = vsel %vm340_vm0, %v2007_v15, 0  ;;  %v2502_v53 = vld [vmem:[%s2910_s13 + $0x94] sm:$0x1] }
  0x3b   : > { %v611_v24 = vsel %vm2951_vm4, %v606_v17, %v610_v59  ;;  %2796 = vmatprep.subr.msk.bf16.mxu1 %vm340_vm0, %v2007_v15  ;;  %v1465_v42 = vshrl.u32 %v2460_v37, 16  ;;  %v1468_v43 = vshll.u32 %v2460_v37, 16  ;;  %v1474_v45 = vshll.u32 %v2461_v39, 16  ;;  %v2504_v57 = vld [vmem:[%s2910_s13 + $0x9c] sm:$0x1] }
  0x3c   : > { %v620_v25 = vrot.slane %v619_v18, 4  ;;  %v2361_v26 = vcombine.low %v597_v16, %v611_v24  ;;  %v633_v27 = vor.u32 %v632_v22, %v629_v13  ;;  %v1479_v46 = vshrl.u32 %v2462_v40, 16  ;;  %v2517_v0 = vld [vmem:[%s2910_s13 + $0x50] ss:$8 sps:$4 sm:$0xff]   ;;  %v2825_v2 = vld [vmem:[%s2910_s13 + $0xa0] ss:$8 sps:$4 sm:$0xff]  }
  0x3d   : > { %v1482_v48 = vshll.u32 %v2462_v40, 16  ;;  %v1488_v49 = vshll.u32 %v2463_v41, 16  ;;  %v1786_v50 = vunpack.c.l.bf16 %v2493_v47  ;;  %v1787_v51 = vunpack.c.h.bf16 %v2493_v47  ;;  %v2525_v1 = vld [vmem:[%s2910_s13 + $0x8] ss:$8 sps:$4 sm:$0xff]   ;;  %v2526_v5 = vld [vmem:[%s2910_s13 + $0xc] sm:$0x1] }
  0x3e   : > { %2649 = vmatprep.mubr.msk.bf16.mxu1 %vm327_vm1, %v2361_v26  ;;  %v625_v29 = vsel %vm2951_vm4, %v620_v25, %v624_v21  ;;  %v634_v30 = vrot.slane %v633_v27, 4  ;;  %v1467_v9 = vrot.slane %v1465_v42, 4  ;;  %v1470_v54 = vrot.slane %v1468_v43, 5  ;;  %v2827_v6 = vld [vmem:[%s2910_s13 + $0xb0] ss:$8 sps:$4 sm:$0xff]  }
  0x3f   : > { %2690 = vmatmul.mubr.msk.bf16.gmra.mrb[4].mxu0 %vm327_vm1, %v2822_v20  ;;  %v1476_v55 = vrot.slane %v1474_v45, 5  ;;  %v1481_v56 = vrot.slane %v1479_v46, 4  ;;  %v1484_v60 = vrot.slane %v1482_v48, 5  ;;  %v1490_v61 = vrot.slane %v1488_v49, 5  ;;  %v2528_v12 = vld [vmem:[%s2910_s13 + $0x14] sm:$0x1] }
  0x40   : > { %v639_v33 = vsel %vm2951_vm4, %v634_v30, %v638_v28  ;;  %2695 = vmatprep.mubr.msk.bf16.mxu0 %vm327_vm1, %v2824_v23  ;;  %v1810_v62 = vunpack.c.l.bf16 %v2501_v52  ;;  %v1811_v63 = vunpack.c.l.bf16 %v2502_v53  ;;  %v1471_v59 = vor.u32 %v1470_v54, %v1467_v9  ;;  %v2830_v21 = vld [vmem:[%s2910_s13 + $0x80] ss:$8 sps:$4 sm:$0xff]   ;;  %v2464_v26 = vld [vmem:[%s2910_s13 + $0x18] sm:$0xf]  ;;  %v2467_v40 = vld [vmem:[%s2910_s13 + $0x24] sm:$0x1] }
  0x41   : > { %v2362_v35 = vcombine.low %v625_v29, %v639_v33  ;;  %v1812_v3 = vunpack.c.h.bf16 %v2501_v52  ;;  %v1813_v4 = vunpack.c.l.bf16 %v2504_v57  ;;  %v1891_v58 = vunpack.c.l.bf16 %v2517_v0  ;;  %v2466_v33 = vld [vmem:[%s2910_s13 + $0x20] sm:$0xf]  ;;  %v2495_v48 = vld [vmem:[%s2910_s13 + $0xe8] ss:$8 sps:$4 sm:$0xff]   ;;  %v2506_v9 = vld [vmem:[%s2910_s13 + $0xa4] sm:$0x1] }
  0x42   : > { %v1485_v7 = vor.u32 %v1484_v60, %v1481_v56  ;;  %v1843_v8 = vrot.slane %v1810_v62, 1  ;;  %v1844_v10 = vrot.slane %v1811_v63, 1  ;;  %v1892_v11 = vunpack.c.h.bf16 %v2517_v0  ;;  %v2505_v49 = vld [vmem:[%s2910_s13 + $0xa0] ss:$8 sps:$4 sm:$0xff]   ;;  %v2508_v0 = vld [vmem:[%s2910_s13 + $0xac] sm:$0x1] }
  0x43   : > { %2650 = vmatmul.mubr.msk.bf16.gmra.mrb[4].mxu1 %vm327_vm1, %v2362_v35  ;;  %v1472_v13 = vrot.slane %v1471_v59, 4  ;;  %v1846_v14 = vrot.slane %v1812_v3, 1  ;;  %v1847_v15 = vrot.slane %v1813_v4, 1  ;;  %v1923_v16 = vunpack.c.l.bf16 %v2525_v1 }
  0x44   : > { %2655 = vmatprep.mubr.msk.bf16.mxu1 %vm327_vm1, %v2823_v34  ;;  %v1486_v17 = vrot.slane %v1485_v7, 4  ;;  %v1845_v18 = vsel %vm1842_vm5, %v1843_v8, %v1844_v10  ;;  %v1924_v19 = vunpack.c.l.bf16 %v2526_v5  ;;  %v1925_v20 = vunpack.c.h.bf16 %v2525_v1  ;;  %v2519_v1 = vld [vmem:[%s2910_s13 + $0x60] ss:$8 sps:$4 sm:$0xff]   ;;  %v2530_v10 = vld [vmem:[%s2910_s13 + $0x1c] sm:$0x1] }
  0x45   : > { %v1477_v22 = vsel %vm2951_vm4, %v1472_v13, %v1476_v55  ;;  %v1848_v23 = vsel %vm1842_vm5, %v1846_v14, %v1847_v15  ;;  %v1875_v24 = vadd.f32 %v1845_v18, %v1786_v50  ;;  %v1926_v25 = vunpack.c.l.bf16 %v2528_v12  ;;  %v2529_v8 = vld [vmem:[%s2910_s13 + $0x18] ss:$8 sps:$4 sm:$0xff]   ;;  %v2532_v15 = vld [vmem:[%s2910_s13 + $0x24] sm:$0x1] }
  0x46   : > { %v1491_v27 = vsel %vm2951_vm4, %v1486_v17, %v1490_v61  ;;  %v1876_v28 = vadd.f32 %v1848_v23, %v1787_v51  ;;  %v1955_v29 = vrot.slane %v1923_v16, 1  ;;  %v1956_v30 = vrot.slane %v1924_v19, 1 }
  0x47   : > { %2696 = vmatmul.mubr.msk.bf16.vlgmr.msra.gmra.mrb[0].mxu0 %vm327_vm1, %v2826_v36  ;;  %v2477_v34 = vcombine.low %v1477_v22, %v1491_v27  ;;  %v1899_v35 = vadd.f32 %v1891_v58, %v1875_v24  ;;  %v1958_v36 = vrot.slane %v1925_v20, 1  ;;  %v1959_v37 = vrot.slane %v1926_v25, 1 }
  0x48   : > { %2704 = vmatpush3.bf16.msra.mxu0 %v1603_v31  ;;  %2699 = vmatprep.mubr.msk.bf16.mxu0 %vm327_vm1, %v2828_v38  ;;  %v2465_v31 = vld [vmem:[%s2910_s13 + $0x1c] sm:$0x1]  ;;  %v2829_v38 = vld [vmem:[%s2910_s13 + $0xc0] ss:$8 sps:$4 sm:$0xff]   ;;  %v1900_v39 = vadd.f32 %v1892_v11, %v1876_v28  ;;  %v1493_v41 = vshrl.u32 %v2464_v26, 16  ;;  %v1496_v42 = vshll.u32 %v2464_v26, 16  ;;  %v1788_v63 = vunpack.c.l.bf16 %v2495_v48 }
  0x49   : > { %v1960_v43 = vsel %vm1842_vm5, %v1958_v36, %v1959_v37  ;;  %v1502_v46 = vshll.u32 %v2465_v31, 16  ;;  %v1507_v47 = vshrl.u32 %v2466_v33, 16  ;;  %v1510_v53 = vshll.u32 %v2466_v33, 16  ;;  %v2468_v28 = vld [vmem:[%s2910_s13 + $0x28] sm:$0xf] }
  0x4a   : > { %v1988_v50 = vadd.f32 %v1960_v43, %v1900_v39  ;;  %v1495_v51 = vrot.slane %v1493_v41, 4  ;;  %v1498_v52 = vrot.slane %v1496_v42, 5  ;;  %v1516_v57 = vshll.u32 %v2467_v40, 16  ;;  %v2471_v40 = vld [vmem:[%s2910_s13 + $0x34] sm:$0x1] }
  0x4b   : > { %2656 = vmatmul.mubr.msk.bf16.vlgmr.msra.gmra.mrb[0].mxu1 %vm327_vm1, %v2825_v2  ;;  %v1504_v55 = vrot.slane %v1502_v46, 5  ;;  %v1509_v56 = vrot.slane %v1507_v47, 4  ;;  %v1512_v62 = vrot.slane %v1510_v53, 5  ;;  %v1789_v59 = vunpack.c.h.bf16 %v2495_v48 }
  0x4c   : > { %2714 = vmatpush3.bf16.msra.mxu1 %v3063_v32  ;;  %2659 = vmatprep.mubr.msk.bf16.mxu1 %vm327_vm1, %v2827_v6  ;;  %v1957_v32 = vsel %vm1842_vm5, %v1955_v29, %v1956_v30  ;;  %v1996_v60 = vmul.f32 0.25, %v1988_v50  ;;  %v1499_v61 = vor.u32 %v1498_v52, %v1495_v51  ;;  %v1518_v2 = vrot.slane %v1516_v57, 5  ;;  %v2469_v29 = vld [vmem:[%s2910_s13 + $0x2c] sm:$0x1]  ;;  %v2509_v50 = vld [vmem:[%s2910_s13 + $0xb0] ss:$8 sps:$4 sm:$0xff]  }
  0x4d   : > { %v1987_v45 = vadd.f32 %v1957_v32, %v1899_v35  ;;  %v1814_v3 = vunpack.c.l.bf16 %v2505_v49  ;;  %v1815_v4 = vunpack.c.l.bf16 %v2506_v9  ;;  %v1513_v6 = vor.u32 %v1512_v62, %v1509_v56  ;;  %v2470_v35 = vld [vmem:[%s2910_s13 + $0x30] sm:$0xf] }
  0x4e   : > { %v1500_v5 = vrot.slane %v1499_v61, 4  ;;  %v1816_v7 = vunpack.c.h.bf16 %v2505_v49  ;;  %v1817_v11 = vunpack.c.l.bf16 %v2508_v0  ;;  %v1893_v14 = vunpack.c.l.bf16 %v2519_v1  ;;  %v2497_v49 = vld [vmem:[%s2910_s13 + $0xf8] ss:$8 sps:$4 sm:$0xff]   ;;  %v2512_v61 = vld [vmem:[%s2910_s13 + $0xbc] sm:$0x1] }
  0x4f   : > { %2700 = vmatmul.mubr.msk.bf16.gmra.mrb[4].mxu0 %vm327_vm1, %v2830_v21  ;;  %v1995_v54 = vmul.f32 0.25, %v1987_v45  ;;  %v1849_v12 = vrot.slane %v1814_v3, 1  ;;  %v1850_v13 = vrot.slane %v1815_v4, 1  ;;  %v1514_v17 = vrot.slane %v1513_v6, 4 }
  0x50   : > { %2705 = vmatprep.mubr.msk.bf16.mxu0 %vm327_vm1, %v2477_v34  ;;  %v1505_v16 = vsel %vm2951_vm4, %v1500_v5, %v1504_v55  ;;  %v1852_v18 = vrot.slane %v1816_v7, 1  ;;  %v1894_v19 = vunpack.c.h.bf16 %v2519_v1  ;;  %v1853_v21 = vrot.slane %v1817_v11, 1  ;;  %v2534_v11 = vld [vmem:[%s2910_s13 + $0x2c] sm:$0x1] }
  0x51   : > { %v2003_v58 = vpack.c.bf16 %v1996_v60, %v1995_v54  ;;  %v1851_v20 = vsel %vm1842_vm5, %v1849_v12, %v1850_v13  ;;  %v1927_v22 = vunpack.c.l.bf16 %v2529_v8  ;;  %v1928_v23 = vunpack.c.l.bf16 %v2530_v10  ;;  %v2510_v54 = vld [vmem:[%s2910_s13 + $0xb4] sm:$0x1]  ;;  %v2533_v10 = vld [vmem:[%s2910_s13 + $0x28] ss:$8 sps:$4 sm:$0xff]  }
  0x52   : > { %v1519_v24 = vsel %vm2951_vm4, %v1514_v17, %v1518_v2  ;;  %v1877_v25 = vadd.f32 %v1851_v20, %v1788_v63  ;;  %v1929_v26 = vunpack.c.h.bf16 %v2529_v8  ;;  %v1930_v27 = vunpack.c.l.bf16 %v2532_v15  ;;  %v2521_v2 = vld [vmem:[%s2910_s13 + $0x70] ss:$8 sps:$4 sm:$0xff]   ;;  %v2536_v20 = vld [vmem:[%s2910_s13 + $0x34] sm:$0x1] }
  0x53   : > { %2660 = vmatmul.mubr.msk.bf16.gmra.mrb[4].mxu1 %vm327_vm1, %v2829_v38  ;;  %v2478_v30 = vcombine.low %v1505_v16, %v1519_v24  ;;  %v1854_v31 = vsel %vm1842_vm5, %v1852_v18, %v1853_v21  ;;  %v1961_v33 = vrot.slane %v1927_v22, 1  ;;  %v1962_v34 = vrot.slane %v1928_v23, 1 }
  0x54   : > { %2715 = vmatprep.mubr.msk.bf16.mxu1 %vm327_vm1, %v2003_v58  ;;  %v1878_v36 = vadd.f32 %v1854_v31, %v1789_v59  ;;  %v1901_v37 = vadd.f32 %v1893_v14, %v1877_v25  ;;  %v1964_v38 = vrot.slane %v1929_v26, 1  ;;  %v1965_v39 = vrot.slane %v1930_v27, 1  ;;  %v2472_v25 = vld [vmem:[%s2910_s13 + $0x38] sm:$0xf] }
  0x55   : > { %v1963_v32 = vsel %vm1842_vm5, %v1961_v33, %v1962_v34  ;;  %v1521_v41 = vshrl.u32 %v2468_v28, 16  ;;  %v1524_v42 = vshll.u32 %v2468_v28, 16  ;;  %v1530_v43 = vshll.u32 %v2469_v29, 16 }
  0x56   : > { %v1902_v45 = vadd.f32 %v1894_v19, %v1878_v36  ;;  %v1966_v46 = vsel %vm1842_vm5, %v1964_v38, %v1965_v39  ;;  %v1989_v47 = vadd.f32 %v1963_v32, %v1901_v37  ;;  %v1535_v48 = vshrl.u32 %v2470_v35, 16  ;;  %v2474_v36 = vld [vmem:[%s2910_s13 + $0x40] sm:$0xf] }
  0x57   : > { %2706 = vmatmul.mubr.msk.bf16.vlgmr.msra.gmra.mrb[0].mxu0 %vm327_vm1, %v2478_v30  ;;  %v1523_v51 = vrot.slane %v1521_v41, 4  ;;  %v1526_v52 = vrot.slane %v1524_v42, 5  ;;  %v1532_v53 = vrot.slane %v1530_v43, 5  ;;  %v1538_v9 = vshll.u32 %v2470_v35, 16  ;;  %v2473_v30 = vld [vmem:[%s2910_s13 + $0x3c] sm:$0x1] }
  0x58   : > { %v1990_v55 = vadd.f32 %v1966_v46, %v1902_v45  ;;  %v1997_v56 = vmul.f32 0.25, %v1989_v47  ;;  %v1537_v57 = vrot.slane %v1535_v48, 4  ;;  %v1544_v60 = vshll.u32 %v2471_v40, 16  ;;  %v2475_v42 = vld [vmem:[%s2910_s13 + $0x44] sm:$0x1] }
  0x59   : > { %v1527_v62 = vor.u32 %v1526_v52, %v1523_v51  ;;  %v1540_v63 = vrot.slane %v1538_v9, 5  ;;  %v1790_v0 = vunpack.c.l.bf16 %v2497_v49  ;;  %v1791_v1 = vunpack.c.h.bf16 %v2497_v49 }
  0x5a   : > { %v1998_v59 = vmul.f32 0.25, %v1990_v55  ;;  %v1546_v3 = vrot.slane %v1544_v60, 5  ;;  %v1818_v4 = vunpack.c.l.bf16 %v2509_v50  ;;  %v1819_v58 = vunpack.c.l.bf16 %v2510_v54  ;;  %v2513_v54 = vld [vmem:[%s2910_s13 + $0xc0] ss:$8 sps:$4 sm:$0xff]   ;;  %v2514_v55 = vld [vmem:[%s2910_s13 + $0xc4] sm:$0x1] }
  0x5b   : > { %v1528_v5 = vrot.slane %v1527_v62, 4  ;;  %v1541_v6 = vor.u32 %v1540_v63, %v1537_v57  ;;  %v1820_v7 = vunpack.c.h.bf16 %v2509_v50  ;;  %v1821_v8 = vunpack.c.l.bf16 %v2512_v61  ;;  %v2499_v50 = vld [vmem:[%s2910_s13 + $0x108] ss:$8 sps:$4 sm:$0xff]   ;;  %v2516_v62 = vld [vmem:[%s2910_s13 + $0xcc] sm:$0x1] }
  0x5c   : > { %v2004_v12 = vpack.c.bf16 %v1998_v59, %v1997_v56  ;;  %v1855_v13 = vrot.slane %v1818_v4, 1  ;;  %v1856_v14 = vrot.slane %v1819_v58, 1  ;;  %v1895_v15 = vunpack.c.l.bf16 %v2521_v2  ;;  %v2523_v59 = vld [vmem:[%s2910_s13 + $0x80] ss:$8 sps:$4 sm:$0xff]  }
  0x5d   : > { %v1533_v16 = vsel %vm2951_vm4, %v1528_v5, %v1532_v53  ;;  %v1542_v17 = vrot.slane %v1541_v6, 4  ;;  %v1858_v18 = vrot.slane %v1820_v7, 1  ;;  %v1859_v19 = vrot.slane %v1821_v8, 1 }
  0x5e   : > { %2716 = vmatmul.mubr.msk.bf16.vlgmr.msra.gmra.mrb[8].mxu1 %vm327_vm1, %v2004_v12  ;;  %v1857_v21 = vsel %vm1842_vm5, %v1855_v13, %v1856_v14  ;;  %v1896_v22 = vunpack.c.h.bf16 %v2521_v2  ;;  %v1931_v23 = vunpack.c.l.bf16 %v2533_v10  ;;  %v1932_v24 = vunpack.c.l.bf16 %v2534_v11  ;;  %v2537_v11 = vld [vmem:[%s2910_s13 + $0x38] ss:$8 sps:$4 sm:$0xff]   ;;  %v2538_v12 = vld [vmem:[%s2910_s13 + $0x3c] sm:$0x1] }
  0x5f   : > { %v1547_v26 = vsel %vm2951_vm4, %v1542_v17, %v1546_v3  ;;  %v1860_v27 = vsel %vm1842_vm5, %v1858_v18, %v1859_v19  ;;  %v1879_v28 = vadd.f32 %v1857_v21, %v1790_v0  ;;  %v1933_v29 = vunpack.c.h.bf16 %v2533_v10  ;;  %v2540_v21 = vld [vmem:[%s2910_s13 + $0x44] sm:$0x1] }
  0x60   : > { %v2479_v31 = vcombine.low %v1533_v16, %v1547_v26  ;;  %v1880_v33 = vadd.f32 %v1860_v27, %v1791_v1  ;;  %v1934_v34 = vunpack.c.l.bf16 %v2536_v20  ;;  %v1967_v35 = vrot.slane %v1931_v23, 1 }
  0x61   : > { %v1903_v37 = vadd.f32 %v1895_v15, %v1879_v28  ;;  %v1968_v38 = vrot.slane %v1932_v24, 1  ;;  %v1970_v39 = vrot.slane %v1933_v29, 1  ;;  %v1549_v32 = vshrl.u32 %v2472_v25, 16 }
  0x62   : > { %2709 = vmatprep.mubr.msk.bf16.mxu0 %vm327_vm1, %v2479_v31  ;;  %v1904_v40 = vadd.f32 %v1896_v22, %v1880_v33  ;;  %v1971_v41 = vrot.slane %v1934_v34, 1  ;;  %v1552_v43 = vshll.u32 %v2472_v25, 16  ;;  %v1558_v45 = vshll.u32 %v2473_v30, 16 }
  0x63   : > { %v1969_v46 = vsel %vm1842_vm5, %v1967_v35, %v1968_v38  ;;  %v1551_v47 = vrot.slane %v1549_v32, 4  ;;  %v1563_v48 = vshrl.u32 %v2474_v36, 16  ;;  %v1566_v49 = vshll.u32 %v2474_v36, 16 }
  0x64   : > { %v1972_v51 = vsel %vm1842_vm5, %v1970_v39, %v1971_v41  ;;  %v1991_v52 = vadd.f32 %v1969_v46, %v1903_v37  ;;  %v1554_v53 = vrot.slane %v1552_v43, 5  ;;  %v1560_v9 = vrot.slane %v1558_v45, 5 }
  0x65   : > { %v1992_v56 = vadd.f32 %v1972_v51, %v1904_v40  ;;  %v1565_v57 = vrot.slane %v1563_v48, 4  ;;  %v1568_v60 = vrot.slane %v1566_v49, 5  ;;  %v1572_v61 = vshll.u32 %v2475_v42, 16 }
  0x66   : > { %v1999_v63 = vmul.f32 0.25, %v1991_v52  ;;  %v1555_v0 = vor.u32 %v1554_v53, %v1551_v47  ;;  %v1792_v1 = vunpack.c.l.bf16 %v2499_v50  ;;  %v1793_v2 = vunpack.c.h.bf16 %v2499_v50 }
  0x67   : > { %v2000_v3 = vmul.f32 0.25, %v1992_v56  ;;  %v1569_v4 = vor.u32 %v1568_v60, %v1565_v57  ;;  %v1574_v58 = vrot.slane %v1572_v61, 5  ;;  %v1822_v5 = vunpack.c.l.bf16 %v2513_v54 }
  0x68   : > { %v1556_v6 = vrot.slane %v1555_v0, 4  ;;  %v1823_v7 = vunpack.c.l.bf16 %v2514_v55  ;;  %v1824_v8 = vunpack.c.h.bf16 %v2513_v54  ;;  %v1825_v10 = vunpack.c.l.bf16 %v2516_v62 }
  0x69   : > { %v2005_v13 = vpack.c.bf16 %v2000_v3, %v1999_v63  ;;  %v1570_v14 = vrot.slane %v1569_v4, 4  ;;  %v1861_v15 = vrot.slane %v1822_v5, 1  ;;  %v1897_v16 = vunpack.c.l.bf16 %v2523_v59 }
  0x6a   : > { %v1561_v17 = vsel %vm2951_vm4, %v1556_v6, %v1560_v9  ;;  %v1862_v18 = vrot.slane %v1823_v7, 1  ;;  %v1864_v19 = vrot.slane %v1824_v8, 1  ;;  %v1865_v20 = vrot.slane %v1825_v10, 1 }
  0x6b   : > { %2719 = vmatprep.mubr.msk.bf16.mxu1 %vm327_vm1, %v2005_v13  ;;  %v1575_v22 = vsel %vm2951_vm4, %v1570_v14, %v1574_v58  ;;  %v1898_v23 = vunpack.c.h.bf16 %v2523_v59  ;;  %v1935_v24 = vunpack.c.l.bf16 %v2537_v11  ;;  %v1936_v25 = vunpack.c.l.bf16 %v2538_v12 }
  0x6c   : > { %v2480_v26 = vcombine.low %v1561_v17, %v1575_v22  ;;  %v1863_v27 = vsel %vm1842_vm5, %v1861_v15, %v1862_v18  ;;  %v1866_v28 = vsel %vm1842_vm5, %v1864_v19, %v1865_v20  ;;  %v1937_v29 = vunpack.c.h.bf16 %v2537_v11 }
  0x6d   : > { %v1881_v30 = vadd.f32 %v1863_v27, %v1792_v1  ;;  %v1882_v31 = vadd.f32 %v1866_v28, %v1793_v2  ;;  %v1938_v33 = vunpack.c.l.bf16 %v2540_v21  ;;  %v1973_v34 = vrot.slane %v1935_v24, 1 }
  0x6e   : > { %2710 = vmatmul.mubr.msk.bf16.gmra.mrb[4].mxu0 %vm327_vm1, %v2480_v26  ;;  %v1974_v35 = vrot.slane %v1936_v25, 1  ;;  %v1976_v36 = vrot.slane %v1937_v29, 1 }
  0x6f   : > { %v1905_v44 = vadd.f32 %v1897_v16, %v1881_v30  ;;  %v1906_v37 = vadd.f32 %v1898_v23, %v1882_v31  ;;  %v1977_v38 = vrot.slane %v1938_v33, 1 }
  0x70   : > { %v1975_v39 = vsel %vm1842_vm5, %v1973_v34, %v1974_v35 }
  0x71   : > { %v1978_v32 = vsel %vm1842_vm5, %v1976_v36, %v1977_v38  ;;  %v1993_v40 = vadd.f32 %v1975_v39, %v1905_v44 }
  0x72   : > { %v1994_v41 = vadd.f32 %v1978_v32, %v1906_v37 }
  0x73   : > { %v2001_v42 = vmul.f32 0.25, %v1993_v40 }
  0x74   : > { %v2002_v43 = vmul.f32 0.25, %v1994_v41 }
  0x76   : > { %v2006_v45 = vpack.c.bf16 %v2002_v43, %v2001_v42 }
  0x78   : > { %2720 = vmatmul.mubr.msk.bf16.gmra.mrb[12].mxu1 %vm327_vm1, %v2006_v45 }
 0x11e   : > { %v2657_v46 = vpop.f32.mrb[0].mxu1 }
 0x11f   : > { %v822_v47 = vpop.f32.mrb[1].mxu1 }
 0x120   : > { %v2658_v48 = vpop.f32.mrb[2].mxu1 }
 0x121   : > { %v825_v49 = vpop.f32.mrb[3].mxu1 }
 0x126   : > { %v3173_v50 = vpop.f32.mrb[4].mxu1 }
 0x127   : > { %v3175_v51 = vpop.f32.mrb[5].mxu1 }
 0x128   : > { %v3177_v52 = vpop.f32.mrb[6].mxu1 }
 0x129   : > { %v3179_v53 = vpop.f32.mrb[7].mxu1 }
 0x12a   : > { %v2707_v9 = vpop.f32.mrb[0].mxu0 }
 0x12b   : > { %v2723_v54 = vadd.f32 %v2707_v9, %v2657_v46  ;;  %v1639_v55 = vpop.f32.mrb[1].mxu0 }
 0x12c   : > { %v2724_v56 = vadd.f32 %v1639_v55, %v822_v47  ;;  %v2708_v57 = vpop.f32.mrb[2].mxu0 }
 0x12d   : > { %v2559_v60 = vpack.c.bf16 %v2723_v54, %v2723_v54  ;;  %v2725_v61 = vadd.f32 %v2708_v57, %v2658_v48  ;;  %v1642_v62 = vpop.f32.mrb[3].mxu0  ;;  %v1704_v2 = vmul.f32 %v2723_v54, %v2723_v54  ;;  %v1682_v7 = vsel %vm1678_vm7, %v2723_v54, 0.0 }
 0x12e   : > { %v1702_v63 = vmul.f32 %v2724_v56, %v2724_v56  ;;  %v2557_v0 = vpack.c.bf16 %v2724_v56, %v2724_v56  ;;  %v2726_v1 = vadd.f32 %v1642_v62, %v825_v49  ;;  %v1679_v3 = vsel %vm1678_vm7, %v2724_v56, 0.0 }
 0x12f   : > { %1772 = vst.msk [vmem:[%s3190_s29 + $0x8] sm:$0xf] %vm1769_vm6, %v2559_v60  ;;  %v2560_v59 = vpack.c.bf16 %v2725_v61, %v2725_v61  ;;  %v1705_v10 = vmul.f32 %v2725_v61, %v2725_v61  ;;  %v1713_v15 = vsel %vm1678_vm7, %v1704_v2, 0.0  ;;  %v1684_v19 = vsel %vm1678_vm7, %v2725_v61, 0.0 }
 0x130   : > { %1770 = vst.msk [vmem:[%s3190_s29] sm:$0xf] %vm1769_vm6, %v2557_v0  ;;  %v1680_v4 = vsel %vm1678_vm7, %v2726_v1, 0.0  ;;  %v1703_v58 = vmul.f32 %v2726_v1, %v2726_v1  ;;  %v2558_v5 = vpack.c.bf16 %v2726_v1, %v2726_v1  ;;  %v1710_v8 = vsel %vm1678_vm7, %v1702_v63, 0.0 }
 0x131   : > { %1773 = vst.msk [vmem:[%s3190_s29 + $0xc] sm:$0xf] %vm1769_vm6, %v2560_v59  ;;  %v1681_v6 = vadd.f32 %v1680_v4, %v1679_v3  ;;  %v2717_v12 = vpop.f32.mrb[8].mxu1  ;;  %v1715_v26 = vsel %vm1678_vm7, %v1705_v10, 0.0 }
 0x132   : > { %v1711_v11 = vsel %vm1678_vm7, %v1703_v58, 0.0  ;;  %1771 = vst.msk [vmem:[%s3190_s29 + $0x4] sm:$0xf] %vm1769_vm6, %v2558_v5  ;;  %v2112_v16 = vmul.f32 %v2717_v12, %v2717_v12  ;;  %v2567_v17 = vpack.c.bf16 %v2717_v12, %v2717_v12  ;;  %v2057_v18 = vpop.f32.mrb[9].mxu1  ;;  %v2091_v25 = vsel %vm1678_vm7, %v2717_v12, 0.0 }
 0x133   : > { %v1683_v13 = vadd.f32 %v1682_v7, %v1681_v6  ;;  %v1712_v14 = vadd.f32 %v1711_v11, %v1710_v8  ;;  %v2088_v20 = vsel %vm1678_vm7, %v2057_v18, 0.0  ;;  %v2110_v21 = vmul.f32 %v2057_v18, %v2057_v18  ;;  %v2718_v23 = vpop.f32.mrb[10].mxu1 }
 0x134   : > { %v2565_v22 = vpack.c.bf16 %v2057_v18, %v2057_v18  ;;  %2178 = vst.msk [vmem:[%s3210_s8 + $0x8] sm:$0xf] %vm1769_vm6, %v2567_v17  ;;  %v2113_v27 = vmul.f32 %v2718_v23, %v2718_v23  ;;  %v2568_v28 = vpack.c.bf16 %v2718_v23, %v2718_v23  ;;  %v2060_v29 = vpop.f32.mrb[11].mxu1  ;;  %v2121_v37 = vsel %vm1678_vm7, %v2112_v16, 0.0 }
 0x135   : > { %v1714_v24 = vadd.f32 %v1713_v15, %v1712_v14  ;;  %v2118_v30 = vsel %vm1678_vm7, %v2110_v21, 0.0  ;;  %v2089_v31 = vsel %vm1678_vm7, %v2060_v29, 0.0  ;;  %v2111_v33 = vmul.f32 %v2060_v29, %v2060_v29 }
 0x136   : > { %2176 = vst.msk [vmem:[%s3210_s8] sm:$0xf] %vm1769_vm6, %v2565_v22  ;;  %v2566_v34 = vpack.c.bf16 %v2060_v29, %v2060_v29  ;;  %2179 = vst.msk [vmem:[%s3210_s8 + $0xc] sm:$0xf] %vm1769_vm6, %v2568_v28  ;;  %v2090_v35 = vadd.f32 %v2089_v31, %v2088_v20  ;;  %v1685_v36 = vadd.f32 %v1684_v19, %v1683_v13  ;;  %v2093_v38 = vsel %vm1678_vm7, %v2718_v23, 0.0 }
 0x137   : > { %v1716_v44 = vadd.f32 %v1715_v26, %v1714_v24  ;;  %v2119_v39 = vsel %vm1678_vm7, %v2111_v33, 0.0  ;;  %v2123_v41 = vsel %vm1678_vm7, %v2113_v27, 0.0 }
 0x138   : > { %2177 = vst.msk [vmem:[%s3210_s8 + $0x4] sm:$0xf] %vm1769_vm6, %v2566_v34  ;;  %v2092_v32 = vadd.f32 %v2091_v25, %v2090_v35  ;;  %v2120_v40 = vadd.f32 %v2119_v39, %v2118_v30 }
 0x13a   : > { %v2122_v42 = vadd.f32 %v2121_v37, %v2120_v40  ;;  %v2094_v43 = vadd.f32 %v2093_v38, %v2092_v32 }
 0x13c   : > { %v2124_v45 = vadd.f32 %v2123_v41, %v2122_v42 }
 0x141   : > { %v2711_v46 = vpop.f32.mrb[4].mxu0 }
 0x142   : > { %v2727_v47 = vadd.f32 %v2711_v46, %v3173_v50  ;;  %v1655_v48 = vpop.f32.mrb[5].mxu0 }
 0x143   : > { %v2728_v49 = vadd.f32 %v1655_v48, %v3175_v51  ;;  %v2712_v9 = vpop.f32.mrb[6].mxu0 }
 0x144   : > { %v2563_v54 = vpack.c.bf16 %v2727_v47, %v2727_v47  ;;  %v2729_v55 = vadd.f32 %v2712_v9, %v3177_v52  ;;  %v1658_v56 = vpop.f32.mrb[7].mxu0  ;;  %v1708_v1 = vmul.f32 %v2727_v47, %v2727_v47  ;;  %v1690_v4 = vsel %vm1678_vm7, %v2727_v47, 0.0 }
 0x145   : > { %v1686_v57 = vsel %vm1678_vm7, %v2728_v49, 0.0  ;;  %v1706_v60 = vmul.f32 %v2728_v49, %v2728_v49  ;;  %v2561_v61 = vpack.c.bf16 %v2728_v49, %v2728_v49  ;;  %v2730_v62 = vadd.f32 %v1658_v56, %v3179_v53 }
 0x146   : > { %1776 = vst.msk [vmem:[%s3190_s29 + $0x18] sm:$0xf] %vm1769_vm6, %v2563_v54  ;;  %v1687_v63 = vadd.f32 %v1686_v57, %v1685_v36  ;;  %v2564_v51 = vpack.c.bf16 %v2729_v55, %v2729_v55  ;;  %v1709_v58 = vmul.f32 %v2729_v55, %v2729_v55  ;;  %v1692_v8 = vsel %vm1678_vm7, %v2729_v55, 0.0 }
 0x147   : > { %v1717_v50 = vsel %vm1678_vm7, %v1706_v60, 0.0  ;;  %1774 = vst.msk [vmem:[%s3190_s29 + $0x10] sm:$0xf] %vm1769_vm6, %v2561_v61  ;;  %v1688_v0 = vsel %vm1678_vm7, %v2730_v62, 0.0  ;;  %v1707_v52 = vmul.f32 %v2730_v62, %v2730_v62  ;;  %v2562_v3 = vpack.c.bf16 %v2730_v62, %v2730_v62 }
 0x148   : > { %v1718_v2 = vadd.f32 %v1717_v50, %v1716_v44  ;;  %v1689_v59 = vadd.f32 %v1688_v0, %v1687_v63  ;;  %1777 = vst.msk [vmem:[%s3190_s29 + $0x1c] sm:$0xf] %vm1769_vm6, %v2564_v51  ;;  %v1721_v10 = vsel %vm1678_vm7, %v1708_v1, 0.0  ;;  %v1723_v22 = vsel %vm1678_vm7, %v1709_v58, 0.0 }
 0x149   : > { %v1719_v53 = vsel %vm1678_vm7, %v1707_v52, 0.0  ;;  %1775 = vst.msk [vmem:[%s3190_s29 + $0x14] sm:$0xf] %vm1769_vm6, %v2562_v3 }
 0x14a   : > { %v1691_v5 = vadd.f32 %v1690_v4, %v1689_v59  ;;  %v1720_v6 = vadd.f32 %v1719_v53, %v1718_v2 }
 0x14b   : > { %v2721_v7 = vpop.f32.mrb[12].mxu1 }
 0x14c   : > { %v2571_v11 = vpack.c.bf16 %v2721_v7, %v2721_v7  ;;  %v2073_v12 = vpop.f32.mrb[13].mxu1  ;;  %v1693_v13 = vadd.f32 %v1692_v8, %v1691_v5  ;;  %v1722_v18 = vadd.f32 %v1721_v10, %v1720_v6  ;;  %v2099_v19 = vsel %vm1678_vm7, %v2721_v7, 0.0 }
 0x14d   : > { %v2095_v14 = vsel %vm1678_vm7, %v2073_v12, 0.0  ;;  %v2114_v15 = vmul.f32 %v2073_v12, %v2073_v12  ;;  %v2569_v16 = vpack.c.bf16 %v2073_v12, %v2073_v12  ;;  %v2722_v17 = vpop.f32.mrb[14].mxu1  ;;  %v2116_v20 = vmul.f32 %v2721_v7, %v2721_v7 }
 0x14e   : > { %2182 = vst.msk [vmem:[%s3210_s8 + $0x18] sm:$0xf] %vm1769_vm6, %v2571_v11  ;;  %v2096_v21 = vadd.f32 %v2095_v14, %v2094_v43  ;;  %v2076_v23 = vpop.f32.mrb[15].mxu1  ;;  %v2572_v25 = vpack.c.bf16 %v2722_v17, %v2722_v17  ;;  %v1694_v26 = vrot.slane %v1693_v13, 4  ;;  %v2117_v29 = vmul.f32 %v2722_v17, %v2722_v17 }
 0x14f   : > { %v2125_v24 = vsel %vm1678_vm7, %v2114_v15, 0.0  ;;  %2180 = vst.msk [vmem:[%s3210_s8 + $0x10] sm:$0xf] %vm1769_vm6, %v2569_v16  ;;  %v2097_v27 = vsel %vm1678_vm7, %v2076_v23, 0.0  ;;  %v2115_v31 = vmul.f32 %v2076_v23, %v2076_v23  ;;  %v2101_v33 = vsel %vm1678_vm7, %v2722_v17, 0.0 }
 0x150   : > { %v2126_v28 = vadd.f32 %v2125_v24, %v2124_v45  ;;  %v2098_v30 = vadd.f32 %v2097_v27, %v2096_v21  ;;  %2183 = vst.msk [vmem:[%s3210_s8 + $0x1c] sm:$0xf] %vm1769_vm6, %v2572_v25  ;;  %v1695_v34 = vadd.f32 %v1694_v26, %v1693_v13  ;;  %v2570_v35 = vpack.c.bf16 %v2076_v23, %v2076_v23 }
 0x151   : > { %v1724_v36 = vadd.f32 %v1723_v22, %v1722_v18  ;;  %v2129_v44 = vsel %vm1678_vm7, %v2116_v20, 0.0  ;;  %v2127_v38 = vsel %vm1678_vm7, %v2115_v31, 0.0  ;;  %v2131_v41 = vsel %vm1678_vm7, %v2117_v29, 0.0 }
 0x152   : > { %v2100_v37 = vadd.f32 %v2099_v19, %v2098_v30  ;;  %v1696_v39 = vrot.slane %v1695_v34, 2  ;;  %v2128_v32 = vadd.f32 %v2127_v38, %v2126_v28  ;;  %2181 = vst.msk [vmem:[%s3210_s8 + $0x14] sm:$0xf] %vm1769_vm6, %v2570_v35 }
 0x153   : > { %v1725_v40 = vrot.slane %v1724_v36, 4 }
 0x154   : > { %v2102_v42 = vadd.f32 %v2101_v33, %v2100_v37  ;;  %v2130_v43 = vadd.f32 %v2129_v44, %v2128_v32  ;;  %v1697_v46 = vadd.f32 %v1696_v39, %v1695_v34 }
 0x155   : > { %v1726_v45 = vadd.f32 %v1725_v40, %v1724_v36 }
 0x156   : > { %v2103_v47 = vrot.slane %v2102_v42, 4  ;;  %v2132_v48 = vadd.f32 %v2131_v41, %v2130_v43  ;;  %v1698_v9 = vrot.slane %v1697_v46, 1 }
 0x157   : > { %v1727_v49 = vrot.slane %v1726_v45, 2 }
 0x158   : > { %v2104_v54 = vadd.f32 %v2103_v47, %v2102_v42  ;;  %v2133_v56 = vrot.slane %v2132_v48, 4  ;;  %v1699_v57 = vadd.f32 %v1698_v9, %v1697_v46 }
 0x159   : > { %v1728_v55 = vadd.f32 %v1727_v49, %v1726_v45 }
 0x15a   : > { %v2105_v60 = vrot.slane %v2104_v54, 2  ;;  %v2134_v62 = vadd.f32 %v2133_v56, %v2132_v48  ;;  %1701 = vst.msk [vmem:[%s277_s11] sm:$0x1] %vm1700_vm8, %v1699_v57 }
 0x15b   : > { %v1729_v61 = vrot.slane %v1728_v55, 1 }
 0x15c   : > { %v2106_v63 = vadd.f32 %v2105_v60, %v2104_v54  ;;  %v2135_v51 = vrot.slane %v2134_v62, 2 }
 0x15d   : > { %v1730_v50 = vadd.f32 %v1729_v61, %v1728_v55 }
 0x15e   : > { %v2107_v0 = vrot.slane %v2106_v63, 1  ;;  %v2136_v52 = vadd.f32 %v2135_v51, %v2134_v62 }
 0x15f   : > { %1732 = vrot.lane.b32.xlu0 %v1730_v50, %s2839_s12 }
 0x160   : > { %v2108_v1 = vadd.f32 %v2107_v0, %v2106_v63  ;;  %v2137_v2 = vrot.slane %v2136_v52, 1 }
 0x162   : > { %2109 = vst.msk [vmem:[%s285_s15] sm:$0x1] %vm1700_vm8, %v2108_v1  ;;  %v2138_v59 = vadd.f32 %v2137_v2, %v2136_v52 }
 0x164   : > { %2140 = vrot.lane.b32.xlu0 %v2138_v59, %s2839_s12 }
 0x1d1   : > { %v1733_v3 = vpop.permute.xlu0 %1732 }
 0x1d2   : > { %1736 = vst.msk [vmem:[%s277_s11] sm:$0x1] %vm1735_vm9, %v1733_v3 }
 0x1d6   : > { %v2141_v4 = vpop.permute.xlu0 %2140 }
 0x1d7   : > { %2143 = vst.msk [vmem:[%s285_s15] sm:$0x1] %vm1735_vm9, %v2141_v4 }
 0x1d8 PF: > { %s17_s21 = sadd.s32 1, %s2837_s21  }
 0x1d9   : > { %p14_p5 = scmp.ge.s32.totalorder %s17_s21, 4  }
 0x1db   :  { %16 = sbr.rel (!%p14_p5) target bundleno = 1 (0x1), region = 111 }

</bundles_post_ra>
